<compile_context>
chip_gen: v7x
topology: tpu7x:2x2x1
jax: 0.10.0
libtpu: 0.0.40
codegen_flags: <defaults>
</compile_context>

<pallas_src>
import functools

import jax
import jax.numpy as jnp
from jax.experimental import pallas as pl
from jax.experimental.pallas import tpu as pltpu

EPS = 1e-5


# --------------------------------------------------------------------------
# Fused decoder-layer Pallas kernel (whole batch, no grid)
# --------------------------------------------------------------------------
def _fused_layer_kernel(*refs, n_head, has_self_mask, has_cross_mask, want_norm):
    refs = list(refs)
    ctx_ref = refs.pop()                              # VMEM scratch (B, Sq, C) f32
    o_norm_ref = refs.pop() if want_norm else None    # optional: shared-norm output
    o_x_ref = refs.pop()                              # layer output x
    it = iter(refs)

    x_ref = next(it)
    mem_ref = next(it)
    dpos_ref = next(it)
    epos_ref = next(it)
    self_mask = next(it)[...] if has_self_mask else None     # (B, Sq, Sq) additive
    cross_mask = next(it)[...] if has_cross_mask else None   # (B, Sq, Sk) additive

    ln_w_ref = next(it); ln_b_ref = next(it)
    sa_qk_w_ref = next(it); sa_qk_b_ref = next(it)
    sa_v_w_ref = next(it); sa_v_b_ref = next(it)
    sa_o_w_ref = next(it); sa_o_b_ref = next(it)
    ca_q_w_ref = next(it); ca_q_b_ref = next(it)
    ca_k_w_ref = next(it); ca_k_b_ref = next(it)
    ca_v_w_ref = next(it); ca_v_b_ref = next(it)
    ca_o_w_ref = next(it); ca_o_b_ref = next(it)
    ffn1_w_ref = next(it); ffn1_b_ref = next(it)
    ffn2_w_ref = next(it); ffn2_b_ref = next(it)

    B, Sq, C = x_ref.shape
    Sk = mem_ref.shape[1]
    D = C // n_head
    bf16 = jnp.bfloat16

    # Flatten batch into the matmul row dimension (M = B*Sq / B*Sk).
    x = x_ref[...].astype(jnp.float32).reshape(B * Sq, C)
    mem = mem_ref[...].astype(jnp.float32).reshape(B * Sk, C)
    dpos = dpos_ref[...].astype(jnp.float32).reshape(B * Sq, C)
    epos = epos_ref[...].astype(jnp.float32).reshape(B * Sk, C)

    ln_w = ln_w_ref[...]   # (4, C): rows = [n1, n2, n3, shared final norm]
    ln_b = ln_b_ref[...]

    def layernorm(v, row):
        w = ln_w[row:row + 1, :]
        b = ln_b[row:row + 1, :]
        mean = jnp.mean(v, axis=-1, keepdims=True)
        zm = v - mean
        var = jnp.mean(zm * zm, axis=-1, keepdims=True)
        # ANE LayerNorm ordering: (zero_mean * denom + bias) * weight
        return (zm * jax.lax.rsqrt(var + EPS) + b) * w

    def attention(q, k, v, s_kv, mask, o_w, o_b):
        # q: (B*Sq, C) f32 (1/sqrt(D) already folded into q weights);
        # k, v: (B*s_kv, C) f32.  Per-head contexts are written into the lane
        # slices of the VMEM scratch; ONE full-C output-projection matmul after.
        q3 = q.reshape(B, Sq, C)
        k3 = k.reshape(B, s_kv, C)
        v3 = v.reshape(B, s_kv, C)
        for h in range(n_head):
            sl = slice(h * D, (h + 1) * D)
            s = jnp.einsum('bqd,bkd->bqk',
                           q3[..., sl].astype(bf16), k3[..., sl].astype(bf16),
                           preferred_element_type=jnp.float32)      # (B, Sq, s_kv)
            if mask is not None:
                s = s + mask
            s = s - jnp.max(s, axis=-1, keepdims=True)
            e = jnp.exp(s)
            w = e * pl.reciprocal(jnp.sum(e, axis=-1, keepdims=True), approx=True)
            ctx = jnp.einsum('bqk,bkd->bqd',
                             w.astype(bf16), v3[..., sl].astype(bf16),
                             preferred_element_type=jnp.float32)    # (B, Sq, D)
            ctx_ref[:, :, sl] = ctx
        ctx_all = ctx_ref[...].reshape(B * Sq, C).astype(bf16)
        return jnp.dot(ctx_all, o_w, preferred_element_type=jnp.float32) + o_b

    # ---------------- self-attention (pre-norm) ----------------
    t2 = layernorm(x, 0)
    qk_in = (t2 + dpos).astype(bf16)
    qk = jnp.dot(qk_in, sa_qk_w_ref[...],
                 preferred_element_type=jnp.float32) + sa_qk_b_ref[...]   # (B*Sq, 2C)
    v = jnp.dot(t2.astype(bf16), sa_v_w_ref[...],
                preferred_element_type=jnp.float32) + sa_v_b_ref[...]
    x = x + attention(qk[:, :C], qk[:, C:], v, Sq, self_mask,
                      sa_o_w_ref[...], sa_o_b_ref[...])

    # ---------------- cross-attention ----------------
    t2 = layernorm(x, 1)
    q = jnp.dot((t2 + dpos).astype(bf16), ca_q_w_ref[...],
                preferred_element_type=jnp.float32) + ca_q_b_ref[...]
    k = jnp.dot((mem + epos).astype(bf16), ca_k_w_ref[...],
                preferred_element_type=jnp.float32) + ca_k_b_ref[...]
    v = jnp.dot(mem.astype(bf16), ca_v_w_ref[...],
                preferred_element_type=jnp.float32) + ca_v_b_ref[...]
    x = x + attention(q, k, v, Sk, cross_mask, ca_o_w_ref[...], ca_o_b_ref[...])

    # ---------------- FFN ----------------
    t2 = layernorm(x, 2)
    h1 = jnp.dot(t2.astype(bf16), ffn1_w_ref[...],
                 preferred_element_type=jnp.float32) + ffn1_b_ref[...]
    # TODO(synk): exact-erf GELU (PyTorch default); tanh approximation used.
    h1 = 0.5 * h1 * (1.0 + jnp.tanh(0.7978845608028654 * (h1 + 0.044715 * h1 * h1 * h1)))
    x = x + jnp.dot(h1.astype(bf16), ffn2_w_ref[...],
                    preferred_element_type=jnp.float32) + ffn2_b_ref[...]

    o_x_ref[...] = x.reshape(B, Sq, C).astype(o_x_ref.dtype)
    if want_norm:
        o_norm_ref[...] = layernorm(x, 3).reshape(B, Sq, C).astype(o_norm_ref.dtype)


_WEIGHT_KEYS = ("ln_w", "ln_b",
                "sa_qk_w", "sa_qk_b", "sa_v_w", "sa_v_b", "sa_o_w", "sa_o_b",
                "ca_q_w", "ca_q_b", "ca_k_w", "ca_k_b",
                "ca_v_w", "ca_v_b", "ca_o_w", "ca_o_b",
                "ffn1_w", "ffn1_b", "ffn2_w", "ffn2_b")


def _fused_layer_call(x, mem, dpos, epos, self_mask, cross_mask, lp, n_head, want_norm):
    B, Sq, C = x.shape
    has_self = self_mask is not None
    has_cross = cross_mask is not None

    inputs = [x, mem, dpos, epos]
    if has_self:
        inputs.append(self_mask)
    if has_cross:
        inputs.append(cross_mask)
    for kname in _WEIGHT_KEYS:
        inputs.append(lp[kname])

    kern = functools.partial(_fused_layer_kernel, n_head=n_head,
                             has_self_mask=has_self, has_cross_mask=has_cross,
                             want_norm=want_norm)
    if want_norm:
        out_shape = (jax.ShapeDtypeStruct((B, Sq, C), x.dtype),
                     jax.ShapeDtypeStruct((B, Sq, C), x.dtype))
    else:
        out_shape = jax.ShapeDtypeStruct((B, Sq, C), x.dtype)

    out = pl.pallas_call(
        kern,
        out_shape=out_shape,
        scratch_shapes=[pltpu.VMEM((B, Sq, C), jnp.float32)],   # per-head ctx buffer
        compiler_params=pltpu.CompilerParams(vmem_limit_bytes=32 * 1024 * 1024),
    )(*inputs)
    if want_norm:
        return out[0], out[1]
    return out, None


# --------------------------------------------------------------------------
# Decoder wiring (JAX glue around the fused kernel)
# --------------------------------------------------------------------------
def _combined_mask(B, Sq, Sk, qk_mask=None, k_mask=None, dtype=jnp.float32):
    # Reference masks live in ANE layout: qk_mask (B, Sk, 1, Sq), k_mask (B, Sk, 1, 1).
    # Convert to additive (B, Sq, Sk); return None when no mask is supplied.
    if qk_mask is None and k_mask is None:
        return None
    m = jnp.zeros((B, Sq, Sk), dtype)
    if qk_mask is not None:
        m = m + jnp.transpose(qk_mask[:, :, 0, :], (0, 2, 1))
    if k_mask is not None:
        m = m + jnp.transpose(k_mask[:, :, 0, :], (0, 2, 1))  # (B,1,Sk) broadcast over Sq
    return m


def _to_bsc(t):   # (B, C, 1, S) -> (B, S, C)
    return jnp.transpose(t[:, :, 0, :], (0, 2, 1))


def _to_bc1s(t):  # (B, S, C) -> (B, C, 1, S)
    return jnp.transpose(t, (0, 2, 1))[:, :, None, :]


def transformer_decoder_forward(prepared_layers, decoder_embed, encoder_embed,
                                decoder_pos_embed, encoder_pos_embed,
                                encoder_k_mask=None, decoder_k_mask=None,
                                decoder_qk_mask=None, return_intermediate=False,
                                early_exit_from_layer_idx=None, n_head=4):
    num_layers = len(prepared_layers)
    if early_exit_from_layer_idx:
        assert 0 < early_exit_from_layer_idx < num_layers
    num_used = early_exit_from_layer_idx if early_exit_from_layer_idx else num_layers

    x = _to_bsc(decoder_embed)
    mem = _to_bsc(encoder_embed)
    dpos = _to_bsc(decoder_pos_embed)
    epos = _to_bsc(encoder_pos_embed)
    B, Sq, _ = x.shape
    Sk = mem.shape[1]
    self_mask = _combined_mask(B, Sq, Sq, decoder_qk_mask, decoder_k_mask, x.dtype)
    cross_mask = _combined_mask(B, Sq, Sk, None, encoder_k_mask, x.dtype)

    intermediates = []
    normed = None
    for idx in range(num_used):
        lp = prepared_layers[idx]
        # Shared final LayerNorm only needed on intermediates or the last used layer.
        want_norm = return_intermediate or (idx == num_used - 1)
        x, ni = _fused_layer_call(x, mem, dpos, epos, self_mask, cross_mask,
                                  lp, n_head, want_norm)
        if want_norm:
            normed = ni
        if return_intermediate:
            intermediates.append(ni)
    if return_intermediate:
        return jnp.stack([_to_bc1s(t) for t in intermediates], 0)
    return _to_bc1s(normed)


# --------------------------------------------------------------------------
# Parameter handling
#   init_params(): raw PyTorch Conv2d convention (Cout, Cin), f32.
#   prepare_params(): one-time conversion to kernel-ready layout:
#     - weights transposed to (Cin, Cout) and cast to bf16 (biases stay f32),
#     - self-attn q/k fused into a (C, 2C) matrix (shared input t2 + pos),
#     - 1/sqrt(D) scale folded into q weights/biases,
#     - LayerNorm params stacked as (4, C) rows [n1, n2, n3, shared final norm].
# --------------------------------------------------------------------------
def _init_attn(key, C):
    ks = jax.random.split(key, 8)
    w = lambda k, o, i: jax.random.normal(k, (o, i), jnp.float32) * 0.05
    b = lambda k, o: jax.random.normal(k, (o,), jnp.float32) * 0.02
    return dict(q_w=w(ks[0], C, C), q_b=b(ks[1], C),
                k_w=w(ks[2], C, C), k_b=b(ks[3], C),
                v_w=w(ks[4], C, C), v_b=b(ks[5], C),
                o_w=w(ks[6], C, C), o_b=b(ks[7], C))


def _init_layer(key, C, F):
    ks = jax.random.split(key, 6)
    p = dict(self_attn=_init_attn(ks[0], C), cross_attn=_init_attn(ks[1], C))
    p["ffn1_w"] = jax.random.normal(ks[2], (F, C), jnp.float32) * 0.05
    p["ffn1_b"] = jax.random.normal(ks[3], (F,), jnp.float32) * 0.02
    p["ffn2_w"] = jax.random.normal(ks[4], (C, F), jnp.float32) * 0.05
    p["ffn2_b"] = jax.random.normal(ks[5], (C,), jnp.float32) * 0.02
    for i in (1, 2, 3):  # LayerNormANE defaults: weight=1, bias=0
        p[f"n{i}_w"] = jnp.ones((C,), jnp.float32)
        p[f"n{i}_b"] = jnp.zeros((C,), jnp.float32)
    return p


def init_params(key, C, F, num_layers):
    layer_p = _init_layer(key, C, F)
    # Mirror copy.deepcopy(layer): every layer starts with identical parameters.
    return dict(layers=[layer_p for _ in range(num_layers)],
                norm_w=jnp.ones((C,), jnp.float32),
                norm_b=jnp.zeros((C,), jnp.float32))


def prepare_params(raw, n_head):
    C = raw["norm_w"].shape[0]
    scale = float(C // n_head) ** -0.5
    wdt = jnp.bfloat16   # matmul weights in bf16; biases / LN params stay f32
    prepared = []
    for lp in raw["layers"]:
        sa, ca = lp["self_attn"], lp["cross_attn"]
        prepared.append(dict(
            ln_w=jnp.stack([lp["n1_w"], lp["n2_w"], lp["n3_w"], raw["norm_w"]], 0),
            ln_b=jnp.stack([lp["n1_b"], lp["n2_b"], lp["n3_b"], raw["norm_b"]], 0),
            sa_qk_w=jnp.concatenate([sa["q_w"].T * scale, sa["k_w"].T], axis=1).astype(wdt),
            sa_qk_b=jnp.concatenate([sa["q_b"] * scale, sa["k_b"]]).reshape(1, 2 * C),
            sa_v_w=sa["v_w"].T.astype(wdt), sa_v_b=sa["v_b"].reshape(1, C),
            sa_o_w=sa["o_w"].T.astype(wdt), sa_o_b=sa["o_b"].reshape(1, C),
            ca_q_w=(ca["q_w"].T * scale).astype(wdt),
            ca_q_b=(ca["q_b"] * scale).reshape(1, C),
            ca_k_w=ca["k_w"].T.astype(wdt), ca_k_b=ca["k_b"].reshape(1, C),
            ca_v_w=ca["v_w"].T.astype(wdt), ca_v_b=ca["v_b"].reshape(1, C),
            ca_o_w=ca["o_w"].T.astype(wdt), ca_o_b=ca["o_b"].reshape(1, C),
            ffn1_w=lp["ffn1_w"].T.astype(wdt), ffn1_b=lp["ffn1_b"].reshape(1, -1),
            ffn2_w=lp["ffn2_w"].T.astype(wdt), ffn2_b=lp["ffn2_b"].reshape(1, C),
        ))
    return prepared


# --------------------------------------------------------------------------
if __name__ == "__main__":
    B, C, S_dec, S_enc = 2, 32, 8, 16
    n_head, ffn_dim, num_layers = 4, 64, 2

    key = jax.random.PRNGKey(0)
    ks = jax.random.split(key, 5)
    decoder_embed = jax.random.normal(ks[0], (B, C, 1, S_dec), jnp.float32)
    encoder_embed = jax.random.normal(ks[1], (B, C, 1, S_enc), jnp.float32)
    decoder_pos_embed = jax.random.normal(ks[2], (B, C, 1, S_dec), jnp.float32) * 0.1
    encoder_pos_embed = jax.random.normal(ks[3], (B, C, 1, S_enc), jnp.float32) * 0.1

    # Causal additive qk mask in ANE layout (B, S_k, 1, S_q): block key k > query q.
    kk = jnp.arange(S_dec)[:, None]
    qq = jnp.arange(S_dec)[None, :]
    causal = jnp.where(kk > qq, -1e4, 0.0).astype(jnp.float32)
    decoder_qk_mask = jnp.broadcast_to(causal[None, :, None, :], (B, S_dec, 1, S_dec))

    raw_params = init_params(jax.random.PRNGKey(42), C, ffn_dim, num_layers)
    prepared = prepare_params(raw_params, n_head)   # one-time weight prep (transpose/fuse/scale/bf16)

    fwd = jax.jit(functools.partial(transformer_decoder_forward, n_head=n_head))
    out = fwd(prepared, decoder_embed, encoder_embed,
              decoder_pos_embed, encoder_pos_embed,
              None, None, decoder_qk_mask)
    out = jax.block_until_ready(out)

    assert out.shape == (B, C, 1, S_dec), out.shape
    assert bool(jnp.all(jnp.isfinite(out)))
    print("KERNEL_OK")
</pallas_src>

<mosaic_0001>
module attributes {stable_mosaic.version = 11 : i64} {
  func.func @_fused_layer_kernel(%arg0: memref<2x8x32xf32, #tpu.memory_space<vmem>>, %arg1: memref<2x16x32xf32, #tpu.memory_space<vmem>>, %arg2: memref<2x8x32xf32, #tpu.memory_space<vmem>>, %arg3: memref<2x16x32xf32, #tpu.memory_space<vmem>>, %arg4: memref<2x8x8xf32, #tpu.memory_space<vmem>>, %arg5: memref<4x32xf32, #tpu.memory_space<vmem>>, %arg6: memref<4x32xf32, #tpu.memory_space<vmem>>, %arg7: memref<32x64xbf16, #tpu.memory_space<vmem>>, %arg8: memref<1x64xf32, #tpu.memory_space<vmem>>, %arg9: memref<32x32xbf16, #tpu.memory_space<vmem>>, %arg10: memref<1x32xf32, #tpu.memory_space<vmem>>, %arg11: memref<32x32xbf16, #tpu.memory_space<vmem>>, %arg12: memref<1x32xf32, #tpu.memory_space<vmem>>, %arg13: memref<32x32xbf16, #tpu.memory_space<vmem>>, %arg14: memref<1x32xf32, #tpu.memory_space<vmem>>, %arg15: memref<32x32xbf16, #tpu.memory_space<vmem>>, %arg16: memref<1x32xf32, #tpu.memory_space<vmem>>, %arg17: memref<32x32xbf16, #tpu.memory_space<vmem>>, %arg18: memref<1x32xf32, #tpu.memory_space<vmem>>, %arg19: memref<32x32xbf16, #tpu.memory_space<vmem>>, %arg20: memref<1x32xf32, #tpu.memory_space<vmem>>, %arg21: memref<32x64xbf16, #tpu.memory_space<vmem>>, %arg22: memref<1x64xf32, #tpu.memory_space<vmem>>, %arg23: memref<64x32xbf16, #tpu.memory_space<vmem>>, %arg24: memref<1x32xf32, #tpu.memory_space<vmem>>, %arg25: memref<2x8x32xf32, #tpu.memory_space<vmem>>, %arg26: memref<2x8x32xf32, #tpu.memory_space<vmem>>, %arg27: memref<2x8x32xf32, #tpu.memory_space<vmem>>) attributes {dimension_semantics = [], scalar_prefetch = 0 : i64, scratch_operands = 1 : i64, tpu.core_type = #tpu.core_type<tc>} {
    %c0 = arith.constant 0 : index
    %c0_0 = arith.constant 0 : index
    %c0_1 = arith.constant 0 : index
    %0 = vector.load %arg4[%c0, %c0_0, %c0_1] : memref<2x8x8xf32, #tpu.memory_space<vmem>>, vector<2x8x8xf32>
    %c0_2 = arith.constant 0 : index
    %c0_3 = arith.constant 0 : index
    %c0_4 = arith.constant 0 : index
    %1 = vector.load %arg0[%c0_2, %c0_3, %c0_4] : memref<2x8x32xf32, #tpu.memory_space<vmem>>, vector<2x8x32xf32>
    %2 = vector.shape_cast %1 : vector<2x8x32xf32> to vector<16x32xf32>
    %c0_5 = arith.constant 0 : index
    %c0_6 = arith.constant 0 : index
    %c0_7 = arith.constant 0 : index
    %3 = vector.load %arg1[%c0_5, %c0_6, %c0_7] : memref<2x16x32xf32, #tpu.memory_space<vmem>>, vector<2x16x32xf32>
    %4 = vector.shape_cast %3 : vector<2x16x32xf32> to vector<32x32xf32>
    %c0_8 = arith.constant 0 : index
    %c0_9 = arith.constant 0 : index
    %c0_10 = arith.constant 0 : index
    %5 = vector.load %arg2[%c0_8, %c0_9, %c0_10] : memref<2x8x32xf32, #tpu.memory_space<vmem>>, vector<2x8x32xf32>
    %6 = vector.shape_cast %5 : vector<2x8x32xf32> to vector<16x32xf32>
    %c0_11 = arith.constant 0 : index
    %c0_12 = arith.constant 0 : index
    %c0_13 = arith.constant 0 : index
    %7 = vector.load %arg3[%c0_11, %c0_12, %c0_13] : memref<2x16x32xf32, #tpu.memory_space<vmem>>, vector<2x16x32xf32>
    %8 = vector.shape_cast %7 : vector<2x16x32xf32> to vector<32x32xf32>
    %c0_14 = arith.constant 0 : index
    %c0_15 = arith.constant 0 : index
    %9 = vector.load %arg5[%c0_14, %c0_15] : memref<4x32xf32, #tpu.memory_space<vmem>>, vector<4x32xf32>
    %c0_16 = arith.constant 0 : index
    %c0_17 = arith.constant 0 : index
    %10 = vector.load %arg6[%c0_16, %c0_17] : memref<4x32xf32, #tpu.memory_space<vmem>>, vector<4x32xf32>
    %11 = vector.extract_strided_slice %9 {offsets = [0, 0], sizes = [1, 32], strides = [1, 1]} : vector<4x32xf32> to vector<1x32xf32>
    %12 = vector.extract_strided_slice %10 {offsets = [0, 0], sizes = [1, 32], strides = [1, 1]} : vector<4x32xf32> to vector<1x32xf32>
    %cst = arith.constant dense<0.000000e+00> : vector<16xf32>
    %13 = vector.multi_reduction <add>, %2, %cst [1] : vector<16x32xf32> to vector<16xf32>
    %14 = vector.shape_cast %13 : vector<16xf32> to vector<16x1xf32>
    %cst_18 = arith.constant 3.200000e+01 : f32
    %15 = vector.broadcast %cst_18 : f32 to vector<16x1xf32>
    %16 = arith.divf %14, %15 : vector<16x1xf32>
    %17 = vector.broadcast %16 : vector<16x1xf32> to vector<16x32xf32>
    %18 = arith.subf %2, %17 : vector<16x32xf32>
    %19 = arith.mulf %18, %18 : vector<16x32xf32>
    %cst_19 = arith.constant dense<0.000000e+00> : vector<16xf32>
    %20 = vector.multi_reduction <add>, %19, %cst_19 [1] : vector<16x32xf32> to vector<16xf32>
    %21 = vector.shape_cast %20 : vector<16xf32> to vector<16x1xf32>
    %cst_20 = arith.constant 3.200000e+01 : f32
    %22 = vector.broadcast %cst_20 : f32 to vector<16x1xf32>
    %23 = arith.divf %21, %22 : vector<16x1xf32>
    %cst_21 = arith.constant 9.99999974E-6 : f32
    %24 = vector.broadcast %cst_21 : f32 to vector<16x1xf32>
    %25 = arith.addf %23, %24 : vector<16x1xf32>
    %26 = math.rsqrt %25 : vector<16x1xf32>
    %27 = vector.broadcast %26 : vector<16x1xf32> to vector<16x32xf32>
    %28 = arith.mulf %18, %27 : vector<16x32xf32>
    %29 = vector.broadcast %12 : vector<1x32xf32> to vector<16x32xf32>
    %30 = arith.addf %28, %29 : vector<16x32xf32>
    %31 = vector.broadcast %11 : vector<1x32xf32> to vector<16x32xf32>
    %32 = arith.mulf %30, %31 : vector<16x32xf32>
    %33 = arith.addf %32, %6 : vector<16x32xf32>
    %34 = arith.truncf %33 : vector<16x32xf32> to vector<16x32xbf16>
    %c0_22 = arith.constant 0 : index
    %c0_23 = arith.constant 0 : index
    %35 = vector.load %arg7[%c0_22, %c0_23] : memref<32x64xbf16, #tpu.memory_space<vmem>>, vector<32x64xbf16>
    %cst_24 = arith.constant dense<0.000000e+00> : vector<16x64xf32>
    %36 = tpu.matmul %34, %35, %cst_24 {dimension_numbers = #tpu.dot_dimension_numbers<[1], [0], [0], [1], [0, 0, 1, 1], [], []>} : vector<16x32xbf16>, vector<32x64xbf16>, vector<16x64xf32> -> vector<16x64xf32>
    %c0_25 = arith.constant 0 : index
    %c0_26 = arith.constant 0 : index
    %37 = vector.load %arg8[%c0_25, %c0_26] : memref<1x64xf32, #tpu.memory_space<vmem>>, vector<1x64xf32>
    %38 = vector.broadcast %37 : vector<1x64xf32> to vector<16x64xf32>
    %39 = arith.addf %36, %38 : vector<16x64xf32>
    %40 = arith.truncf %32 : vector<16x32xf32> to vector<16x32xbf16>
    %c0_27 = arith.constant 0 : index
    %c0_28 = arith.constant 0 : index
    %41 = vector.load %arg9[%c0_27, %c0_28] : memref<32x32xbf16, #tpu.memory_space<vmem>>, vector<32x32xbf16>
    %cst_29 = arith.constant dense<0.000000e+00> : vector<16x32xf32>
    %42 = tpu.matmul %40, %41, %cst_29 {dimension_numbers = #tpu.dot_dimension_numbers<[1], [0], [0], [1], [0, 0, 1, 1], [], []>} : vector<16x32xbf16>, vector<32x32xbf16>, vector<16x32xf32> -> vector<16x32xf32>
    %c0_30 = arith.constant 0 : index
    %c0_31 = arith.constant 0 : index
    %43 = vector.load %arg10[%c0_30, %c0_31] : memref<1x32xf32, #tpu.memory_space<vmem>>, vector<1x32xf32>
    %44 = vector.broadcast %43 : vector<1x32xf32> to vector<16x32xf32>
    %45 = arith.addf %42, %44 : vector<16x32xf32>
    %46 = vector.extract_strided_slice %39 {offsets = [0, 0], sizes = [16, 32], strides = [1, 1]} : vector<16x64xf32> to vector<16x32xf32>
    %47 = vector.extract_strided_slice %39 {offsets = [0, 32], sizes = [16, 32], strides = [1, 1]} : vector<16x64xf32> to vector<16x32xf32>
    %c0_32 = arith.constant 0 : index
    %c0_33 = arith.constant 0 : index
    %48 = vector.load %arg11[%c0_32, %c0_33] : memref<32x32xbf16, #tpu.memory_space<vmem>>, vector<32x32xbf16>
    %c0_34 = arith.constant 0 : index
    %c0_35 = arith.constant 0 : index
    %49 = vector.load %arg12[%c0_34, %c0_35] : memref<1x32xf32, #tpu.memory_space<vmem>>, vector<1x32xf32>
    %50 = vector.shape_cast %46 : vector<16x32xf32> to vector<2x8x32xf32>
    %51 = vector.shape_cast %47 : vector<16x32xf32> to vector<2x8x32xf32>
    %52 = vector.shape_cast %45 : vector<16x32xf32> to vector<2x8x32xf32>
    %53 = vector.extract_strided_slice %50 {offsets = [0, 0, 0], sizes = [2, 8, 8], strides = [1, 1, 1]} : vector<2x8x32xf32> to vector<2x8x8xf32>
    %54 = arith.truncf %53 : vector<2x8x8xf32> to vector<2x8x8xbf16>
    %55 = vector.extract_strided_slice %51 {offsets = [0, 0, 0], sizes = [2, 8, 8], strides = [1, 1, 1]} : vector<2x8x32xf32> to vector<2x8x8xf32>
    %56 = arith.truncf %55 : vector<2x8x8xf32> to vector<2x8x8xbf16>
    "tpu.trace_start"() <{level = 10 : i32, message = "bqd,bkd->bqk"}> : () -> ()
    %cst_36 = arith.constant dense<0.000000e+00> : vector<2x8x8xf32>
    %57 = tpu.matmul %54, %56, %cst_36 {dimension_numbers = #tpu.dot_dimension_numbers<[2], [2], [1], [1], [0, 0, 0, 1, 1, 1], [0], [0]>} : vector<2x8x8xbf16>, vector<2x8x8xbf16>, vector<2x8x8xf32> -> vector<2x8x8xf32>
    "tpu.trace_stop"() : () -> ()
    %58 = arith.addf %57, %0 : vector<2x8x8xf32>
    %cst_37 = arith.constant dense<0xFF800000> : vector<2x8xf32>
    %59 = vector.multi_reduction <maximumf>, %58, %cst_37 [2] : vector<2x8x8xf32> to vector<2x8xf32>
    %60 = vector.shape_cast %59 : vector<2x8xf32> to vector<2x8x1xf32>
    %61 = vector.broadcast %60 : vector<2x8x1xf32> to vector<2x8x8xf32>
    %62 = arith.subf %58, %61 : vector<2x8x8xf32>
    %63 = math.exp %62 : vector<2x8x8xf32>
    %cst_38 = arith.constant dense<0.000000e+00> : vector<2x8xf32>
    %64 = vector.multi_reduction <add>, %63, %cst_38 [2] : vector<2x8x8xf32> to vector<2x8xf32>
    %65 = vector.shape_cast %64 : vector<2x8xf32> to vector<2x8x1xf32>
    %66 = tpu.reciprocal %65 {approx = true} : vector<2x8x1xf32> -> vector<2x8x1xf32>
    %67 = vector.broadcast %66 : vector<2x8x1xf32> to vector<2x8x8xf32>
    %68 = arith.mulf %63, %67 : vector<2x8x8xf32>
    %69 = arith.truncf %68 : vector<2x8x8xf32> to vector<2x8x8xbf16>
    %70 = vector.extract_strided_slice %52 {offsets = [0, 0, 0], sizes = [2, 8, 8], strides = [1, 1, 1]} : vector<2x8x32xf32> to vector<2x8x8xf32>
    %71 = arith.truncf %70 : vector<2x8x8xf32> to vector<2x8x8xbf16>
    "tpu.trace_start"() <{level = 10 : i32, message = "bqk,bkd->bqd"}> : () -> ()
    %cst_39 = arith.constant dense<0.000000e+00> : vector<2x8x8xf32>
    %72 = tpu.matmul %69, %71, %cst_39 {dimension_numbers = #tpu.dot_dimension_numbers<[2], [1], [1], [2], [0, 0, 0, 1, 1, 2], [0], [0]>} : vector<2x8x8xbf16>, vector<2x8x8xbf16>, vector<2x8x8xf32> -> vector<2x8x8xf32>
    "tpu.trace_stop"() : () -> ()
    %c0_40 = arith.constant 0 : index
    %c0_41 = arith.constant 0 : index
    %c0_42 = arith.constant 0 : index
    %73 = vector.load %arg27[%c0_40, %c0_41, %c0_42] : memref<2x8x32xf32, #tpu.memory_space<vmem>>, vector<2x8x8xf32>
    tpu.vector_store %arg27[%c0_40, %c0_41, %c0_42], %72 {strides = array<i32>} : memref<2x8x32xf32, #tpu.memory_space<vmem>>, vector<2x8x8xf32>,
    %74 = vector.extract_strided_slice %50 {offsets = [0, 0, 8], sizes = [2, 8, 8], strides = [1, 1, 1]} : vector<2x8x32xf32> to vector<2x8x8xf32>
    %75 = arith.truncf %74 : vector<2x8x8xf32> to vector<2x8x8xbf16>
    %76 = vector.extract_strided_slice %51 {offsets = [0, 0, 8], sizes = [2, 8, 8], strides = [1, 1, 1]} : vector<2x8x32xf32> to vector<2x8x8xf32>
    %77 = arith.truncf %76 : vector<2x8x8xf32> to vector<2x8x8xbf16>
    "tpu.trace_start"() <{level = 10 : i32, message = "bqd,bkd->bqk"}> : () -> ()
    %cst_43 = arith.constant dense<0.000000e+00> : vector<2x8x8xf32>
    %78 = tpu.matmul %75, %77, %cst_43 {dimension_numbers = #tpu.dot_dimension_numbers<[2], [2], [1], [1], [0, 0, 0, 1, 1, 1], [0], [0]>} : vector<2x8x8xbf16>, vector<2x8x8xbf16>, vector<2x8x8xf32> -> vector<2x8x8xf32>
    "tpu.trace_stop"() : () -> ()
    %79 = arith.addf %78, %0 : vector<2x8x8xf32>
    %cst_44 = arith.constant dense<0xFF800000> : vector<2x8xf32>
    %80 = vector.multi_reduction <maximumf>, %79, %cst_44 [2] : vector<2x8x8xf32> to vector<2x8xf32>
    %81 = vector.shape_cast %80 : vector<2x8xf32> to vector<2x8x1xf32>
    %82 = vector.broadcast %81 : vector<2x8x1xf32> to vector<2x8x8xf32>
    %83 = arith.subf %79, %82 : vector<2x8x8xf32>
    %84 = math.exp %83 : vector<2x8x8xf32>
    %cst_45 = arith.constant dense<0.000000e+00> : vector<2x8xf32>
    %85 = vector.multi_reduction <add>, %84, %cst_45 [2] : vector<2x8x8xf32> to vector<2x8xf32>
    %86 = vector.shape_cast %85 : vector<2x8xf32> to vector<2x8x1xf32>
    %87 = tpu.reciprocal %86 {approx = true} : vector<2x8x1xf32> -> vector<2x8x1xf32>
    %88 = vector.broadcast %87 : vector<2x8x1xf32> to vector<2x8x8xf32>
    %89 = arith.mulf %84, %88 : vector<2x8x8xf32>
    %90 = arith.truncf %89 : vector<2x8x8xf32> to vector<2x8x8xbf16>
    %91 = vector.extract_strided_slice %52 {offsets = [0, 0, 8], sizes = [2, 8, 8], strides = [1, 1, 1]} : vector<2x8x32xf32> to vector<2x8x8xf32>
    %92 = arith.truncf %91 : vector<2x8x8xf32> to vector<2x8x8xbf16>
    "tpu.trace_start"() <{level = 10 : i32, message = "bqk,bkd->bqd"}> : () -> ()
    %cst_46 = arith.constant dense<0.000000e+00> : vector<2x8x8xf32>
    %93 = tpu.matmul %90, %92, %cst_46 {dimension_numbers = #tpu.dot_dimension_numbers<[2], [1], [1], [2], [0, 0, 0, 1, 1, 2], [0], [0]>} : vector<2x8x8xbf16>, vector<2x8x8xbf16>, vector<2x8x8xf32> -> vector<2x8x8xf32>
    "tpu.trace_stop"() : () -> ()
    %c0_47 = arith.constant 0 : index
    %c0_48 = arith.constant 0 : index
    %c8 = arith.constant 8 : index
    %94 = vector.load %arg27[%c0_47, %c0_48, %c8] : memref<2x8x32xf32, #tpu.memory_space<vmem>>, vector<2x8x8xf32>
    tpu.vector_store %arg27[%c0_47, %c0_48, %c8], %93 {strides = array<i32>} : memref<2x8x32xf32, #tpu.memory_space<vmem>>, vector<2x8x8xf32>,
    %95 = vector.extract_strided_slice %50 {offsets = [0, 0, 16], sizes = [2, 8, 8], strides = [1, 1, 1]} : vector<2x8x32xf32> to vector<2x8x8xf32>
    %96 = arith.truncf %95 : vector<2x8x8xf32> to vector<2x8x8xbf16>
    %97 = vector.extract_strided_slice %51 {offsets = [0, 0, 16], sizes = [2, 8, 8], strides = [1, 1, 1]} : vector<2x8x32xf32> to vector<2x8x8xf32>
    %98 = arith.truncf %97 : vector<2x8x8xf32> to vector<2x8x8xbf16>
    "tpu.trace_start"() <{level = 10 : i32, message = "bqd,bkd->bqk"}> : () -> ()
    %cst_49 = arith.constant dense<0.000000e+00> : vector<2x8x8xf32>
    %99 = tpu.matmul %96, %98, %cst_49 {dimension_numbers = #tpu.dot_dimension_numbers<[2], [2], [1], [1], [0, 0, 0, 1, 1, 1], [0], [0]>} : vector<2x8x8xbf16>, vector<2x8x8xbf16>, vector<2x8x8xf32> -> vector<2x8x8xf32>
    "tpu.trace_stop"() : () -> ()
    %100 = arith.addf %99, %0 : vector<2x8x8xf32>
    %cst_50 = arith.constant dense<0xFF800000> : vector<2x8xf32>
    %101 = vector.multi_reduction <maximumf>, %100, %cst_50 [2] : vector<2x8x8xf32> to vector<2x8xf32>
    %102 = vector.shape_cast %101 : vector<2x8xf32> to vector<2x8x1xf32>
    %103 = vector.broadcast %102 : vector<2x8x1xf32> to vector<2x8x8xf32>
    %104 = arith.subf %100, %103 : vector<2x8x8xf32>
    %105 = math.exp %104 : vector<2x8x8xf32>
    %cst_51 = arith.constant dense<0.000000e+00> : vector<2x8xf32>
    %106 = vector.multi_reduction <add>, %105, %cst_51 [2] : vector<2x8x8xf32> to vector<2x8xf32>
    %107 = vector.shape_cast %106 : vector<2x8xf32> to vector<2x8x1xf32>
    %108 = tpu.reciprocal %107 {approx = true} : vector<2x8x1xf32> -> vector<2x8x1xf32>
    %109 = vector.broadcast %108 : vector<2x8x1xf32> to vector<2x8x8xf32>
    %110 = arith.mulf %105, %109 : vector<2x8x8xf32>
    %111 = arith.truncf %110 : vector<2x8x8xf32> to vector<2x8x8xbf16>
    %112 = vector.extract_strided_slice %52 {offsets = [0, 0, 16], sizes = [2, 8, 8], strides = [1, 1, 1]} : vector<2x8x32xf32> to vector<2x8x8xf32>
    %113 = arith.truncf %112 : vector<2x8x8xf32> to vector<2x8x8xbf16>
    "tpu.trace_start"() <{level = 10 : i32, message = "bqk,bkd->bqd"}> : () -> ()
    %cst_52 = arith.constant dense<0.000000e+00> : vector<2x8x8xf32>
    %114 = tpu.matmul %111, %113, %cst_52 {dimension_numbers = #tpu.dot_dimension_numbers<[2], [1], [1], [2], [0, 0, 0, 1, 1, 2], [0], [0]>} : vector<2x8x8xbf16>, vector<2x8x8xbf16>, vector<2x8x8xf32> -> vector<2x8x8xf32>
    "tpu.trace_stop"() : () -> ()
    %c0_53 = arith.constant 0 : index
    %c0_54 = arith.constant 0 : index
    %c16 = arith.constant 16 : index
    %115 = vector.load %arg27[%c0_53, %c0_54, %c16] : memref<2x8x32xf32, #tpu.memory_space<vmem>>, vector<2x8x8xf32>
    tpu.vector_store %arg27[%c0_53, %c0_54, %c16], %114 {strides = array<i32>} : memref<2x8x32xf32, #tpu.memory_space<vmem>>, vector<2x8x8xf32>,
    %116 = vector.extract_strided_slice %50 {offsets = [0, 0, 24], sizes = [2, 8, 8], strides = [1, 1, 1]} : vector<2x8x32xf32> to vector<2x8x8xf32>
    %117 = arith.truncf %116 : vector<2x8x8xf32> to vector<2x8x8xbf16>
    %118 = vector.extract_strided_slice %51 {offsets = [0, 0, 24], sizes = [2, 8, 8], strides = [1, 1, 1]} : vector<2x8x32xf32> to vector<2x8x8xf32>
    %119 = arith.truncf %118 : vector<2x8x8xf32> to vector<2x8x8xbf16>
    "tpu.trace_start"() <{level = 10 : i32, message = "bqd,bkd->bqk"}> : () -> ()
    %cst_55 = arith.constant dense<0.000000e+00> : vector<2x8x8xf32>
    %120 = tpu.matmul %117, %119, %cst_55 {dimension_numbers = #tpu.dot_dimension_numbers<[2], [2], [1], [1], [0, 0, 0, 1, 1, 1], [0], [0]>} : vector<2x8x8xbf16>, vector<2x8x8xbf16>, vector<2x8x8xf32> -> vector<2x8x8xf32>
    "tpu.trace_stop"() : () -> ()
    %121 = arith.addf %120, %0 : vector<2x8x8xf32>
    %cst_56 = arith.constant dense<0xFF800000> : vector<2x8xf32>
    %122 = vector.multi_reduction <maximumf>, %121, %cst_56 [2] : vector<2x8x8xf32> to vector<2x8xf32>
    %123 = vector.shape_cast %122 : vector<2x8xf32> to vector<2x8x1xf32>
    %124 = vector.broadcast %123 : vector<2x8x1xf32> to vector<2x8x8xf32>
    %125 = arith.subf %121, %124 : vector<2x8x8xf32>
    %126 = math.exp %125 : vector<2x8x8xf32>
    %cst_57 = arith.constant dense<0.000000e+00> : vector<2x8xf32>
    %127 = vector.multi_reduction <add>, %126, %cst_57 [2] : vector<2x8x8xf32> to vector<2x8xf32>
    %128 = vector.shape_cast %127 : vector<2x8xf32> to vector<2x8x1xf32>
    %129 = tpu.reciprocal %128 {approx = true} : vector<2x8x1xf32> -> vector<2x8x1xf32>
    %130 = vector.broadcast %129 : vector<2x8x1xf32> to vector<2x8x8xf32>
    %131 = arith.mulf %126, %130 : vector<2x8x8xf32>
    %132 = arith.truncf %131 : vector<2x8x8xf32> to vector<2x8x8xbf16>
    %133 = vector.extract_strided_slice %52 {offsets = [0, 0, 24], sizes = [2, 8, 8], strides = [1, 1, 1]} : vector<2x8x32xf32> to vector<2x8x8xf32>
    %134 = arith.truncf %133 : vector<2x8x8xf32> to vector<2x8x8xbf16>
    "tpu.trace_start"() <{level = 10 : i32, message = "bqk,bkd->bqd"}> : () -> ()
    %cst_58 = arith.constant dense<0.000000e+00> : vector<2x8x8xf32>
    %135 = tpu.matmul %132, %134, %cst_58 {dimension_numbers = #tpu.dot_dimension_numbers<[2], [1], [1], [2], [0, 0, 0, 1, 1, 2], [0], [0]>} : vector<2x8x8xbf16>, vector<2x8x8xbf16>, vector<2x8x8xf32> -> vector<2x8x8xf32>
    "tpu.trace_stop"() : () -> ()
    %c0_59 = arith.constant 0 : index
    %c0_60 = arith.constant 0 : index
    %c24 = arith.constant 24 : index
    %136 = vector.load %arg27[%c0_59, %c0_60, %c24] : memref<2x8x32xf32, #tpu.memory_space<vmem>>, vector<2x8x8xf32>
    tpu.vector_store %arg27[%c0_59, %c0_60, %c24], %135 {strides = array<i32>} : memref<2x8x32xf32, #tpu.memory_space<vmem>>, vector<2x8x8xf32>,
    %c0_61 = arith.constant 0 : index
    %c0_62 = arith.constant 0 : index
    %c0_63 = arith.constant 0 : index
    %137 = vector.load %arg27[%c0_61, %c0_62, %c0_63] : memref<2x8x32xf32, #tpu.memory_space<vmem>>, vector<2x8x32xf32>
    %138 = vector.shape_cast %137 : vector<2x8x32xf32> to vector<16x32xf32>
    %139 = arith.truncf %138 : vector<16x32xf32> to vector<16x32xbf16>
    %cst_64 = arith.constant dense<0.000000e+00> : vector<16x32xf32>
    %140 = tpu.matmul %139, %48, %cst_64 {dimension_numbers = #tpu.dot_dimension_numbers<[1], [0], [0], [1], [0, 0, 1, 1], [], []>} : vector<16x32xbf16>, vector<32x32xbf16>, vector<16x32xf32> -> vector<16x32xf32>
    %141 = vector.broadcast %49 : vector<1x32xf32> to vector<16x32xf32>
    %142 = arith.addf %140, %141 : vector<16x32xf32>
    %143 = arith.addf %2, %142 : vector<16x32xf32>
    %144 = vector.extract_strided_slice %9 {offsets = [1, 0], sizes = [1, 32], strides = [1, 1]} : vector<4x32xf32> to vector<1x32xf32>
    %145 = vector.extract_strided_slice %10 {offsets = [1, 0], sizes = [1, 32], strides = [1, 1]} : vector<4x32xf32> to vector<1x32xf32>
    %cst_65 = arith.constant dense<0.000000e+00> : vector<16xf32>
    %146 = vector.multi_reduction <add>, %143, %cst_65 [1] : vector<16x32xf32> to vector<16xf32>
    %147 = vector.shape_cast %146 : vector<16xf32> to vector<16x1xf32>
    %cst_66 = arith.constant 3.200000e+01 : f32
    %148 = vector.broadcast %cst_66 : f32 to vector<16x1xf32>
    %149 = arith.divf %147, %148 : vector<16x1xf32>
    %150 = vector.broadcast %149 : vector<16x1xf32> to vector<16x32xf32>
    %151 = arith.subf %143, %150 : vector<16x32xf32>
    %152 = arith.mulf %151, %151 : vector<16x32xf32>
    %cst_67 = arith.constant dense<0.000000e+00> : vector<16xf32>
    %153 = vector.multi_reduction <add>, %152, %cst_67 [1] : vector<16x32xf32> to vector<16xf32>
    %154 = vector.shape_cast %153 : vector<16xf32> to vector<16x1xf32>
    %cst_68 = arith.constant 3.200000e+01 : f32
    %155 = vector.broadcast %cst_68 : f32 to vector<16x1xf32>
    %156 = arith.divf %154, %155 : vector<16x1xf32>
    %cst_69 = arith.constant 9.99999974E-6 : f32
    %157 = vector.broadcast %cst_69 : f32 to vector<16x1xf32>
    %158 = arith.addf %156, %157 : vector<16x1xf32>
    %159 = math.rsqrt %158 : vector<16x1xf32>
    %160 = vector.broadcast %159 : vector<16x1xf32> to vector<16x32xf32>
    %161 = arith.mulf %151, %160 : vector<16x32xf32>
    %162 = vector.broadcast %145 : vector<1x32xf32> to vector<16x32xf32>
    %163 = arith.addf %161, %162 : vector<16x32xf32>
    %164 = vector.broadcast %144 : vector<1x32xf32> to vector<16x32xf32>
    %165 = arith.mulf %163, %164 : vector<16x32xf32>
    %166 = arith.addf %165, %6 : vector<16x32xf32>
    %167 = arith.truncf %166 : vector<16x32xf32> to vector<16x32xbf16>
    %c0_70 = arith.constant 0 : index
    %c0_71 = arith.constant 0 : index
    %168 = vector.load %arg13[%c0_70, %c0_71] : memref<32x32xbf16, #tpu.memory_space<vmem>>, vector<32x32xbf16>
    %cst_72 = arith.constant dense<0.000000e+00> : vector<16x32xf32>
    %169 = tpu.matmul %167, %168, %cst_72 {dimension_numbers = #tpu.dot_dimension_numbers<[1], [0], [0], [1], [0, 0, 1, 1], [], []>} : vector<16x32xbf16>, vector<32x32xbf16>, vector<16x32xf32> -> vector<16x32xf32>
    %c0_73 = arith.constant 0 : index
    %c0_74 = arith.constant 0 : index
    %170 = vector.load %arg14[%c0_73, %c0_74] : memref<1x32xf32, #tpu.memory_space<vmem>>, vector<1x32xf32>
    %171 = vector.broadcast %170 : vector<1x32xf32> to vector<16x32xf32>
    %172 = arith.addf %169, %171 : vector<16x32xf32>
    %173 = arith.addf %4, %8 : vector<32x32xf32>
    %174 = arith.truncf %173 : vector<32x32xf32> to vector<32x32xbf16>
    %c0_75 = arith.constant 0 : index
    %c0_76 = arith.constant 0 : index
    %175 = vector.load %arg15[%c0_75, %c0_76] : memref<32x32xbf16, #tpu.memory_space<vmem>>, vector<32x32xbf16>
    %cst_77 = arith.constant dense<0.000000e+00> : vector<32x32xf32>
    %176 = tpu.matmul %174, %175, %cst_77 {dimension_numbers = #tpu.dot_dimension_numbers<[1], [0], [0], [1], [0, 0, 1, 1], [], []>} : vector<32x32xbf16>, vector<32x32xbf16>, vector<32x32xf32> -> vector<32x32xf32>
    %c0_78 = arith.constant 0 : index
    %c0_79 = arith.constant 0 : index
    %177 = vector.load %arg16[%c0_78, %c0_79] : memref<1x32xf32, #tpu.memory_space<vmem>>, vector<1x32xf32>
    %178 = vector.broadcast %177 : vector<1x32xf32> to vector<32x32xf32>
    %179 = arith.addf %176, %178 : vector<32x32xf32>
    %180 = arith.truncf %4 : vector<32x32xf32> to vector<32x32xbf16>
    %c0_80 = arith.constant 0 : index
    %c0_81 = arith.constant 0 : index
    %181 = vector.load %arg17[%c0_80, %c0_81] : memref<32x32xbf16, #tpu.memory_space<vmem>>, vector<32x32xbf16>
    %cst_82 = arith.constant dense<0.000000e+00> : vector<32x32xf32>
    %182 = tpu.matmul %180, %181, %cst_82 {dimension_numbers = #tpu.dot_dimension_numbers<[1], [0], [0], [1], [0, 0, 1, 1], [], []>} : vector<32x32xbf16>, vector<32x32xbf16>, vector<32x32xf32> -> vector<32x32xf32>
    %c0_83 = arith.constant 0 : index
    %c0_84 = arith.constant 0 : index
    %183 = vector.load %arg18[%c0_83, %c0_84] : memref<1x32xf32, #tpu.memory_space<vmem>>, vector<1x32xf32>
    %184 = vector.broadcast %183 : vector<1x32xf32> to vector<32x32xf32>
    %185 = arith.addf %182, %184 : vector<32x32xf32>
    %c0_85 = arith.constant 0 : index
    %c0_86 = arith.constant 0 : index
    %186 = vector.load %arg19[%c0_85, %c0_86] : memref<32x32xbf16, #tpu.memory_space<vmem>>, vector<32x32xbf16>
    %c0_87 = arith.constant 0 : index
    %c0_88 = arith.constant 0 : index
    %187 = vector.load %arg20[%c0_87, %c0_88] : memref<1x32xf32, #tpu.memory_space<vmem>>, vector<1x32xf32>
    %188 = vector.shape_cast %172 : vector<16x32xf32> to vector<2x8x32xf32>
    %189 = vector.shape_cast %179 : vector<32x32xf32> to vector<2x16x32xf32>
    %190 = vector.shape_cast %185 : vector<32x32xf32> to vector<2x16x32xf32>
    %191 = vector.extract_strided_slice %188 {offsets = [0, 0, 0], sizes = [2, 8, 8], strides = [1, 1, 1]} : vector<2x8x32xf32> to vector<2x8x8xf32>
    %192 = arith.truncf %191 : vector<2x8x8xf32> to vector<2x8x8xbf16>
    %193 = vector.extract_strided_slice %189 {offsets = [0, 0, 0], sizes = [2, 16, 8], strides = [1, 1, 1]} : vector<2x16x32xf32> to vector<2x16x8xf32>
    %194 = arith.truncf %193 : vector<2x16x8xf32> to vector<2x16x8xbf16>
    "tpu.trace_start"() <{level = 10 : i32, message = "bqd,bkd->bqk"}> : () -> ()
    %cst_89 = arith.constant dense<0.000000e+00> : vector<2x8x16xf32>
    %195 = tpu.matmul %192, %194, %cst_89 {dimension_numbers = #tpu.dot_dimension_numbers<[2], [2], [1], [1], [0, 0, 0, 1, 1, 1], [0], [0]>} : vector<2x8x8xbf16>, vector<2x16x8xbf16>, vector<2x8x16xf32> -> vector<2x8x16xf32>
    "tpu.trace_stop"() : () -> ()
    %cst_90 = arith.constant dense<0xFF800000> : vector<2x8xf32>
    %196 = vector.multi_reduction <maximumf>, %195, %cst_90 [2] : vector<2x8x16xf32> to vector<2x8xf32>
    %197 = vector.shape_cast %196 : vector<2x8xf32> to vector<2x8x1xf32>
    %198 = vector.broadcast %197 : vector<2x8x1xf32> to vector<2x8x16xf32>
    %199 = arith.subf %195, %198 : vector<2x8x16xf32>
    %200 = math.exp %199 : vector<2x8x16xf32>
    %cst_91 = arith.constant dense<0.000000e+00> : vector<2x8xf32>
    %201 = vector.multi_reduction <add>, %200, %cst_91 [2] : vector<2x8x16xf32> to vector<2x8xf32>
    %202 = vector.shape_cast %201 : vector<2x8xf32> to vector<2x8x1xf32>
    %203 = tpu.reciprocal %202 {approx = true} : vector<2x8x1xf32> -> vector<2x8x1xf32>
    %204 = vector.broadcast %203 : vector<2x8x1xf32> to vector<2x8x16xf32>
    %205 = arith.mulf %200, %204 : vector<2x8x16xf32>
    %206 = arith.truncf %205 : vector<2x8x16xf32> to vector<2x8x16xbf16>
    %207 = vector.extract_strided_slice %190 {offsets = [0, 0, 0], sizes = [2, 16, 8], strides = [1, 1, 1]} : vector<2x16x32xf32> to vector<2x16x8xf32>
    %208 = arith.truncf %207 : vector<2x16x8xf32> to vector<2x16x8xbf16>
    "tpu.trace_start"() <{level = 10 : i32, message = "bqk,bkd->bqd"}> : () -> ()
    %cst_92 = arith.constant dense<0.000000e+00> : vector<2x8x8xf32>
    %209 = tpu.matmul %206, %208, %cst_92 {dimension_numbers = #tpu.dot_dimension_numbers<[2], [1], [1], [2], [0, 0, 0, 1, 1, 2], [0], [0]>} : vector<2x8x16xbf16>, vector<2x16x8xbf16>, vector<2x8x8xf32> -> vector<2x8x8xf32>
    "tpu.trace_stop"() : () -> ()
    %c0_93 = arith.constant 0 : index
    %c0_94 = arith.constant 0 : index
    %c0_95 = arith.constant 0 : index
    %210 = vector.load %arg27[%c0_93, %c0_94, %c0_95] : memref<2x8x32xf32, #tpu.memory_space<vmem>>, vector<2x8x8xf32>
    tpu.vector_store %arg27[%c0_93, %c0_94, %c0_95], %209 {strides = array<i32>} : memref<2x8x32xf32, #tpu.memory_space<vmem>>, vector<2x8x8xf32>,
    %211 = vector.extract_strided_slice %188 {offsets = [0, 0, 8], sizes = [2, 8, 8], strides = [1, 1, 1]} : vector<2x8x32xf32> to vector<2x8x8xf32>
    %212 = arith.truncf %211 : vector<2x8x8xf32> to vector<2x8x8xbf16>
    %213 = vector.extract_strided_slice %189 {offsets = [0, 0, 8], sizes = [2, 16, 8], strides = [1, 1, 1]} : vector<2x16x32xf32> to vector<2x16x8xf32>
    %214 = arith.truncf %213 : vector<2x16x8xf32> to vector<2x16x8xbf16>
    "tpu.trace_start"() <{level = 10 : i32, message = "bqd,bkd->bqk"}> : () -> ()
    %cst_96 = arith.constant dense<0.000000e+00> : vector<2x8x16xf32>
    %215 = tpu.matmul %212, %214, %cst_96 {dimension_numbers = #tpu.dot_dimension_numbers<[2], [2], [1], [1], [0, 0, 0, 1, 1, 1], [0], [0]>} : vector<2x8x8xbf16>, vector<2x16x8xbf16>, vector<2x8x16xf32> -> vector<2x8x16xf32>
    "tpu.trace_stop"() : () -> ()
    %cst_97 = arith.constant dense<0xFF800000> : vector<2x8xf32>
    %216 = vector.multi_reduction <maximumf>, %215, %cst_97 [2] : vector<2x8x16xf32> to vector<2x8xf32>
    %217 = vector.shape_cast %216 : vector<2x8xf32> to vector<2x8x1xf32>
    %218 = vector.broadcast %217 : vector<2x8x1xf32> to vector<2x8x16xf32>
    %219 = arith.subf %215, %218 : vector<2x8x16xf32>
    %220 = math.exp %219 : vector<2x8x16xf32>
    %cst_98 = arith.constant dense<0.000000e+00> : vector<2x8xf32>
    %221 = vector.multi_reduction <add>, %220, %cst_98 [2] : vector<2x8x16xf32> to vector<2x8xf32>
    %222 = vector.shape_cast %221 : vector<2x8xf32> to vector<2x8x1xf32>
    %223 = tpu.reciprocal %222 {approx = true} : vector<2x8x1xf32> -> vector<2x8x1xf32>
    %224 = vector.broadcast %223 : vector<2x8x1xf32> to vector<2x8x16xf32>
    %225 = arith.mulf %220, %224 : vector<2x8x16xf32>
    %226 = arith.truncf %225 : vector<2x8x16xf32> to vector<2x8x16xbf16>
    %227 = vector.extract_strided_slice %190 {offsets = [0, 0, 8], sizes = [2, 16, 8], strides = [1, 1, 1]} : vector<2x16x32xf32> to vector<2x16x8xf32>
    %228 = arith.truncf %227 : vector<2x16x8xf32> to vector<2x16x8xbf16>
    "tpu.trace_start"() <{level = 10 : i32, message = "bqk,bkd->bqd"}> : () -> ()
    %cst_99 = arith.constant dense<0.000000e+00> : vector<2x8x8xf32>
    %229 = tpu.matmul %226, %228, %cst_99 {dimension_numbers = #tpu.dot_dimension_numbers<[2], [1], [1], [2], [0, 0, 0, 1, 1, 2], [0], [0]>} : vector<2x8x16xbf16>, vector<2x16x8xbf16>, vector<2x8x8xf32> -> vector<2x8x8xf32>
    "tpu.trace_stop"() : () -> ()
    %c0_100 = arith.constant 0 : index
    %c0_101 = arith.constant 0 : index
    %c8_102 = arith.constant 8 : index
    %230 = vector.load %arg27[%c0_100, %c0_101, %c8_102] : memref<2x8x32xf32, #tpu.memory_space<vmem>>, vector<2x8x8xf32>
    tpu.vector_store %arg27[%c0_100, %c0_101, %c8_102], %229 {strides = array<i32>} : memref<2x8x32xf32, #tpu.memory_space<vmem>>, vector<2x8x8xf32>,
    %231 = vector.extract_strided_slice %188 {offsets = [0, 0, 16], sizes = [2, 8, 8], strides = [1, 1, 1]} : vector<2x8x32xf32> to vector<2x8x8xf32>
    %232 = arith.truncf %231 : vector<2x8x8xf32> to vector<2x8x8xbf16>
    %233 = vector.extract_strided_slice %189 {offsets = [0, 0, 16], sizes = [2, 16, 8], strides = [1, 1, 1]} : vector<2x16x32xf32> to vector<2x16x8xf32>
    %234 = arith.truncf %233 : vector<2x16x8xf32> to vector<2x16x8xbf16>
    "tpu.trace_start"() <{level = 10 : i32, message = "bqd,bkd->bqk"}> : () -> ()
    %cst_103 = arith.constant dense<0.000000e+00> : vector<2x8x16xf32>
    %235 = tpu.matmul %232, %234, %cst_103 {dimension_numbers = #tpu.dot_dimension_numbers<[2], [2], [1], [1], [0, 0, 0, 1, 1, 1], [0], [0]>} : vector<2x8x8xbf16>, vector<2x16x8xbf16>, vector<2x8x16xf32> -> vector<2x8x16xf32>
    "tpu.trace_stop"() : () -> ()
    %cst_104 = arith.constant dense<0xFF800000> : vector<2x8xf32>
    %236 = vector.multi_reduction <maximumf>, %235, %cst_104 [2] : vector<2x8x16xf32> to vector<2x8xf32>
    %237 = vector.shape_cast %236 : vector<2x8xf32> to vector<2x8x1xf32>
    %238 = vector.broadcast %237 : vector<2x8x1xf32> to vector<2x8x16xf32>
    %239 = arith.subf %235, %238 : vector<2x8x16xf32>
    %240 = math.exp %239 : vector<2x8x16xf32>
    %cst_105 = arith.constant dense<0.000000e+00> : vector<2x8xf32>
    %241 = vector.multi_reduction <add>, %240, %cst_105 [2] : vector<2x8x16xf32> to vector<2x8xf32>
    %242 = vector.shape_cast %241 : vector<2x8xf32> to vector<2x8x1xf32>
    %243 = tpu.reciprocal %242 {approx = true} : vector<2x8x1xf32> -> vector<2x8x1xf32>
    %244 = vector.broadcast %243 : vector<2x8x1xf32> to vector<2x8x16xf32>
    %245 = arith.mulf %240, %244 : vector<2x8x16xf32>
    %246 = arith.truncf %245 : vector<2x8x16xf32> to vector<2x8x16xbf16>
    %247 = vector.extract_strided_slice %190 {offsets = [0, 0, 16], sizes = [2, 16, 8], strides = [1, 1, 1]} : vector<2x16x32xf32> to vector<2x16x8xf32>
    %248 = arith.truncf %247 : vector<2x16x8xf32> to vector<2x16x8xbf16>
    "tpu.trace_start"() <{level = 10 : i32, message = "bqk,bkd->bqd"}> : () -> ()
    %cst_106 = arith.constant dense<0.000000e+00> : vector<2x8x8xf32>
    %249 = tpu.matmul %246, %248, %cst_106 {dimension_numbers = #tpu.dot_dimension_numbers<[2], [1], [1], [2], [0, 0, 0, 1, 1, 2], [0], [0]>} : vector<2x8x16xbf16>, vector<2x16x8xbf16>, vector<2x8x8xf32> -> vector<2x8x8xf32>
    "tpu.trace_stop"() : () -> ()
    %c0_107 = arith.constant 0 : index
    %c0_108 = arith.constant 0 : index
    %c16_109 = arith.constant 16 : index
    %250 = vector.load %arg27[%c0_107, %c0_108, %c16_109] : memref<2x8x32xf32, #tpu.memory_space<vmem>>, vector<2x8x8xf32>
    tpu.vector_store %arg27[%c0_107, %c0_108, %c16_109], %249 {strides = array<i32>} : memref<2x8x32xf32, #tpu.memory_space<vmem>>, vector<2x8x8xf32>,
    %251 = vector.extract_strided_slice %188 {offsets = [0, 0, 24], sizes = [2, 8, 8], strides = [1, 1, 1]} : vector<2x8x32xf32> to vector<2x8x8xf32>
    %252 = arith.truncf %251 : vector<2x8x8xf32> to vector<2x8x8xbf16>
    %253 = vector.extract_strided_slice %189 {offsets = [0, 0, 24], sizes = [2, 16, 8], strides = [1, 1, 1]} : vector<2x16x32xf32> to vector<2x16x8xf32>
    %254 = arith.truncf %253 : vector<2x16x8xf32> to vector<2x16x8xbf16>
    "tpu.trace_start"() <{level = 10 : i32, message = "bqd,bkd->bqk"}> : () -> ()
    %cst_110 = arith.constant dense<0.000000e+00> : vector<2x8x16xf32>
    %255 = tpu.matmul %252, %254, %cst_110 {dimension_numbers = #tpu.dot_dimension_numbers<[2], [2], [1], [1], [0, 0, 0, 1, 1, 1], [0], [0]>} : vector<2x8x8xbf16>, vector<2x16x8xbf16>, vector<2x8x16xf32> -> vector<2x8x16xf32>
    "tpu.trace_stop"() : () -> ()
    %cst_111 = arith.constant dense<0xFF800000> : vector<2x8xf32>
    %256 = vector.multi_reduction <maximumf>, %255, %cst_111 [2] : vector<2x8x16xf32> to vector<2x8xf32>
    %257 = vector.shape_cast %256 : vector<2x8xf32> to vector<2x8x1xf32>
    %258 = vector.broadcast %257 : vector<2x8x1xf32> to vector<2x8x16xf32>
    %259 = arith.subf %255, %258 : vector<2x8x16xf32>
    %260 = math.exp %259 : vector<2x8x16xf32>
    %cst_112 = arith.constant dense<0.000000e+00> : vector<2x8xf32>
    %261 = vector.multi_reduction <add>, %260, %cst_112 [2] : vector<2x8x16xf32> to vector<2x8xf32>
    %262 = vector.shape_cast %261 : vector<2x8xf32> to vector<2x8x1xf32>
    %263 = tpu.reciprocal %262 {approx = true} : vector<2x8x1xf32> -> vector<2x8x1xf32>
    %264 = vector.broadcast %263 : vector<2x8x1xf32> to vector<2x8x16xf32>
    %265 = arith.mulf %260, %264 : vector<2x8x16xf32>
    %266 = arith.truncf %265 : vector<2x8x16xf32> to vector<2x8x16xbf16>
    %267 = vector.extract_strided_slice %190 {offsets = [0, 0, 24], sizes = [2, 16, 8], strides = [1, 1, 1]} : vector<2x16x32xf32> to vector<2x16x8xf32>
    %268 = arith.truncf %267 : vector<2x16x8xf32> to vector<2x16x8xbf16>
    "tpu.trace_start"() <{level = 10 : i32, message = "bqk,bkd->bqd"}> : () -> ()
    %cst_113 = arith.constant dense<0.000000e+00> : vector<2x8x8xf32>
    %269 = tpu.matmul %266, %268, %cst_113 {dimension_numbers = #tpu.dot_dimension_numbers<[2], [1], [1], [2], [0, 0, 0, 1, 1, 2], [0], [0]>} : vector<2x8x16xbf16>, vector<2x16x8xbf16>, vector<2x8x8xf32> -> vector<2x8x8xf32>
    "tpu.trace_stop"() : () -> ()
    %c0_114 = arith.constant 0 : index
    %c0_115 = arith.constant 0 : index
    %c24_116 = arith.constant 24 : index
    %270 = vector.load %arg27[%c0_114, %c0_115, %c24_116] : memref<2x8x32xf32, #tpu.memory_space<vmem>>, vector<2x8x8xf32>
    tpu.vector_store %arg27[%c0_114, %c0_115, %c24_116], %269 {strides = array<i32>} : memref<2x8x32xf32, #tpu.memory_space<vmem>>, vector<2x8x8xf32>,
    %c0_117 = arith.constant 0 : index
    %c0_118 = arith.constant 0 : index
    %c0_119 = arith.constant 0 : index
    %271 = vector.load %arg27[%c0_117, %c0_118, %c0_119] : memref<2x8x32xf32, #tpu.memory_space<vmem>>, vector<2x8x32xf32>
    %272 = vector.shape_cast %271 : vector<2x8x32xf32> to vector<16x32xf32>
    %273 = arith.truncf %272 : vector<16x32xf32> to vector<16x32xbf16>
    %cst_120 = arith.constant dense<0.000000e+00> : vector<16x32xf32>
    %274 = tpu.matmul %273, %186, %cst_120 {dimension_numbers = #tpu.dot_dimension_numbers<[1], [0], [0], [1], [0, 0, 1, 1], [], []>} : vector<16x32xbf16>, vector<32x32xbf16>, vector<16x32xf32> -> vector<16x32xf32>
    %275 = vector.broadcast %187 : vector<1x32xf32> to vector<16x32xf32>
    %276 = arith.addf %274, %275 : vector<16x32xf32>
    %277 = arith.addf %143, %276 : vector<16x32xf32>
    %278 = vector.extract_strided_slice %9 {offsets = [2, 0], sizes = [1, 32], strides = [1, 1]} : vector<4x32xf32> to vector<1x32xf32>
    %279 = vector.extract_strided_slice %10 {offsets = [2, 0], sizes = [1, 32], strides = [1, 1]} : vector<4x32xf32> to vector<1x32xf32>
    %cst_121 = arith.constant dense<0.000000e+00> : vector<16xf32>
    %280 = vector.multi_reduction <add>, %277, %cst_121 [1] : vector<16x32xf32> to vector<16xf32>
    %281 = vector.shape_cast %280 : vector<16xf32> to vector<16x1xf32>
    %cst_122 = arith.constant 3.200000e+01 : f32
    %282 = vector.broadcast %cst_122 : f32 to vector<16x1xf32>
    %283 = arith.divf %281, %282 : vector<16x1xf32>
    %284 = vector.broadcast %283 : vector<16x1xf32> to vector<16x32xf32>
    %285 = arith.subf %277, %284 : vector<16x32xf32>
    %286 = arith.mulf %285, %285 : vector<16x32xf32>
    %cst_123 = arith.constant dense<0.000000e+00> : vector<16xf32>
    %287 = vector.multi_reduction <add>, %286, %cst_123 [1] : vector<16x32xf32> to vector<16xf32>
    %288 = vector.shape_cast %287 : vector<16xf32> to vector<16x1xf32>
    %cst_124 = arith.constant 3.200000e+01 : f32
    %289 = vector.broadcast %cst_124 : f32 to vector<16x1xf32>
    %290 = arith.divf %288, %289 : vector<16x1xf32>
    %cst_125 = arith.constant 9.99999974E-6 : f32
    %291 = vector.broadcast %cst_125 : f32 to vector<16x1xf32>
    %292 = arith.addf %290, %291 : vector<16x1xf32>
    %293 = math.rsqrt %292 : vector<16x1xf32>
    %294 = vector.broadcast %293 : vector<16x1xf32> to vector<16x32xf32>
    %295 = arith.mulf %285, %294 : vector<16x32xf32>
    %296 = vector.broadcast %279 : vector<1x32xf32> to vector<16x32xf32>
    %297 = arith.addf %295, %296 : vector<16x32xf32>
    %298 = vector.broadcast %278 : vector<1x32xf32> to vector<16x32xf32>
    %299 = arith.mulf %297, %298 : vector<16x32xf32>
    %300 = arith.truncf %299 : vector<16x32xf32> to vector<16x32xbf16>
    %c0_126 = arith.constant 0 : index
    %c0_127 = arith.constant 0 : index
    %301 = vector.load %arg21[%c0_126, %c0_127] : memref<32x64xbf16, #tpu.memory_space<vmem>>, vector<32x64xbf16>
    %cst_128 = arith.constant dense<0.000000e+00> : vector<16x64xf32>
    %302 = tpu.matmul %300, %301, %cst_128 {dimension_numbers = #tpu.dot_dimension_numbers<[1], [0], [0], [1], [0, 0, 1, 1], [], []>} : vector<16x32xbf16>, vector<32x64xbf16>, vector<16x64xf32> -> vector<16x64xf32>
    %c0_129 = arith.constant 0 : index
    %c0_130 = arith.constant 0 : index
    %303 = vector.load %arg22[%c0_129, %c0_130] : memref<1x64xf32, #tpu.memory_space<vmem>>, vector<1x64xf32>
    %304 = vector.broadcast %303 : vector<1x64xf32> to vector<16x64xf32>
    %305 = arith.addf %302, %304 : vector<16x64xf32>
    %cst_131 = arith.constant 5.000000e-01 : f32
    %306 = vector.broadcast %cst_131 : f32 to vector<16x64xf32>
    %307 = arith.mulf %306, %305 : vector<16x64xf32>
    %cst_132 = arith.constant 4.471500e-02 : f32
    %308 = vector.broadcast %cst_132 : f32 to vector<16x64xf32>
    %309 = arith.mulf %308, %305 : vector<16x64xf32>
    %310 = arith.mulf %309, %305 : vector<16x64xf32>
    %311 = arith.mulf %310, %305 : vector<16x64xf32>
    %312 = arith.addf %305, %311 : vector<16x64xf32>
    %cst_133 = arith.constant 0.797884583 : f32
    %313 = vector.broadcast %cst_133 : f32 to vector<16x64xf32>
    %314 = arith.mulf %313, %312 : vector<16x64xf32>
    %315 = math.tanh %314 : vector<16x64xf32>
    %cst_134 = arith.constant 1.000000e+00 : f32
    %316 = vector.broadcast %cst_134 : f32 to vector<16x64xf32>
    %317 = arith.addf %316, %315 : vector<16x64xf32>
    %318 = arith.mulf %307, %317 : vector<16x64xf32>
    %319 = arith.truncf %318 : vector<16x64xf32> to vector<16x64xbf16>
    %c0_135 = arith.constant 0 : index
    %c0_136 = arith.constant 0 : index
    %320 = vector.load %arg23[%c0_135, %c0_136] : memref<64x32xbf16, #tpu.memory_space<vmem>>, vector<64x32xbf16>
    %cst_137 = arith.constant dense<0.000000e+00> : vector<16x32xf32>
    %321 = tpu.matmul %319, %320, %cst_137 {dimension_numbers = #tpu.dot_dimension_numbers<[1], [0], [0], [1], [0, 0, 1, 1], [], []>} : vector<16x64xbf16>, vector<64x32xbf16>, vector<16x32xf32> -> vector<16x32xf32>
    %322 = arith.addf %277, %321 : vector<16x32xf32>
    %c0_138 = arith.constant 0 : index
    %c0_139 = arith.constant 0 : index
    %323 = vector.load %arg24[%c0_138, %c0_139] : memref<1x32xf32, #tpu.memory_space<vmem>>, vector<1x32xf32>
    %324 = vector.broadcast %323 : vector<1x32xf32> to vector<16x32xf32>
    %325 = arith.addf %322, %324 : vector<16x32xf32>
    %326 = vector.shape_cast %325 : vector<16x32xf32> to vector<2x8x32xf32>
    %c0_140 = arith.constant 0 : index
    %c0_141 = arith.constant 0 : index
    %c0_142 = arith.constant 0 : index
    %327 = vector.load %arg25[%c0_140, %c0_141, %c0_142] : memref<2x8x32xf32, #tpu.memory_space<vmem>>, vector<2x8x32xf32>
    tpu.vector_store %arg25[%c0_140, %c0_141, %c0_142], %326 {strides = array<i32>} : memref<2x8x32xf32, #tpu.memory_space<vmem>>, vector<2x8x32xf32>,
    %328 = vector.extract_strided_slice %9 {offsets = [3, 0], sizes = [1, 32], strides = [1, 1]} : vector<4x32xf32> to vector<1x32xf32>
    %329 = vector.extract_strided_slice %10 {offsets = [3, 0], sizes = [1, 32], strides = [1, 1]} : vector<4x32xf32> to vector<1x32xf32>
    %cst_143 = arith.constant dense<0.000000e+00> : vector<16xf32>
    %330 = vector.multi_reduction <add>, %325, %cst_143 [1] : vector<16x32xf32> to vector<16xf32>
    %331 = vector.shape_cast %330 : vector<16xf32> to vector<16x1xf32>
    %cst_144 = arith.constant 3.200000e+01 : f32
    %332 = vector.broadcast %cst_144 : f32 to vector<16x1xf32>
    %333 = arith.divf %331, %332 : vector<16x1xf32>
    %334 = vector.broadcast %333 : vector<16x1xf32> to vector<16x32xf32>
    %335 = arith.subf %325, %334 : vector<16x32xf32>
    %336 = arith.mulf %335, %335 : vector<16x32xf32>
    %cst_145 = arith.constant dense<0.000000e+00> : vector<16xf32>
    %337 = vector.multi_reduction <add>, %336, %cst_145 [1] : vector<16x32xf32> to vector<16xf32>
    %338 = vector.shape_cast %337 : vector<16xf32> to vector<16x1xf32>
    %cst_146 = arith.constant 3.200000e+01 : f32
    %339 = vector.broadcast %cst_146 : f32 to vector<16x1xf32>
    %340 = arith.divf %338, %339 : vector<16x1xf32>
    %cst_147 = arith.constant 9.99999974E-6 : f32
    %341 = vector.broadcast %cst_147 : f32 to vector<16x1xf32>
    %342 = arith.addf %340, %341 : vector<16x1xf32>
    %343 = math.rsqrt %342 : vector<16x1xf32>
    %344 = vector.broadcast %343 : vector<16x1xf32> to vector<16x32xf32>
    %345 = arith.mulf %335, %344 : vector<16x32xf32>
    %346 = vector.broadcast %329 : vector<1x32xf32> to vector<16x32xf32>
    %347 = arith.addf %345, %346 : vector<16x32xf32>
    %348 = vector.broadcast %328 : vector<1x32xf32> to vector<16x32xf32>
    %349 = arith.mulf %347, %348 : vector<16x32xf32>
    %350 = vector.shape_cast %349 : vector<16x32xf32> to vector<2x8x32xf32>
    %c0_148 = arith.constant 0 : index
    %c0_149 = arith.constant 0 : index
    %c0_150 = arith.constant 0 : index
    %351 = vector.load %arg26[%c0_148, %c0_149, %c0_150] : memref<2x8x32xf32, #tpu.memory_space<vmem>>, vector<2x8x32xf32>
    tpu.vector_store %arg26[%c0_148, %c0_149, %c0_150], %350 {strides = array<i32>} : memref<2x8x32xf32, #tpu.memory_space<vmem>>, vector<2x8x32xf32>,
    return
  }
}

module attributes {stable_mosaic.version = 11 : i64} {
  func.func @_fused_layer_kernel(%arg0: memref<2x8x32xf32, #tpu.memory_space<vmem>>, %arg1: memref<2x16x32xf32, #tpu.memory_space<vmem>>, %arg2: memref<2x8x32xf32, #tpu.memory_space<vmem>>, %arg3: memref<2x16x32xf32, #tpu.memory_space<vmem>>, %arg4: memref<2x8x8xf32, #tpu.memory_space<vmem>>, %arg5: memref<4x32xf32, #tpu.memory_space<vmem>>, %arg6: memref<4x32xf32, #tpu.memory_space<vmem>>, %arg7: memref<32x64xbf16, #tpu.memory_space<vmem>>, %arg8: memref<1x64xf32, #tpu.memory_space<vmem>>, %arg9: memref<32x32xbf16, #tpu.memory_space<vmem>>, %arg10: memref<1x32xf32, #tpu.memory_space<vmem>>, %arg11: memref<32x32xbf16, #tpu.memory_space<vmem>>, %arg12: memref<1x32xf32, #tpu.memory_space<vmem>>, %arg13: memref<32x32xbf16, #tpu.memory_space<vmem>>, %arg14: memref<1x32xf32, #tpu.memory_space<vmem>>, %arg15: memref<32x32xbf16, #tpu.memory_space<vmem>>, %arg16: memref<1x32xf32, #tpu.memory_space<vmem>>, %arg17: memref<32x32xbf16, #tpu.memory_space<vmem>>, %arg18: memref<1x32xf32, #tpu.memory_space<vmem>>, %arg19: memref<32x32xbf16, #tpu.memory_space<vmem>>, %arg20: memref<1x32xf32, #tpu.memory_space<vmem>>, %arg21: memref<32x64xbf16, #tpu.memory_space<vmem>>, %arg22: memref<1x64xf32, #tpu.memory_space<vmem>>, %arg23: memref<64x32xbf16, #tpu.memory_space<vmem>>, %arg24: memref<1x32xf32, #tpu.memory_space<vmem>>, %arg25: memref<2x8x32xf32, #tpu.memory_space<vmem>>, %arg26: memref<2x8x32xf32, #tpu.memory_space<vmem>>) attributes {dimension_semantics = [], scalar_prefetch = 0 : i64, scratch_operands = 1 : i64, tpu.core_type = #tpu.core_type<tc>} {
    %c0 = arith.constant 0 : index
    %c0_0 = arith.constant 0 : index
    %c0_1 = arith.constant 0 : index
    %0 = vector.load %arg4[%c0, %c0_0, %c0_1] : memref<2x8x8xf32, #tpu.memory_space<vmem>>, vector<2x8x8xf32>
    %c0_2 = arith.constant 0 : index
    %c0_3 = arith.constant 0 : index
    %c0_4 = arith.constant 0 : index
    %1 = vector.load %arg0[%c0_2, %c0_3, %c0_4] : memref<2x8x32xf32, #tpu.memory_space<vmem>>, vector<2x8x32xf32>
    %2 = vector.shape_cast %1 : vector<2x8x32xf32> to vector<16x32xf32>
    %c0_5 = arith.constant 0 : index
    %c0_6 = arith.constant 0 : index
    %c0_7 = arith.constant 0 : index
    %3 = vector.load %arg1[%c0_5, %c0_6, %c0_7] : memref<2x16x32xf32, #tpu.memory_space<vmem>>, vector<2x16x32xf32>
    %4 = vector.shape_cast %3 : vector<2x16x32xf32> to vector<32x32xf32>
    %c0_8 = arith.constant 0 : index
    %c0_9 = arith.constant 0 : index
    %c0_10 = arith.constant 0 : index
    %5 = vector.load %arg2[%c0_8, %c0_9, %c0_10] : memref<2x8x32xf32, #tpu.memory_space<vmem>>, vector<2x8x32xf32>
    %6 = vector.shape_cast %5 : vector<2x8x32xf32> to vector<16x32xf32>
    %c0_11 = arith.constant 0 : index
    %c0_12 = arith.constant 0 : index
    %c0_13 = arith.constant 0 : index
    %7 = vector.load %arg3[%c0_11, %c0_12, %c0_13] : memref<2x16x32xf32, #tpu.memory_space<vmem>>, vector<2x16x32xf32>
    %8 = vector.shape_cast %7 : vector<2x16x32xf32> to vector<32x32xf32>
    %c0_14 = arith.constant 0 : index
    %c0_15 = arith.constant 0 : index
    %9 = vector.load %arg5[%c0_14, %c0_15] : memref<4x32xf32, #tpu.memory_space<vmem>>, vector<4x32xf32>
    %c0_16 = arith.constant 0 : index
    %c0_17 = arith.constant 0 : index
    %10 = vector.load %arg6[%c0_16, %c0_17] : memref<4x32xf32, #tpu.memory_space<vmem>>, vector<4x32xf32>
    %11 = vector.extract_strided_slice %9 {offsets = [0, 0], sizes = [1, 32], strides = [1, 1]} : vector<4x32xf32> to vector<1x32xf32>
    %12 = vector.extract_strided_slice %10 {offsets = [0, 0], sizes = [1, 32], strides = [1, 1]} : vector<4x32xf32> to vector<1x32xf32>
    %cst = arith.constant dense<0.000000e+00> : vector<16xf32>
    %13 = vector.multi_reduction <add>, %2, %cst [1] : vector<16x32xf32> to vector<16xf32>
    %14 = vector.shape_cast %13 : vector<16xf32> to vector<16x1xf32>
    %cst_18 = arith.constant 3.200000e+01 : f32
    %15 = vector.broadcast %cst_18 : f32 to vector<16x1xf32>
    %16 = arith.divf %14, %15 : vector<16x1xf32>
    %17 = vector.broadcast %16 : vector<16x1xf32> to vector<16x32xf32>
    %18 = arith.subf %2, %17 : vector<16x32xf32>
    %19 = arith.mulf %18, %18 : vector<16x32xf32>
    %cst_19 = arith.constant dense<0.000000e+00> : vector<16xf32>
    %20 = vector.multi_reduction <add>, %19, %cst_19 [1] : vector<16x32xf32> to vector<16xf32>
    %21 = vector.shape_cast %20 : vector<16xf32> to vector<16x1xf32>
    %cst_20 = arith.constant 3.200000e+01 : f32
    %22 = vector.broadcast %cst_20 : f32 to vector<16x1xf32>
    %23 = arith.divf %21, %22 : vector<16x1xf32>
    %cst_21 = arith.constant 9.99999974E-6 : f32
    %24 = vector.broadcast %cst_21 : f32 to vector<16x1xf32>
    %25 = arith.addf %23, %24 : vector<16x1xf32>
    %26 = math.rsqrt %25 : vector<16x1xf32>
    %27 = vector.broadcast %26 : vector<16x1xf32> to vector<16x32xf32>
    %28 = arith.mulf %18, %27 : vector<16x32xf32>
    %29 = vector.broadcast %12 : vector<1x32xf32> to vector<16x32xf32>
    %30 = arith.addf %28, %29 : vector<16x32xf32>
    %31 = vector.broadcast %11 : vector<1x32xf32> to vector<16x32xf32>
    %32 = arith.mulf %30, %31 : vector<16x32xf32>
    %33 = arith.addf %32, %6 : vector<16x32xf32>
    %34 = arith.truncf %33 : vector<16x32xf32> to vector<16x32xbf16>
    %c0_22 = arith.constant 0 : index
    %c0_23 = arith.constant 0 : index
    %35 = vector.load %arg7[%c0_22, %c0_23] : memref<32x64xbf16, #tpu.memory_space<vmem>>, vector<32x64xbf16>
    %cst_24 = arith.constant dense<0.000000e+00> : vector<16x64xf32>
    %36 = tpu.matmul %34, %35, %cst_24 {dimension_numbers = #tpu.dot_dimension_numbers<[1], [0], [0], [1], [0, 0, 1, 1], [], []>} : vector<16x32xbf16>, vector<32x64xbf16>, vector<16x64xf32> -> vector<16x64xf32>
    %c0_25 = arith.constant 0 : index
    %c0_26 = arith.constant 0 : index
    %37 = vector.load %arg8[%c0_25, %c0_26] : memref<1x64xf32, #tpu.memory_space<vmem>>, vector<1x64xf32>
    %38 = vector.broadcast %37 : vector<1x64xf32> to vector<16x64xf32>
    %39 = arith.addf %36, %38 : vector<16x64xf32>
    %40 = arith.truncf %32 : vector<16x32xf32> to vector<16x32xbf16>
    %c0_27 = arith.constant 0 : index
    %c0_28 = arith.constant 0 : index
    %41 = vector.load %arg9[%c0_27, %c0_28] : memref<32x32xbf16, #tpu.memory_space<vmem>>, vector<32x32xbf16>
    %cst_29 = arith.constant dense<0.000000e+00> : vector<16x32xf32>
    %42 = tpu.matmul %40, %41, %cst_29 {dimension_numbers = #tpu.dot_dimension_numbers<[1], [0], [0], [1], [0, 0, 1, 1], [], []>} : vector<16x32xbf16>, vector<32x32xbf16>, vector<16x32xf32> -> vector<16x32xf32>
    %c0_30 = arith.constant 0 : index
    %c0_31 = arith.constant 0 : index
    %43 = vector.load %arg10[%c0_30, %c0_31] : memref<1x32xf32, #tpu.memory_space<vmem>>, vector<1x32xf32>
    %44 = vector.broadcast %43 : vector<1x32xf32> to vector<16x32xf32>
    %45 = arith.addf %42, %44 : vector<16x32xf32>
    %46 = vector.extract_strided_slice %39 {offsets = [0, 0], sizes = [16, 32], strides = [1, 1]} : vector<16x64xf32> to vector<16x32xf32>
    %47 = vector.extract_strided_slice %39 {offsets = [0, 32], sizes = [16, 32], strides = [1, 1]} : vector<16x64xf32> to vector<16x32xf32>
    %c0_32 = arith.constant 0 : index
    %c0_33 = arith.constant 0 : index
    %48 = vector.load %arg11[%c0_32, %c0_33] : memref<32x32xbf16, #tpu.memory_space<vmem>>, vector<32x32xbf16>
    %c0_34 = arith.constant 0 : index
    %c0_35 = arith.constant 0 : index
    %49 = vector.load %arg12[%c0_34, %c0_35] : memref<1x32xf32, #tpu.memory_space<vmem>>, vector<1x32xf32>
    %50 = vector.shape_cast %46 : vector<16x32xf32> to vector<2x8x32xf32>
    %51 = vector.shape_cast %47 : vector<16x32xf32> to vector<2x8x32xf32>
    %52 = vector.shape_cast %45 : vector<16x32xf32> to vector<2x8x32xf32>
    %53 = vector.extract_strided_slice %50 {offsets = [0, 0, 0], sizes = [2, 8, 8], strides = [1, 1, 1]} : vector<2x8x32xf32> to vector<2x8x8xf32>
    %54 = arith.truncf %53 : vector<2x8x8xf32> to vector<2x8x8xbf16>
    %55 = vector.extract_strided_slice %51 {offsets = [0, 0, 0], sizes = [2, 8, 8], strides = [1, 1, 1]} : vector<2x8x32xf32> to vector<2x8x8xf32>
    %56 = arith.truncf %55 : vector<2x8x8xf32> to vector<2x8x8xbf16>
    "tpu.trace_start"() <{level = 10 : i32, message = "bqd,bkd->bqk"}> : () -> ()
    %cst_36 = arith.constant dense<0.000000e+00> : vector<2x8x8xf32>
    %57 = tpu.matmul %54, %56, %cst_36 {dimension_numbers = #tpu.dot_dimension_numbers<[2], [2], [1], [1], [0, 0, 0, 1, 1, 1], [0], [0]>} : vector<2x8x8xbf16>, vector<2x8x8xbf16>, vector<2x8x8xf32> -> vector<2x8x8xf32>
    "tpu.trace_stop"() : () -> ()
    %58 = arith.addf %57, %0 : vector<2x8x8xf32>
    %cst_37 = arith.constant dense<0xFF800000> : vector<2x8xf32>
    %59 = vector.multi_reduction <maximumf>, %58, %cst_37 [2] : vector<2x8x8xf32> to vector<2x8xf32>
    %60 = vector.shape_cast %59 : vector<2x8xf32> to vector<2x8x1xf32>
    %61 = vector.broadcast %60 : vector<2x8x1xf32> to vector<2x8x8xf32>
    %62 = arith.subf %58, %61 : vector<2x8x8xf32>
    %63 = math.exp %62 : vector<2x8x8xf32>
    %cst_38 = arith.constant dense<0.000000e+00> : vector<2x8xf32>
    %64 = vector.multi_reduction <add>, %63, %cst_38 [2] : vector<2x8x8xf32> to vector<2x8xf32>
    %65 = vector.shape_cast %64 : vector<2x8xf32> to vector<2x8x1xf32>
    %66 = tpu.reciprocal %65 {approx = true} : vector<2x8x1xf32> -> vector<2x8x1xf32>
    %67 = vector.broadcast %66 : vector<2x8x1xf32> to vector<2x8x8xf32>
    %68 = arith.mulf %63, %67 : vector<2x8x8xf32>
    %69 = arith.truncf %68 : vector<2x8x8xf32> to vector<2x8x8xbf16>
    %70 = vector.extract_strided_slice %52 {offsets = [0, 0, 0], sizes = [2, 8, 8], strides = [1, 1, 1]} : vector<2x8x32xf32> to vector<2x8x8xf32>
    %71 = arith.truncf %70 : vector<2x8x8xf32> to vector<2x8x8xbf16>
    "tpu.trace_start"() <{level = 10 : i32, message = "bqk,bkd->bqd"}> : () -> ()
    %cst_39 = arith.constant dense<0.000000e+00> : vector<2x8x8xf32>
    %72 = tpu.matmul %69, %71, %cst_39 {dimension_numbers = #tpu.dot_dimension_numbers<[2], [1], [1], [2], [0, 0, 0, 1, 1, 2], [0], [0]>} : vector<2x8x8xbf16>, vector<2x8x8xbf16>, vector<2x8x8xf32> -> vector<2x8x8xf32>
    "tpu.trace_stop"() : () -> ()
    %c0_40 = arith.constant 0 : index
    %c0_41 = arith.constant 0 : index
    %c0_42 = arith.constant 0 : index
    %73 = vector.load %arg26[%c0_40, %c0_41, %c0_42] : memref<2x8x32xf32, #tpu.memory_space<vmem>>, vector<2x8x8xf32>
    tpu.vector_store %arg26[%c0_40, %c0_41, %c0_42], %72 {strides = array<i32>} : memref<2x8x32xf32, #tpu.memory_space<vmem>>, vector<2x8x8xf32>,
    %74 = vector.extract_strided_slice %50 {offsets = [0, 0, 8], sizes = [2, 8, 8], strides = [1, 1, 1]} : vector<2x8x32xf32> to vector<2x8x8xf32>
    %75 = arith.truncf %74 : vector<2x8x8xf32> to vector<2x8x8xbf16>
    %76 = vector.extract_strided_slice %51 {offsets = [0, 0, 8], sizes = [2, 8, 8], strides = [1, 1, 1]} : vector<2x8x32xf32> to vector<2x8x8xf32>
    %77 = arith.truncf %76 : vector<2x8x8xf32> to vector<2x8x8xbf16>
    "tpu.trace_start"() <{level = 10 : i32, message = "bqd,bkd->bqk"}> : () -> ()
    %cst_43 = arith.constant dense<0.000000e+00> : vector<2x8x8xf32>
    %78 = tpu.matmul %75, %77, %cst_43 {dimension_numbers = #tpu.dot_dimension_numbers<[2], [2], [1], [1], [0, 0, 0, 1, 1, 1], [0], [0]>} : vector<2x8x8xbf16>, vector<2x8x8xbf16>, vector<2x8x8xf32> -> vector<2x8x8xf32>
    "tpu.trace_stop"() : () -> ()
    %79 = arith.addf %78, %0 : vector<2x8x8xf32>
    %cst_44 = arith.constant dense<0xFF800000> : vector<2x8xf32>
    %80 = vector.multi_reduction <maximumf>, %79, %cst_44 [2] : vector<2x8x8xf32> to vector<2x8xf32>
    %81 = vector.shape_cast %80 : vector<2x8xf32> to vector<2x8x1xf32>
    %82 = vector.broadcast %81 : vector<2x8x1xf32> to vector<2x8x8xf32>
    %83 = arith.subf %79, %82 : vector<2x8x8xf32>
    %84 = math.exp %83 : vector<2x8x8xf32>
    %cst_45 = arith.constant dense<0.000000e+00> : vector<2x8xf32>
    %85 = vector.multi_reduction <add>, %84, %cst_45 [2] : vector<2x8x8xf32> to vector<2x8xf32>
    %86 = vector.shape_cast %85 : vector<2x8xf32> to vector<2x8x1xf32>
    %87 = tpu.reciprocal %86 {approx = true} : vector<2x8x1xf32> -> vector<2x8x1xf32>
    %88 = vector.broadcast %87 : vector<2x8x1xf32> to vector<2x8x8xf32>
    %89 = arith.mulf %84, %88 : vector<2x8x8xf32>
    %90 = arith.truncf %89 : vector<2x8x8xf32> to vector<2x8x8xbf16>
    %91 = vector.extract_strided_slice %52 {offsets = [0, 0, 8], sizes = [2, 8, 8], strides = [1, 1, 1]} : vector<2x8x32xf32> to vector<2x8x8xf32>
    %92 = arith.truncf %91 : vector<2x8x8xf32> to vector<2x8x8xbf16>
    "tpu.trace_start"() <{level = 10 : i32, message = "bqk,bkd->bqd"}> : () -> ()
    %cst_46 = arith.constant dense<0.000000e+00> : vector<2x8x8xf32>
    %93 = tpu.matmul %90, %92, %cst_46 {dimension_numbers = #tpu.dot_dimension_numbers<[2], [1], [1], [2], [0, 0, 0, 1, 1, 2], [0], [0]>} : vector<2x8x8xbf16>, vector<2x8x8xbf16>, vector<2x8x8xf32> -> vector<2x8x8xf32>
    "tpu.trace_stop"() : () -> ()
    %c0_47 = arith.constant 0 : index
    %c0_48 = arith.constant 0 : index
    %c8 = arith.constant 8 : index
    %94 = vector.load %arg26[%c0_47, %c0_48, %c8] : memref<2x8x32xf32, #tpu.memory_space<vmem>>, vector<2x8x8xf32>
    tpu.vector_store %arg26[%c0_47, %c0_48, %c8], %93 {strides = array<i32>} : memref<2x8x32xf32, #tpu.memory_space<vmem>>, vector<2x8x8xf32>,
    %95 = vector.extract_strided_slice %50 {offsets = [0, 0, 16], sizes = [2, 8, 8], strides = [1, 1, 1]} : vector<2x8x32xf32> to vector<2x8x8xf32>
    %96 = arith.truncf %95 : vector<2x8x8xf32> to vector<2x8x8xbf16>
    %97 = vector.extract_strided_slice %51 {offsets = [0, 0, 16], sizes = [2, 8, 8], strides = [1, 1, 1]} : vector<2x8x32xf32> to vector<2x8x8xf32>
    %98 = arith.truncf %97 : vector<2x8x8xf32> to vector<2x8x8xbf16>
    "tpu.trace_start"() <{level = 10 : i32, message = "bqd,bkd->bqk"}> : () -> ()
    %cst_49 = arith.constant dense<0.000000e+00> : vector<2x8x8xf32>
    %99 = tpu.matmul %96, %98, %cst_49 {dimension_numbers = #tpu.dot_dimension_numbers<[2], [2], [1], [1], [0, 0, 0, 1, 1, 1], [0], [0]>} : vector<2x8x8xbf16>, vector<2x8x8xbf16>, vector<2x8x8xf32> -> vector<2x8x8xf32>
    "tpu.trace_stop"() : () -> ()
    %100 = arith.addf %99, %0 : vector<2x8x8xf32>
    %cst_50 = arith.constant dense<0xFF800000> : vector<2x8xf32>
    %101 = vector.multi_reduction <maximumf>, %100, %cst_50 [2] : vector<2x8x8xf32> to vector<2x8xf32>
    %102 = vector.shape_cast %101 : vector<2x8xf32> to vector<2x8x1xf32>
    %103 = vector.broadcast %102 : vector<2x8x1xf32> to vector<2x8x8xf32>
    %104 = arith.subf %100, %103 : vector<2x8x8xf32>
    %105 = math.exp %104 : vector<2x8x8xf32>
    %cst_51 = arith.constant dense<0.000000e+00> : vector<2x8xf32>
    %106 = vector.multi_reduction <add>, %105, %cst_51 [2] : vector<2x8x8xf32> to vector<2x8xf32>
    %107 = vector.shape_cast %106 : vector<2x8xf32> to vector<2x8x1xf32>
    %108 = tpu.reciprocal %107 {approx = true} : vector<2x8x1xf32> -> vector<2x8x1xf32>
    %109 = vector.broadcast %108 : vector<2x8x1xf32> to vector<2x8x8xf32>
    %110 = arith.mulf %105, %109 : vector<2x8x8xf32>
    %111 = arith.truncf %110 : vector<2x8x8xf32> to vector<2x8x8xbf16>
    %112 = vector.extract_strided_slice %52 {offsets = [0, 0, 16], sizes = [2, 8, 8], strides = [1, 1, 1]} : vector<2x8x32xf32> to vector<2x8x8xf32>
    %113 = arith.truncf %112 : vector<2x8x8xf32> to vector<2x8x8xbf16>
    "tpu.trace_start"() <{level = 10 : i32, message = "bqk,bkd->bqd"}> : () -> ()
    %cst_52 = arith.constant dense<0.000000e+00> : vector<2x8x8xf32>
    %114 = tpu.matmul %111, %113, %cst_52 {dimension_numbers = #tpu.dot_dimension_numbers<[2], [1], [1], [2], [0, 0, 0, 1, 1, 2], [0], [0]>} : vector<2x8x8xbf16>, vector<2x8x8xbf16>, vector<2x8x8xf32> -> vector<2x8x8xf32>
    "tpu.trace_stop"() : () -> ()
    %c0_53 = arith.constant 0 : index
    %c0_54 = arith.constant 0 : index
    %c16 = arith.constant 16 : index
    %115 = vector.load %arg26[%c0_53, %c0_54, %c16] : memref<2x8x32xf32, #tpu.memory_space<vmem>>, vector<2x8x8xf32>
    tpu.vector_store %arg26[%c0_53, %c0_54, %c16], %114 {strides = array<i32>} : memref<2x8x32xf32, #tpu.memory_space<vmem>>, vector<2x8x8xf32>,
    %116 = vector.extract_strided_slice %50 {offsets = [0, 0, 24], sizes = [2, 8, 8], strides = [1, 1, 1]} : vector<2x8x32xf32> to vector<2x8x8xf32>
    %117 = arith.truncf %116 : vector<2x8x8xf32> to vector<2x8x8xbf16>
    %118 = vector.extract_strided_slice %51 {offsets = [0, 0, 24], sizes = [2, 8, 8], strides = [1, 1, 1]} : vector<2x8x32xf32> to vector<2x8x8xf32>
    %119 = arith.truncf %118 : vector<2x8x8xf32> to vector<2x8x8xbf16>
    "tpu.trace_start"() <{level = 10 : i32, message = "bqd,bkd->bqk"}> : () -> ()
    %cst_55 = arith.constant dense<0.000000e+00> : vector<2x8x8xf32>
    %120 = tpu.matmul %117, %119, %cst_55 {dimension_numbers = #tpu.dot_dimension_numbers<[2], [2], [1], [1], [0, 0, 0, 1, 1, 1], [0], [0]>} : vector<2x8x8xbf16>, vector<2x8x8xbf16>, vector<2x8x8xf32> -> vector<2x8x8xf32>
    "tpu.trace_stop"() : () -> ()
    %121 = arith.addf %120, %0 : vector<2x8x8xf32>
    %cst_56 = arith.constant dense<0xFF800000> : vector<2x8xf32>
    %122 = vector.multi_reduction <maximumf>, %121, %cst_56 [2] : vector<2x8x8xf32> to vector<2x8xf32>
    %123 = vector.shape_cast %122 : vector<2x8xf32> to vector<2x8x1xf32>
    %124 = vector.broadcast %123 : vector<2x8x1xf32> to vector<2x8x8xf32>
    %125 = arith.subf %121, %124 : vector<2x8x8xf32>
    %126 = math.exp %125 : vector<2x8x8xf32>
    %cst_57 = arith.constant dense<0.000000e+00> : vector<2x8xf32>
    %127 = vector.multi_reduction <add>, %126, %cst_57 [2] : vector<2x8x8xf32> to vector<2x8xf32>
    %128 = vector.shape_cast %127 : vector<2x8xf32> to vector<2x8x1xf32>
    %129 = tpu.reciprocal %128 {approx = true} : vector<2x8x1xf32> -> vector<2x8x1xf32>
    %130 = vector.broadcast %129 : vector<2x8x1xf32> to vector<2x8x8xf32>
    %131 = arith.mulf %126, %130 : vector<2x8x8xf32>
    %132 = arith.truncf %131 : vector<2x8x8xf32> to vector<2x8x8xbf16>
    %133 = vector.extract_strided_slice %52 {offsets = [0, 0, 24], sizes = [2, 8, 8], strides = [1, 1, 1]} : vector<2x8x32xf32> to vector<2x8x8xf32>
    %134 = arith.truncf %133 : vector<2x8x8xf32> to vector<2x8x8xbf16>
    "tpu.trace_start"() <{level = 10 : i32, message = "bqk,bkd->bqd"}> : () -> ()
    %cst_58 = arith.constant dense<0.000000e+00> : vector<2x8x8xf32>
    %135 = tpu.matmul %132, %134, %cst_58 {dimension_numbers = #tpu.dot_dimension_numbers<[2], [1], [1], [2], [0, 0, 0, 1, 1, 2], [0], [0]>} : vector<2x8x8xbf16>, vector<2x8x8xbf16>, vector<2x8x8xf32> -> vector<2x8x8xf32>
    "tpu.trace_stop"() : () -> ()
    %c0_59 = arith.constant 0 : index
    %c0_60 = arith.constant 0 : index
    %c24 = arith.constant 24 : index
    %136 = vector.load %arg26[%c0_59, %c0_60, %c24] : memref<2x8x32xf32, #tpu.memory_space<vmem>>, vector<2x8x8xf32>
    tpu.vector_store %arg26[%c0_59, %c0_60, %c24], %135 {strides = array<i32>} : memref<2x8x32xf32, #tpu.memory_space<vmem>>, vector<2x8x8xf32>,
    %c0_61 = arith.constant 0 : index
    %c0_62 = arith.constant 0 : index
    %c0_63 = arith.constant 0 : index
    %137 = vector.load %arg26[%c0_61, %c0_62, %c0_63] : memref<2x8x32xf32, #tpu.memory_space<vmem>>, vector<2x8x32xf32>
    %138 = vector.shape_cast %137 : vector<2x8x32xf32> to vector<16x32xf32>
    %139 = arith.truncf %138 : vector<16x32xf32> to vector<16x32xbf16>
    %cst_64 = arith.constant dense<0.000000e+00> : vector<16x32xf32>
    %140 = tpu.matmul %139, %48, %cst_64 {dimension_numbers = #tpu.dot_dimension_numbers<[1], [0], [0], [1], [0, 0, 1, 1], [], []>} : vector<16x32xbf16>, vector<32x32xbf16>, vector<16x32xf32> -> vector<16x32xf32>
    %141 = vector.broadcast %49 : vector<1x32xf32> to vector<16x32xf32>
    %142 = arith.addf %140, %141 : vector<16x32xf32>
    %143 = arith.addf %2, %142 : vector<16x32xf32>
    %144 = vector.extract_strided_slice %9 {offsets = [1, 0], sizes = [1, 32], strides = [1, 1]} : vector<4x32xf32> to vector<1x32xf32>
    %145 = vector.extract_strided_slice %10 {offsets = [1, 0], sizes = [1, 32], strides = [1, 1]} : vector<4x32xf32> to vector<1x32xf32>
    %cst_65 = arith.constant dense<0.000000e+00> : vector<16xf32>
    %146 = vector.multi_reduction <add>, %143, %cst_65 [1] : vector<16x32xf32> to vector<16xf32>
    %147 = vector.shape_cast %146 : vector<16xf32> to vector<16x1xf32>
    %cst_66 = arith.constant 3.200000e+01 : f32
    %148 = vector.broadcast %cst_66 : f32 to vector<16x1xf32>
    %149 = arith.divf %147, %148 : vector<16x1xf32>
    %150 = vector.broadcast %149 : vector<16x1xf32> to vector<16x32xf32>
    %151 = arith.subf %143, %150 : vector<16x32xf32>
    %152 = arith.mulf %151, %151 : vector<16x32xf32>
    %cst_67 = arith.constant dense<0.000000e+00> : vector<16xf32>
    %153 = vector.multi_reduction <add>, %152, %cst_67 [1] : vector<16x32xf32> to vector<16xf32>
    %154 = vector.shape_cast %153 : vector<16xf32> to vector<16x1xf32>
    %cst_68 = arith.constant 3.200000e+01 : f32
    %155 = vector.broadcast %cst_68 : f32 to vector<16x1xf32>
    %156 = arith.divf %154, %155 : vector<16x1xf32>
    %cst_69 = arith.constant 9.99999974E-6 : f32
    %157 = vector.broadcast %cst_69 : f32 to vector<16x1xf32>
    %158 = arith.addf %156, %157 : vector<16x1xf32>
    %159 = math.rsqrt %158 : vector<16x1xf32>
    %160 = vector.broadcast %159 : vector<16x1xf32> to vector<16x32xf32>
    %161 = arith.mulf %151, %160 : vector<16x32xf32>
    %162 = vector.broadcast %145 : vector<1x32xf32> to vector<16x32xf32>
    %163 = arith.addf %161, %162 : vector<16x32xf32>
    %164 = vector.broadcast %144 : vector<1x32xf32> to vector<16x32xf32>
    %165 = arith.mulf %163, %164 : vector<16x32xf32>
    %166 = arith.addf %165, %6 : vector<16x32xf32>
    %167 = arith.truncf %166 : vector<16x32xf32> to vector<16x32xbf16>
    %c0_70 = arith.constant 0 : index
    %c0_71 = arith.constant 0 : index
    %168 = vector.load %arg13[%c0_70, %c0_71] : memref<32x32xbf16, #tpu.memory_space<vmem>>, vector<32x32xbf16>
    %cst_72 = arith.constant dense<0.000000e+00> : vector<16x32xf32>
    %169 = tpu.matmul %167, %168, %cst_72 {dimension_numbers = #tpu.dot_dimension_numbers<[1], [0], [0], [1], [0, 0, 1, 1], [], []>} : vector<16x32xbf16>, vector<32x32xbf16>, vector<16x32xf32> -> vector<16x32xf32>
    %c0_73 = arith.constant 0 : index
    %c0_74 = arith.constant 0 : index
    %170 = vector.load %arg14[%c0_73, %c0_74] : memref<1x32xf32, #tpu.memory_space<vmem>>, vector<1x32xf32>
    %171 = vector.broadcast %170 : vector<1x32xf32> to vector<16x32xf32>
    %172 = arith.addf %169, %171 : vector<16x32xf32>
    %173 = arith.addf %4, %8 : vector<32x32xf32>
    %174 = arith.truncf %173 : vector<32x32xf32> to vector<32x32xbf16>
    %c0_75 = arith.constant 0 : index
    %c0_76 = arith.constant 0 : index
    %175 = vector.load %arg15[%c0_75, %c0_76] : memref<32x32xbf16, #tpu.memory_space<vmem>>, vector<32x32xbf16>
    %cst_77 = arith.constant dense<0.000000e+00> : vector<32x32xf32>
    %176 = tpu.matmul %174, %175, %cst_77 {dimension_numbers = #tpu.dot_dimension_numbers<[1], [0], [0], [1], [0, 0, 1, 1], [], []>} : vector<32x32xbf16>, vector<32x32xbf16>, vector<32x32xf32> -> vector<32x32xf32>
    %c0_78 = arith.constant 0 : index
    %c0_79 = arith.constant 0 : index
    %177 = vector.load %arg16[%c0_78, %c0_79] : memref<1x32xf32, #tpu.memory_space<vmem>>, vector<1x32xf32>
    %178 = vector.broadcast %177 : vector<1x32xf32> to vector<32x32xf32>
    %179 = arith.addf %176, %178 : vector<32x32xf32>
    %180 = arith.truncf %4 : vector<32x32xf32> to vector<32x32xbf16>
    %c0_80 = arith.constant 0 : index
    %c0_81 = arith.constant 0 : index
    %181 = vector.load %arg17[%c0_80, %c0_81] : memref<32x32xbf16, #tpu.memory_space<vmem>>, vector<32x32xbf16>
    %cst_82 = arith.constant dense<0.000000e+00> : vector<32x32xf32>
    %182 = tpu.matmul %180, %181, %cst_82 {dimension_numbers = #tpu.dot_dimension_numbers<[1], [0], [0], [1], [0, 0, 1, 1], [], []>} : vector<32x32xbf16>, vector<32x32xbf16>, vector<32x32xf32> -> vector<32x32xf32>
    %c0_83 = arith.constant 0 : index
    %c0_84 = arith.constant 0 : index
    %183 = vector.load %arg18[%c0_83, %c0_84] : memref<1x32xf32, #tpu.memory_space<vmem>>, vector<1x32xf32>
    %184 = vector.broadcast %183 : vector<1x32xf32> to vector<32x32xf32>
    %185 = arith.addf %182, %184 : vector<32x32xf32>
    %c0_85 = arith.constant 0 : index
    %c0_86 = arith.constant 0 : index
    %186 = vector.load %arg19[%c0_85, %c0_86] : memref<32x32xbf16, #tpu.memory_space<vmem>>, vector<32x32xbf16>
    %c0_87 = arith.constant 0 : index
    %c0_88 = arith.constant 0 : index
    %187 = vector.load %arg20[%c0_87, %c0_88] : memref<1x32xf32, #tpu.memory_space<vmem>>, vector<1x32xf32>
    %188 = vector.shape_cast %172 : vector<16x32xf32> to vector<2x8x32xf32>
    %189 = vector.shape_cast %179 : vector<32x32xf32> to vector<2x16x32xf32>
    %190 = vector.shape_cast %185 : vector<32x32xf32> to vector<2x16x32xf32>
    %191 = vector.extract_strided_slice %188 {offsets = [0, 0, 0], sizes = [2, 8, 8], strides = [1, 1, 1]} : vector<2x8x32xf32> to vector<2x8x8xf32>
    %192 = arith.truncf %191 : vector<2x8x8xf32> to vector<2x8x8xbf16>
    %193 = vector.extract_strided_slice %189 {offsets = [0, 0, 0], sizes = [2, 16, 8], strides = [1, 1, 1]} : vector<2x16x32xf32> to vector<2x16x8xf32>
    %194 = arith.truncf %193 : vector<2x16x8xf32> to vector<2x16x8xbf16>
    "tpu.trace_start"() <{level = 10 : i32, message = "bqd,bkd->bqk"}> : () -> ()
    %cst_89 = arith.constant dense<0.000000e+00> : vector<2x8x16xf32>
    %195 = tpu.matmul %192, %194, %cst_89 {dimension_numbers = #tpu.dot_dimension_numbers<[2], [2], [1], [1], [0, 0, 0, 1, 1, 1], [0], [0]>} : vector<2x8x8xbf16>, vector<2x16x8xbf16>, vector<2x8x16xf32> -> vector<2x8x16xf32>
    "tpu.trace_stop"() : () -> ()
    %cst_90 = arith.constant dense<0xFF800000> : vector<2x8xf32>
    %196 = vector.multi_reduction <maximumf>, %195, %cst_90 [2] : vector<2x8x16xf32> to vector<2x8xf32>
    %197 = vector.shape_cast %196 : vector<2x8xf32> to vector<2x8x1xf32>
    %198 = vector.broadcast %197 : vector<2x8x1xf32> to vector<2x8x16xf32>
    %199 = arith.subf %195, %198 : vector<2x8x16xf32>
    %200 = math.exp %199 : vector<2x8x16xf32>
    %cst_91 = arith.constant dense<0.000000e+00> : vector<2x8xf32>
    %201 = vector.multi_reduction <add>, %200, %cst_91 [2] : vector<2x8x16xf32> to vector<2x8xf32>
    %202 = vector.shape_cast %201 : vector<2x8xf32> to vector<2x8x1xf32>
    %203 = tpu.reciprocal %202 {approx = true} : vector<2x8x1xf32> -> vector<2x8x1xf32>
    %204 = vector.broadcast %203 : vector<2x8x1xf32> to vector<2x8x16xf32>
    %205 = arith.mulf %200, %204 : vector<2x8x16xf32>
    %206 = arith.truncf %205 : vector<2x8x16xf32> to vector<2x8x16xbf16>
    %207 = vector.extract_strided_slice %190 {offsets = [0, 0, 0], sizes = [2, 16, 8], strides = [1, 1, 1]} : vector<2x16x32xf32> to vector<2x16x8xf32>
    %208 = arith.truncf %207 : vector<2x16x8xf32> to vector<2x16x8xbf16>
    "tpu.trace_start"() <{level = 10 : i32, message = "bqk,bkd->bqd"}> : () -> ()
    %cst_92 = arith.constant dense<0.000000e+00> : vector<2x8x8xf32>
    %209 = tpu.matmul %206, %208, %cst_92 {dimension_numbers = #tpu.dot_dimension_numbers<[2], [1], [1], [2], [0, 0, 0, 1, 1, 2], [0], [0]>} : vector<2x8x16xbf16>, vector<2x16x8xbf16>, vector<2x8x8xf32> -> vector<2x8x8xf32>
    "tpu.trace_stop"() : () -> ()
    %c0_93 = arith.constant 0 : index
    %c0_94 = arith.constant 0 : index
    %c0_95 = arith.constant 0 : index
    %210 = vector.load %arg26[%c0_93, %c0_94, %c0_95] : memref<2x8x32xf32, #tpu.memory_space<vmem>>, vector<2x8x8xf32>
    tpu.vector_store %arg26[%c0_93, %c0_94, %c0_95], %209 {strides = array<i32>} : memref<2x8x32xf32, #tpu.memory_space<vmem>>, vector<2x8x8xf32>,
    %211 = vector.extract_strided_slice %188 {offsets = [0, 0, 8], sizes = [2, 8, 8], strides = [1, 1, 1]} : vector<2x8x32xf32> to vector<2x8x8xf32>
    %212 = arith.truncf %211 : vector<2x8x8xf32> to vector<2x8x8xbf16>
    %213 = vector.extract_strided_slice %189 {offsets = [0, 0, 8], sizes = [2, 16, 8], strides = [1, 1, 1]} : vector<2x16x32xf32> to vector<2x16x8xf32>
    %214 = arith.truncf %213 : vector<2x16x8xf32> to vector<2x16x8xbf16>
    "tpu.trace_start"() <{level = 10 : i32, message = "bqd,bkd->bqk"}> : () -> ()
    %cst_96 = arith.constant dense<0.000000e+00> : vector<2x8x16xf32>
    %215 = tpu.matmul %212, %214, %cst_96 {dimension_numbers = #tpu.dot_dimension_numbers<[2], [2], [1], [1], [0, 0, 0, 1, 1, 1], [0], [0]>} : vector<2x8x8xbf16>, vector<2x16x8xbf16>, vector<2x8x16xf32> -> vector<2x8x16xf32>
    "tpu.trace_stop"() : () -> ()
    %cst_97 = arith.constant dense<0xFF800000> : vector<2x8xf32>
    %216 = vector.multi_reduction <maximumf>, %215, %cst_97 [2] : vector<2x8x16xf32> to vector<2x8xf32>
    %217 = vector.shape_cast %216 : vector<2x8xf32> to vector<2x8x1xf32>
    %218 = vector.broadcast %217 : vector<2x8x1xf32> to vector<2x8x16xf32>
    %219 = arith.subf %215, %218 : vector<2x8x16xf32>
    %220 = math.exp %219 : vector<2x8x16xf32>
    %cst_98 = arith.constant dense<0.000000e+00> : vector<2x8xf32>
    %221 = vector.multi_reduction <add>, %220, %cst_98 [2] : vector<2x8x16xf32> to vector<2x8xf32>
    %222 = vector.shape_cast %221 : vector<2x8xf32> to vector<2x8x1xf32>
    %223 = tpu.reciprocal %222 {approx = true} : vector<2x8x1xf32> -> vector<2x8x1xf32>
    %224 = vector.broadcast %223 : vector<2x8x1xf32> to vector<2x8x16xf32>
    %225 = arith.mulf %220, %224 : vector<2x8x16xf32>
    %226 = arith.truncf %225 : vector<2x8x16xf32> to vector<2x8x16xbf16>
    %227 = vector.extract_strided_slice %190 {offsets = [0, 0, 8], sizes = [2, 16, 8], strides = [1, 1, 1]} : vector<2x16x32xf32> to vector<2x16x8xf32>
    %228 = arith.truncf %227 : vector<2x16x8xf32> to vector<2x16x8xbf16>
    "tpu.trace_start"() <{level = 10 : i32, message = "bqk,bkd->bqd"}> : () -> ()
    %cst_99 = arith.constant dense<0.000000e+00> : vector<2x8x8xf32>
    %229 = tpu.matmul %226, %228, %cst_99 {dimension_numbers = #tpu.dot_dimension_numbers<[2], [1], [1], [2], [0, 0, 0, 1, 1, 2], [0], [0]>} : vector<2x8x16xbf16>, vector<2x16x8xbf16>, vector<2x8x8xf32> -> vector<2x8x8xf32>
    "tpu.trace_stop"() : () -> ()
    %c0_100 = arith.constant 0 : index
    %c0_101 = arith.constant 0 : index
    %c8_102 = arith.constant 8 : index
    %230 = vector.load %arg26[%c0_100, %c0_101, %c8_102] : memref<2x8x32xf32, #tpu.memory_space<vmem>>, vector<2x8x8xf32>
    tpu.vector_store %arg26[%c0_100, %c0_101, %c8_102], %229 {strides = array<i32>} : memref<2x8x32xf32, #tpu.memory_space<vmem>>, vector<2x8x8xf32>,
    %231 = vector.extract_strided_slice %188 {offsets = [0, 0, 16], sizes = [2, 8, 8], strides = [1, 1, 1]} : vector<2x8x32xf32> to vector<2x8x8xf32>
    %232 = arith.truncf %231 : vector<2x8x8xf32> to vector<2x8x8xbf16>
    %233 = vector.extract_strided_slice %189 {offsets = [0, 0, 16], sizes = [2, 16, 8], strides = [1, 1, 1]} : vector<2x16x32xf32> to vector<2x16x8xf32>
    %234 = arith.truncf %233 : vector<2x16x8xf32> to vector<2x16x8xbf16>
    "tpu.trace_start"() <{level = 10 : i32, message = "bqd,bkd->bqk"}> : () -> ()
    %cst_103 = arith.constant dense<0.000000e+00> : vector<2x8x16xf32>
    %235 = tpu.matmul %232, %234, %cst_103 {dimension_numbers = #tpu.dot_dimension_numbers<[2], [2], [1], [1], [0, 0, 0, 1, 1, 1], [0], [0]>} : vector<2x8x8xbf16>, vector<2x16x8xbf16>, vector<2x8x16xf32> -> vector<2x8x16xf32>
    "tpu.trace_stop"() : () -> ()
    %cst_104 = arith.constant dense<0xFF800000> : vector<2x8xf32>
    %236 = vector.multi_reduction <maximumf>, %235, %cst_104 [2] : vector<2x8x16xf32> to vector<2x8xf32>
    %237 = vector.shape_cast %236 : vector<2x8xf32> to vector<2x8x1xf32>
    %238 = vector.broadcast %237 : vector<2x8x1xf32> to vector<2x8x16xf32>
    %239 = arith.subf %235, %238 : vector<2x8x16xf32>
    %240 = math.exp %239 : vector<2x8x16xf32>
    %cst_105 = arith.constant dense<0.000000e+00> : vector<2x8xf32>
    %241 = vector.multi_reduction <add>, %240, %cst_105 [2] : vector<2x8x16xf32> to vector<2x8xf32>
    %242 = vector.shape_cast %241 : vector<2x8xf32> to vector<2x8x1xf32>
    %243 = tpu.reciprocal %242 {approx = true} : vector<2x8x1xf32> -> vector<2x8x1xf32>
    %244 = vector.broadcast %243 : vector<2x8x1xf32> to vector<2x8x16xf32>
    %245 = arith.mulf %240, %244 : vector<2x8x16xf32>
    %246 = arith.truncf %245 : vector<2x8x16xf32> to vector<2x8x16xbf16>
    %247 = vector.extract_strided_slice %190 {offsets = [0, 0, 16], sizes = [2, 16, 8], strides = [1, 1, 1]} : vector<2x16x32xf32> to vector<2x16x8xf32>
    %248 = arith.truncf %247 : vector<2x16x8xf32> to vector<2x16x8xbf16>
    "tpu.trace_start"() <{level = 10 : i32, message = "bqk,bkd->bqd"}> : () -> ()
    %cst_106 = arith.constant dense<0.000000e+00> : vector<2x8x8xf32>
    %249 = tpu.matmul %246, %248, %cst_106 {dimension_numbers = #tpu.dot_dimension_numbers<[2], [1], [1], [2], [0, 0, 0, 1, 1, 2], [0], [0]>} : vector<2x8x16xbf16>, vector<2x16x8xbf16>, vector<2x8x8xf32> -> vector<2x8x8xf32>
    "tpu.trace_stop"() : () -> ()
    %c0_107 = arith.constant 0 : index
    %c0_108 = arith.constant 0 : index
    %c16_109 = arith.constant 16 : index
    %250 = vector.load %arg26[%c0_107, %c0_108, %c16_109] : memref<2x8x32xf32, #tpu.memory_space<vmem>>, vector<2x8x8xf32>
    tpu.vector_store %arg26[%c0_107, %c0_108, %c16_109], %249 {strides = array<i32>} : memref<2x8x32xf32, #tpu.memory_space<vmem>>, vector<2x8x8xf32>,
    %251 = vector.extract_strided_slice %188 {offsets = [0, 0, 24], sizes = [2, 8, 8], strides = [1, 1, 1]} : vector<2x8x32xf32> to vector<2x8x8xf32>
    %252 = arith.truncf %251 : vector<2x8x8xf32> to vector<2x8x8xbf16>
    %253 = vector.extract_strided_slice %189 {offsets = [0, 0, 24], sizes = [2, 16, 8], strides = [1, 1, 1]} : vector<2x16x32xf32> to vector<2x16x8xf32>
    %254 = arith.truncf %253 : vector<2x16x8xf32> to vector<2x16x8xbf16>
    "tpu.trace_start"() <{level = 10 : i32, message = "bqd,bkd->bqk"}> : () -> ()
    %cst_110 = arith.constant dense<0.000000e+00> : vector<2x8x16xf32>
    %255 = tpu.matmul %252, %254, %cst_110 {dimension_numbers = #tpu.dot_dimension_numbers<[2], [2], [1], [1], [0, 0, 0, 1, 1, 1], [0], [0]>} : vector<2x8x8xbf16>, vector<2x16x8xbf16>, vector<2x8x16xf32> -> vector<2x8x16xf32>
    "tpu.trace_stop"() : () -> ()
    %cst_111 = arith.constant dense<0xFF800000> : vector<2x8xf32>
    %256 = vector.multi_reduction <maximumf>, %255, %cst_111 [2] : vector<2x8x16xf32> to vector<2x8xf32>
    %257 = vector.shape_cast %256 : vector<2x8xf32> to vector<2x8x1xf32>
    %258 = vector.broadcast %257 : vector<2x8x1xf32> to vector<2x8x16xf32>
    %259 = arith.subf %255, %258 : vector<2x8x16xf32>
    %260 = math.exp %259 : vector<2x8x16xf32>
    %cst_112 = arith.constant dense<0.000000e+00> : vector<2x8xf32>
    %261 = vector.multi_reduction <add>, %260, %cst_112 [2] : vector<2x8x16xf32> to vector<2x8xf32>
    %262 = vector.shape_cast %261 : vector<2x8xf32> to vector<2x8x1xf32>
    %263 = tpu.reciprocal %262 {approx = true} : vector<2x8x1xf32> -> vector<2x8x1xf32>
    %264 = vector.broadcast %263 : vector<2x8x1xf32> to vector<2x8x16xf32>
    %265 = arith.mulf %260, %264 : vector<2x8x16xf32>
    %266 = arith.truncf %265 : vector<2x8x16xf32> to vector<2x8x16xbf16>
    %267 = vector.extract_strided_slice %190 {offsets = [0, 0, 24], sizes = [2, 16, 8], strides = [1, 1, 1]} : vector<2x16x32xf32> to vector<2x16x8xf32>
    %268 = arith.truncf %267 : vector<2x16x8xf32> to vector<2x16x8xbf16>
    "tpu.trace_start"() <{level = 10 : i32, message = "bqk,bkd->bqd"}> : () -> ()
    %cst_113 = arith.constant dense<0.000000e+00> : vector<2x8x8xf32>
    %269 = tpu.matmul %266, %268, %cst_113 {dimension_numbers = #tpu.dot_dimension_numbers<[2], [1], [1], [2], [0, 0, 0, 1, 1, 2], [0], [0]>} : vector<2x8x16xbf16>, vector<2x16x8xbf16>, vector<2x8x8xf32> -> vector<2x8x8xf32>
    "tpu.trace_stop"() : () -> ()
    %c0_114 = arith.constant 0 : index
    %c0_115 = arith.constant 0 : index
    %c24_116 = arith.constant 24 : index
    %270 = vector.load %arg26[%c0_114, %c0_115, %c24_116] : memref<2x8x32xf32, #tpu.memory_space<vmem>>, vector<2x8x8xf32>
    tpu.vector_store %arg26[%c0_114, %c0_115, %c24_116], %269 {strides = array<i32>} : memref<2x8x32xf32, #tpu.memory_space<vmem>>, vector<2x8x8xf32>,
    %c0_117 = arith.constant 0 : index
    %c0_118 = arith.constant 0 : index
    %c0_119 = arith.constant 0 : index
    %271 = vector.load %arg26[%c0_117, %c0_118, %c0_119] : memref<2x8x32xf32, #tpu.memory_space<vmem>>, vector<2x8x32xf32>
    %272 = vector.shape_cast %271 : vector<2x8x32xf32> to vector<16x32xf32>
    %273 = arith.truncf %272 : vector<16x32xf32> to vector<16x32xbf16>
    %cst_120 = arith.constant dense<0.000000e+00> : vector<16x32xf32>
    %274 = tpu.matmul %273, %186, %cst_120 {dimension_numbers = #tpu.dot_dimension_numbers<[1], [0], [0], [1], [0, 0, 1, 1], [], []>} : vector<16x32xbf16>, vector<32x32xbf16>, vector<16x32xf32> -> vector<16x32xf32>
    %275 = vector.broadcast %187 : vector<1x32xf32> to vector<16x32xf32>
    %276 = arith.addf %274, %275 : vector<16x32xf32>
    %277 = arith.addf %143, %276 : vector<16x32xf32>
    %278 = vector.extract_strided_slice %9 {offsets = [2, 0], sizes = [1, 32], strides = [1, 1]} : vector<4x32xf32> to vector<1x32xf32>
    %279 = vector.extract_strided_slice %10 {offsets = [2, 0], sizes = [1, 32], strides = [1, 1]} : vector<4x32xf32> to vector<1x32xf32>
    %cst_121 = arith.constant dense<0.000000e+00> : vector<16xf32>
    %280 = vector.multi_reduction <add>, %277, %cst_121 [1] : vector<16x32xf32> to vector<16xf32>
    %281 = vector.shape_cast %280 : vector<16xf32> to vector<16x1xf32>
    %cst_122 = arith.constant 3.200000e+01 : f32
    %282 = vector.broadcast %cst_122 : f32 to vector<16x1xf32>
    %283 = arith.divf %281, %282 : vector<16x1xf32>
    %284 = vector.broadcast %283 : vector<16x1xf32> to vector<16x32xf32>
    %285 = arith.subf %277, %284 : vector<16x32xf32>
    %286 = arith.mulf %285, %285 : vector<16x32xf32>
    %cst_123 = arith.constant dense<0.000000e+00> : vector<16xf32>
    %287 = vector.multi_reduction <add>, %286, %cst_123 [1] : vector<16x32xf32> to vector<16xf32>
    %288 = vector.shape_cast %287 : vector<16xf32> to vector<16x1xf32>
    %cst_124 = arith.constant 3.200000e+01 : f32
    %289 = vector.broadcast %cst_124 : f32 to vector<16x1xf32>
    %290 = arith.divf %288, %289 : vector<16x1xf32>
    %cst_125 = arith.constant 9.99999974E-6 : f32
    %291 = vector.broadcast %cst_125 : f32 to vector<16x1xf32>
    %292 = arith.addf %290, %291 : vector<16x1xf32>
    %293 = math.rsqrt %292 : vector<16x1xf32>
    %294 = vector.broadcast %293 : vector<16x1xf32> to vector<16x32xf32>
    %295 = arith.mulf %285, %294 : vector<16x32xf32>
    %296 = vector.broadcast %279 : vector<1x32xf32> to vector<16x32xf32>
    %297 = arith.addf %295, %296 : vector<16x32xf32>
    %298 = vector.broadcast %278 : vector<1x32xf32> to vector<16x32xf32>
    %299 = arith.mulf %297, %298 : vector<16x32xf32>
    %300 = arith.truncf %299 : vector<16x32xf32> to vector<16x32xbf16>
    %c0_126 = arith.constant 0 : index
    %c0_127 = arith.constant 0 : index
    %301 = vector.load %arg21[%c0_126, %c0_127] : memref<32x64xbf16, #tpu.memory_space<vmem>>, vector<32x64xbf16>
    %cst_128 = arith.constant dense<0.000000e+00> : vector<16x64xf32>
    %302 = tpu.matmul %300, %301, %cst_128 {dimension_numbers = #tpu.dot_dimension_numbers<[1], [0], [0], [1], [0, 0, 1, 1], [], []>} : vector<16x32xbf16>, vector<32x64xbf16>, vector<16x64xf32> -> vector<16x64xf32>
    %c0_129 = arith.constant 0 : index
    %c0_130 = arith.constant 0 : index
    %303 = vector.load %arg22[%c0_129, %c0_130] : memref<1x64xf32, #tpu.memory_space<vmem>>, vector<1x64xf32>
    %304 = vector.broadcast %303 : vector<1x64xf32> to vector<16x64xf32>
    %305 = arith.addf %302, %304 : vector<16x64xf32>
    %cst_131 = arith.constant 5.000000e-01 : f32
    %306 = vector.broadcast %cst_131 : f32 to vector<16x64xf32>
    %307 = arith.mulf %306, %305 : vector<16x64xf32>
    %cst_132 = arith.constant 4.471500e-02 : f32
    %308 = vector.broadcast %cst_132 : f32 to vector<16x64xf32>
    %309 = arith.mulf %308, %305 : vector<16x64xf32>
    %310 = arith.mulf %309, %305 : vector<16x64xf32>
    %311 = arith.mulf %310, %305 : vector<16x64xf32>
    %312 = arith.addf %305, %311 : vector<16x64xf32>
    %cst_133 = arith.constant 0.797884583 : f32
    %313 = vector.broadcast %cst_133 : f32 to vector<16x64xf32>
    %314 = arith.mulf %313, %312 : vector<16x64xf32>
    %315 = math.tanh %314 : vector<16x64xf32>
    %cst_134 = arith.constant 1.000000e+00 : f32
    %316 = vector.broadcast %cst_134 : f32 to vector<16x64xf32>
    %317 = arith.addf %316, %315 : vector<16x64xf32>
    %318 = arith.mulf %307, %317 : vector<16x64xf32>
    %319 = arith.truncf %318 : vector<16x64xf32> to vector<16x64xbf16>
    %c0_135 = arith.constant 0 : index
    %c0_136 = arith.constant 0 : index
    %320 = vector.load %arg23[%c0_135, %c0_136] : memref<64x32xbf16, #tpu.memory_space<vmem>>, vector<64x32xbf16>
    %cst_137 = arith.constant dense<0.000000e+00> : vector<16x32xf32>
    %321 = tpu.matmul %319, %320, %cst_137 {dimension_numbers = #tpu.dot_dimension_numbers<[1], [0], [0], [1], [0, 0, 1, 1], [], []>} : vector<16x64xbf16>, vector<64x32xbf16>, vector<16x32xf32> -> vector<16x32xf32>
    %322 = arith.addf %277, %321 : vector<16x32xf32>
    %c0_138 = arith.constant 0 : index
    %c0_139 = arith.constant 0 : index
    %323 = vector.load %arg24[%c0_138, %c0_139] : memref<1x32xf32, #tpu.memory_space<vmem>>, vector<1x32xf32>
    %324 = vector.broadcast %323 : vector<1x32xf32> to vector<16x32xf32>
    %325 = arith.addf %322, %324 : vector<16x32xf32>
    %326 = vector.shape_cast %325 : vector<16x32xf32> to vector<2x8x32xf32>
    %c0_140 = arith.constant 0 : index
    %c0_141 = arith.constant 0 : index
    %c0_142 = arith.constant 0 : index
    %327 = vector.load %arg25[%c0_140, %c0_141, %c0_142] : memref<2x8x32xf32, #tpu.memory_space<vmem>>, vector<2x8x32xf32>
    tpu.vector_store %arg25[%c0_140, %c0_141, %c0_142], %326 {strides = array<i32>} : memref<2x8x32xf32, #tpu.memory_space<vmem>>, vector<2x8x32xf32>,
    return
  }
}

</mosaic_0001>

<bundles_post_ra>
// kernel: transformer_decoder_forward.3
= control target key start
LH: loop header
LB: loop body
LE: loop exit
PB: predicated region body
PF: predicated region fallthrough
CT: control target
= control target key end

     0   :  { %s4173_s0 = inlined_call_operand.vmem [shape: f32[2,8,32], index: 0, kind: input, shape index: {}]   ;;  %s4174_s1 = inlined_call_operand.vmem [shape: f32[2,16,32], index: 1, kind: input, shape index: {}]   ;;  %s4175_s2 = inlined_call_operand.vmem [shape: f32[2,8,32], index: 2, kind: input, shape index: {}]   ;;  %s4176_s3 = inlined_call_operand.vmem [shape: f32[2,16,32], index: 3, kind: input, shape index: {}]   ;;  %s4177_s4 = inlined_call_operand.vmem [shape: f32[2,8,8], index: 4, kind: input, shape index: {}]   ;;  %s4178_s5 = inlined_call_operand.vmem [shape: f32[4,32], index: 5, kind: input, shape index: {}]   ;;  %s4179_s6 = inlined_call_operand.vmem [shape: f32[4,32], index: 6, kind: input, shape index: {}]   ;;  %s4180_s7 = inlined_call_operand.vmem [shape: bf16[32,64], index: 7, kind: input, shape index: {}]   ;;  %s4181_s8 = inlined_call_operand.vmem [shape: f32[1,64], index: 8, kind: input, shape index: {}]   ;;  %s4182_s9 = inlined_call_operand.vmem [shape: bf16[32,32], index: 9, kind: input, shape index: {}]   ;;  %s4183_s10 = inlined_call_operand.vmem [shape: f32[1,32], index: 10, kind: input, shape index: {}]   ;;  %s4184_s11 = inlined_call_operand.vmem [shape: bf16[32,32], index: 11, kind: input, shape index: {}]   ;;  %s4185_s12 = inlined_call_operand.vmem [shape: f32[1,32], index: 12, kind: input, shape index: {}]   ;;  %s4186_s13 = inlined_call_operand.vmem [shape: bf16[32,32], index: 13, kind: input, shape index: {}]   ;;  %s4187_s14 = inlined_call_operand.vmem [shape: f32[1,32], index: 14, kind: input, shape index: {}]   ;;  %s4188_s15 = inlined_call_operand.vmem [shape: bf16[32,32], index: 15, kind: input, shape index: {}]   ;;  %s4189_s16 = inlined_call_operand.vmem [shape: f32[1,32], index: 16, kind: input, shape index: {}]   ;;  %s4190_s17 = inlined_call_operand.vmem [shape: bf16[32,32], index: 17, kind: input, shape index: {}]   ;;  %s4191_s18 = inlined_call_operand.vmem [shape: f32[1,32], index: 18, kind: input, shape index: {}]   ;;  %s4192_s19 = inlined_call_operand.vmem [shape: bf16[32,32], index: 19, kind: input, shape index: {}]   ;;  %s4193_s20 = inlined_call_operand.vmem [shape: f32[1,32], index: 20, kind: input, shape index: {}]   ;;  %s4194_s21 = inlined_call_operand.vmem [shape: bf16[32,64], index: 21, kind: input, shape index: {}]   ;;  %s4195_s22 = inlined_call_operand.vmem [shape: f32[1,64], index: 22, kind: input, shape index: {}]   ;;  %s4196_s23 = inlined_call_operand.vmem [shape: bf16[64,32], index: 23, kind: input, shape index: {}]   ;;  %s4197_s24 = inlined_call_operand.vmem [shape: f32[1,32], index: 24, kind: input, shape index: {}]   ;;  %s4198_s25 = inlined_call_operand.hbm [shape: f32[2,8,32], index: 25, kind: output, shape index: {0}]   ;;  %s4199_s26 = inlined_call_operand.hbm [shape: f32[2,8,32], index: 26, kind: output, shape index: {1}]  }
   0x1   :  { %4219 = sst [smem:[#allocation9_spill]] %s4173_s0 }
   0x2   :  { %4220 = sst [smem:[#allocation10_spill]] %s4174_s1 }
   0x3   :  { %4221 = sst [smem:[#allocation11_spill]] %s4175_s2 }
   0x4   :  { %4222 = sst [smem:[#allocation12_spill]] %s4176_s3 }
   0x5   :  { %4223 = sst [smem:[#allocation13_spill]] %s4177_s4 }
   0x6   :  { %4224 = sst [smem:[#allocation14_spill]] %s4178_s5 }
   0x7   :  { %4225 = sst [smem:[#allocation15_spill]] %s4179_s6 }
   0x8   :  { %4226 = sst [smem:[#allocation16_spill]] %s4180_s7 }
   0x9   :  { %4227 = sst [smem:[#allocation17_spill]] %s4181_s8 }
   0xa   :  { %4228 = sst [smem:[#allocation18_spill]] %s4182_s9 }
   0xb   :  { %4229 = sst [smem:[#allocation19_spill]] %s4183_s10 }
   0xc   :  { %32 = vsyncpa [#allocation4], 0  ;;  %s4230_s7 = sld [smem:[#allocation9_spill]]  ;;  %vm101_vm0 = vcmask 261120  }
  0x12   :  { %v3551_v0 = vld [vmem:[%s4230_s7] sm:$0xff]  ;;  %v3556_v1 = vld [vmem:[%s4230_s7 + $0x8] sm:$0xff] }
  0x13   :  { %v102_v2 = vsel %vm101_vm0, %v3551_v0, 0.0  ;;  %v105_v3 = vsel %vm101_vm0, %v3556_v1, 0.0 }
  0x14   :  { %103 = vadd.xlane.f32.xlu0 %v102_v2 }
  0x18   :  { %106 = vadd.xlane.f32.xlu0 %v105_v3 }
  0x19   :  { %33 = vsyncpa [#allocation6], 0  ;;  %s4231_s0 = sld [smem:[#allocation16_spill]]  ;;  %v3398_v15 = vmov 0.0   ;;  %vm3399_vm1 = vmmov 0   ;;  %v129_v19 = vlaneseq  ;;  %s4232_s10 = sld [smem:[#allocation15_spill]] }
  0x1a   :  { %2961 = vmatprep.subr.bf16.mxu1 %v3398_v15  ;;  %2965 = vmatprep.mubr.msk.bf16.mxu1 %vm3399_vm1, %v3398_v15  ;;  %s4233_s27 = sld [smem:[#allocation14_spill]]  ;;  %s4234_s28 = sld [smem:[#allocation11_spill]]  ;;  %vm289_vm2 = vcmask 64512   ;;  %vm414_vm3 = vcmask 1043456   ;;  %vm736_vm4 = vcmask 130112   ;;  %vm967_vm5 = vcmask 195712  }
  0x1b   :  { %2977 = vmatprep.subr.bf16.mxu0 %v3398_v15  ;;  %2979 = vmatprep.mubr.msk.bf16.mxu0 %vm3399_vm1, %v3398_v15  ;;  %v3580_v23 = vshrl.u32 %v129_v19, 7  ;;  %s4235_s9 = sld [smem:[#allocation18_spill]]  ;;  %s4236_s1 = sld [smem:[#allocation17_spill]]  ;;  %vm1198_vm6 = vcmask 261312   ;;  %vm1641_vm7 = vcmask 130048   ;;  %vm2664_vm8 = vcmask 523264  }
  0x1c   :  { %s3400_s3 = smov 96   ;;  %s4237_s8 = sld [smem:[#allocation19_spill]] }
  0x1d   :  { %v131_v25 = vsub.s32 0, %v3580_v23  ;;  %s3401_s2 = smov 88   ;;  %s3402_s5 = smov 120  }
  0x1e   :  { %s3403_s6 = smov 80   ;;  %s4215_s7 = smov 104  }
  0x1f   :  { %v3244_v14 = vld [vmem:[%s4231_s0] sm:$0xff]   ;;  %v3245_v16 = vld [vmem:[%s4231_s0 + $0x8] sm:$0xff]   ;;  %s4238_s0 = sld [smem:[#allocation13_spill]]  ;;  %s4209_s30 = smov 24  }
  0x20   :  { %2962 = vmatpush3.bf16.msra.mxu1 %v3244_v14  ;;  %v3586_v26 = vld [vmem:[%s4232_s10] sm:$0xf]  ;;  %v3603_v38 = vld [vmem:[%s4234_s28 + $0x8] sm:$0xff]  ;;  %s4244_s4 = smov 16  }
  0x21   :  { %2963 = vmatprep.subr.bf16.mxu1 %v3398_v15  ;;  %v132_v27 = vrot.slane %v3586_v26, %v131_v25  ;;  %v3592_v29 = vld [vmem:[%s4233_s27] sm:$0xf]  ;;  %v3247_v44 = vld [vmem:[%s4235_s9 + $0x8] sm:$0xff]  }
  0x22   :  { %v138_v32 = vrot.slane %v3592_v29, %v131_v25  ;;  %v3598_v37 = vld [vmem:[%s4234_s28] sm:$0xff]  ;;  %s4213_s28 = smov 8  }
  0x23   :  { %v3246_v42 = vld [vmem:[%s4235_s9] sm:$0xff]   ;;  %s4239_s9 = sld [smem:[#allocation10_spill]] }
  0x24   :  { %2964 = vmatpush3.bf16.msra.mxu1 %v3245_v16  ;;  %v2794_v46 = vld [vmem:[%s4236_s1] ss:$0 sm:$0xff]  ;;  %s4217_s1 = smov 112  }
  0x25   :  { %2969 = vmatprep.subr.bf16.mxu1 %v3398_v15  ;;  %v2798_v59 = vld [vmem:[%s4237_s8] ss:$0 sm:$0xff]  ;;  %s4211_s8 = smov 16  }
  0xa1   :  { %v104_v4 = vpop.xlane.xlu0 %103 }
  0xa2   :  { %v109_v5 = vmul.f32 0.03125, %v104_v4 }
  0xa4   :  { %v111_v6 = vsub.f32 %v3551_v0, %v109_v5 }
  0xa5   :  { %v107_v7 = vpop.xlane.xlu0 %106 }
  0xa6   :  { %v110_v8 = vmul.f32 0.03125, %v107_v7  ;;  %v113_v9 = vmul.f32 %v111_v6, %v111_v6 }
  0xa8   :  { %v112_v10 = vsub.f32 %v3556_v1, %v110_v8  ;;  %v115_v11 = vsel %vm101_vm0, %v113_v9, 0.0  ;;  %v3658_v8 = vld [vmem:[%s4238_s0] sm:$0xff] }
  0xa9   :  { %116 = vadd.xlane.f32.xlu1 %v115_v11 }
  0xaa   :  { %v114_v12 = vmul.f32 %v112_v10, %v112_v10 }
  0xac   :  { %v118_v13 = vsel %vm101_vm0, %v114_v12, 0.0 }
  0xad   :  { %119 = vadd.xlane.f32.xlu1 %v118_v13 }
 0x136   :  { %v117_v17 = vpop.xlane.xlu1 %116 }
 0x137   :  { %v121_v18 = vmul.f32 0.03125, %v117_v17 }
 0x139   :  { %v123_v20 = vadd.f32 1e-05, %v121_v18 }
 0x13a   :  { %v120_v21 = vpop.xlane.xlu1 %119 }
 0x13b   :  { %3264 = vrsqrt.f32 %v123_v20  ;;  %v122_v22 = vmul.f32 0.03125, %v120_v21 }
 0x13d   :  { %v124_v24 = vadd.f32 1e-05, %v122_v22 }
 0x13f   :  { %3266 = vrsqrt.f32 %v124_v24 }
 0x145   :  { %v3265_v28 = vpop.eup %3264 }
 0x146   :  { %v127_v30 = vmul.f32 %v3265_v28, %v111_v6 }
 0x148   :  { %v133_v31 = vadd.f32 %v132_v27, %v127_v30 }
 0x149   :  { %v3267_v33 = vpop.eup %3266 }
 0x14a   :  { %v128_v34 = vmul.f32 %v3267_v33, %v112_v10  ;;  %v139_v36 = vmul.f32 %v138_v32, %v133_v31  ;;  %v3663_v10 = vld [vmem:[%s4238_s0 + $0x8] sm:$0xff] }
 0x14c   :  { %v134_v35 = vadd.f32 %v132_v27, %v128_v34  ;;  %v141_v40 = vadd.f32 %v139_v36, %v3598_v37 }
 0x14e   :  { %v140_v39 = vmul.f32 %v138_v32, %v134_v35 }
 0x150   :  { %v142_v41 = vadd.f32 %v140_v39, %v3603_v38  ;;  %v211_v45 = vpack.c.bf16 %v140_v39, %v139_v36 }
 0x152   :  { %v143_v43 = vpack.c.bf16 %v142_v41, %v141_v40 }
 0x154   :  { %2966 = vmatmul.mubr.msk.bf16.vlgmr.msra.gmra.mrb[0].mxu1 %vm101_vm0, %v143_v43 }
 0x155   :  { %2970 = vmatpush3.bf16.msra.mxu1 %v3246_v42  ;;  %2973 = vmatprep.mubr.msk.bf16.mxu1 %vm3399_vm1, %v3398_v15 }
 0x156   :  { %2971 = vmatprep.subr.bf16.mxu1 %v3398_v15 }
 0x159   :  { %2972 = vmatpush3.bf16.msra.mxu1 %v3247_v44 }
 0x15a   :  { %2983 = vmatprep.subr.bf16.mxu1 %v3398_v15 }
 0x15c   :  { %2974 = vmatmul.mubr.msk.bf16.vlgmr.msra.gmra.mrb[4].mxu1 %vm101_vm0, %v211_v45 }
 0x15d   :  { %2985 = vmatprep.mubr.msk.bf16.mxu1 %vm3399_vm1, %v3398_v15 }
 0x227   :  { %v204_v47 = vpop.f32.mrb[0].mxu1 }
 0x228   :  { %v205_v48 = vadd.f32 %v2794_v46, %v204_v47  ;;  %v2967_v49 = vpop.f32.mrb[1].mxu1 }
 0x229   :  { %v207_v50 = vpop.f32.mrb[2].mxu1 }
 0x22a   :  { %v3624_v51 = vpack.c.bf16 %v205_v48, %v205_v48  ;;  %v208_v52 = vadd.f32 %v2794_v46, %v207_v50  ;;  %v2968_v53 = vpop.f32.mrb[3].mxu1 }
 0x22c   :  { %v3626_v54 = vpack.c.bf16 %v208_v52, %v208_v52  ;;  %287 = vrot.lane.b32.xlu0 %v3624_v51, %s3400_s3 }
 0x22e   :  { %337 = vrot.lane.b32.xlu1 %v3626_v54, %s3400_s3  ;;  %s3405_s3 = smov 72  }
 0x22f   :  { %v272_v55 = vpop.f32.mrb[4].mxu1 }
 0x230   :  { %v2975_v56 = vpop.f32.mrb[5].mxu1  ;;  %v273_v61 = vadd.f32 %v2798_v59, %v272_v55 }
 0x231   :  { %v275_v57 = vpop.f32.mrb[6].mxu1 }
 0x232   :  { %v2976_v58 = vpop.f32.mrb[7].mxu1  ;;  %v276_v2 = vadd.f32 %v2798_v59, %v275_v57  ;;  %v3636_v4 = vpack.c.bf16 %v273_v61, %v273_v61 }
 0x234   :  { %v3639_v5 = vpack.c.bf16 %v276_v2, %v276_v2  ;;  %v416_v6 = vsel %vm414_vm3, %v3636_v4, 0 }
 0x236   :  { %v462_v7 = vsel %vm414_vm3, %v3639_v5, 0 }
 0x29e   :  { %v288_v60 = vpop.permute.xlu0 %287 }
 0x29f   :  { %v294_v62 = vsel %vm289_vm2, %v288_v60, 0 }
 0x2a0   :  { %2978 = vmatpush3.bf16.xpose.msra.mxu0 %v294_v62  ;;  %v338_v63 = vpop.permute.xlu1 %337 }
 0x2a1   :  { %v343_v3 = vsel %vm289_vm2, %v338_v63, 0  ;;  %2989 = vmatprep.subr.bf16.mxu0 %v3398_v15 }
 0x2a2   :  { %2984 = vmatpush3.bf16.xpose.msra.mxu1 %v343_v3 }
 0x2a3   :  { %2995 = vmatprep.subr.bf16.mxu1 %v3398_v15 }
 0x2a7   :  { %2980 = vmatmul.mubr.msk.bf16.vlgmr.msra.gmra.mrb[0].mxu0 %vm289_vm2, %v3624_v51 }
 0x2a8   :  { %2990 = vmatpush3.bf16.msra.mxu0 %v416_v6  ;;  %2991 = vmatprep.mubr.msk.bf16.mxu0 %vm3399_vm1, %v3398_v15 }
 0x2a9   :  { %2986 = vmatmul.mubr.msk.bf16.vlgmr.msra.gmra.mrb[8].mxu1 %vm289_vm2, %v3626_v54  ;;  %3001 = vmatprep.subr.bf16.mxu0 %v3398_v15 }
 0x2aa   :  { %2996 = vmatpush3.bf16.msra.mxu1 %v462_v7  ;;  %2997 = vmatprep.mubr.msk.bf16.mxu1 %vm3399_vm1, %v3398_v15 }
 0x2ab   :  { %3007 = vmatprep.subr.bf16.mxu1 %v3398_v15 }
 0x37a   :  { %v330_v9 = vpop.f32.mrb[0].mxu0 }
 0x37b   :  { %v331_v11 = vadd.f32 %v330_v9, %v3658_v8  ;;  %v2981_v12 = vpop.f32.mrb[1].mxu0 }
 0x37c   :  { %v333_v13 = vpop.f32.mrb[2].mxu0  ;;  %v379_v14 = vpop.f32.mrb[8].mxu1 }
 0x37d   :  { %v380_v16 = vadd.f32 %v379_v14, %v3663_v10  ;;  %v2982_v17 = vpop.f32.mrb[3].mxu0  ;;  %v2987_v18 = vpop.f32.mrb[9].mxu1  ;;  %v385_v19 = vsel %vm289_vm2, %v331_v11, -inf }
 0x37e   :  { %v382_v20 = vpop.f32.mrb[10].mxu1  ;;  %386 = vmax.xlane.f32.xlu1 %v385_v19 }
 0x37f   :  { %v2988_v21 = vpop.f32.mrb[11].mxu1  ;;  %v388_v22 = vsel %vm289_vm2, %v380_v16, -inf }
 0x380   :  { %389 = vmax.xlane.f32.xlu0 %v388_v22 }
 0x38f   :  { %558 = vrot.lane.b32.xlu1 %v3626_v54, %s3401_s2 }
 0x40b   :  { %v387_v24 = vpop.xlane.xlu1 %386 }
 0x40c   :  { %v391_v25 = vsub.f32 %v331_v11, %v387_v24 }
 0x40d   :  { %v390_v27 = vpop.xlane.xlu0 %389 }
 0x40e   :  { %v393_v28 = vmul.f32 1.442695, %v391_v25  ;;  %v392_v30 = vsub.f32 %v380_v16, %v390_v27 }
 0x40f   :  { %v559_v36 = vpop.permute.xlu1 %558 }
 0x410   :  { %3268 = vpow2.f32 %v393_v28  ;;  %v395_v31 = vmul.f32 1.442695, %v392_v30  ;;  %v564_v49 = vsel %vm289_vm2, %v559_v36, 0 }
 0x412   :  { %3270 = vpow2.f32 %v395_v31 }
 0x41a   :  { %v3269_v32 = vpop.eup %3268 }
 0x41b   :  { %v397_v33 = vsel %vm289_vm2, %v3269_v32, 0.0 }
 0x41c   :  { %v3271_v34 = vpop.eup %3270  ;;  %398 = vadd.xlane.f32.xlu0 %v397_v33 }
 0x41d   :  { %v400_v35 = vsel %vm289_vm2, %v3271_v34, 0.0 }
 0x41e   :  { %401 = vadd.xlane.f32.xlu1 %v400_v35 }
 0x42f   :  { %506 = vrot.lane.b32.xlu1 %v3624_v51, %s3402_s5 }
 0x432   :  { %508 = vrot.lane.b32.xlu0 %v3624_v51, %s3401_s2 }
 0x433   :  { %556 = vrot.lane.b32.xlu1 %v3626_v54, %s3402_s5 }
 0x4a9   :  { %v399_v39 = vpop.xlane.xlu0 %398 }
 0x4aa   :  { %3272 = vrcp.f32 %v399_v39 }
 0x4ab   :  { %v402_v40 = vpop.xlane.xlu1 %401 }
 0x4ac   :  { %3274 = vrcp.f32 %v402_v40 }
 0x4ad   :  { %v509_v44 = vpop.permute.xlu0 %508 }
 0x4ae   :  { %v514_v47 = vsel %vm289_vm2, %v509_v44, 0 }
 0x4af   :  { %v507_v50 = vpop.permute.xlu1 %506 }
 0x4b3   :  { %v557_v52 = vpop.permute.xlu1 %556 }
 0x4b4   :  { %v3273_v41 = vpop.eup %3272 }
 0x4b5   :  { %v405_v42 = vmul.f32 %v3273_v41, %v3269_v32 }
 0x4b6   :  { %v3275_v43 = vpop.eup %3274 }
 0x4b7   :  { %v406_v45 = vmul.f32 %v3275_v43, %v3271_v34  ;;  %v407_v46 = vpack.c.bf16 %v405_v42, %v405_v42 }
 0x4b9   :  { %2992 = vmatmul.mubr.msk.bf16.vlgmr.msra.gmra.mrb[4].mxu0 %vm289_vm2, %v407_v46  ;;  %v408_v48 = vpack.c.bf16 %v406_v45, %v406_v45 }
 0x4ba   :  { %3002 = vmatpush3.bf16.xpose.msra.mxu0 %v514_v47  ;;  %3003 = vmatprep.mubr.msk.bf16.mxu0 %vm3399_vm1, %v3398_v15 }
 0x4bb   :  { %2998 = vmatmul.mubr.msk.bf16.vlgmr.msra.gmra.mrb[12].mxu1 %vm289_vm2, %v408_v48  ;;  %3013 = vmatprep.subr.bf16.mxu0 %v3398_v15 }
 0x4bc   :  { %3008 = vmatpush3.bf16.xpose.msra.mxu1 %v564_v49  ;;  %3009 = vmatprep.mubr.msk.bf16.mxu1 %vm3399_vm1, %v3398_v15 }
 0x4bd   :  { %3019 = vmatprep.subr.bf16.mxu1 %v3398_v15 }
 0x4c1   :  { %3004 = vmatmul.mubr.msk.bf16.vlgmr.msra.gmra.mrb[8].mxu0 %vm289_vm2, %v507_v50 }
 0x4c2   :  { %3015 = vmatprep.mubr.msk.bf16.mxu0 %vm3399_vm1, %v3398_v15 }
 0x4c3   :  { %3010 = vmatmul.mubr.msk.bf16.vlgmr.msra.gmra.mrb[16].mxu1 %vm289_vm2, %v557_v52 }
 0x4c4   :  { %3021 = vmatprep.mubr.msk.bf16.mxu1 %vm3399_vm1, %v3398_v15 }
 0x58c   :  { %v452_v53 = vpop.f32.mrb[4].mxu0 }
 0x58d   :  { %504 = vst.msk [vmem:[#allocation2] sm:$0xff] %vm289_vm2, %v452_v53  ;;  %v2993_v55 = vpop.f32.mrb[5].mxu0 }
 0x58e   :  { %v455_v56 = vpop.f32.mrb[6].mxu0  ;;  %v498_v57 = vpop.f32.mrb[12].mxu1 }
 0x58f   :  { %505 = vst.msk [vmem:[#allocation2 + $0x8] sm:$0xff] %vm289_vm2, %v498_v57  ;;  %v2994_v58 = vpop.f32.mrb[7].mxu0  ;;  %v2999_v59 = vpop.f32.mrb[13].mxu1 }
 0x590   :  { %v501_v60 = vpop.f32.mrb[14].mxu1 }
 0x591   :  { %v3000_v61 = vpop.f32.mrb[15].mxu1 }
 0x594   :  { %v550_v62 = vpop.f32.mrb[8].mxu0 }
 0x595   :  { %v551_v63 = vadd.f32 %v550_v62, %v3658_v8  ;;  %v3005_v2 = vpop.f32.mrb[9].mxu0 }
 0x596   :  { %v553_v3 = vpop.f32.mrb[10].mxu0  ;;  %v600_v6 = vpop.f32.mrb[16].mxu1 }
 0x597   :  { %v601_v7 = vadd.f32 %v600_v6, %v3663_v10  ;;  %v3006_v9 = vpop.f32.mrb[11].mxu0  ;;  %v3011_v11 = vpop.f32.mrb[17].mxu1  ;;  %v606_v12 = vsel %vm289_vm2, %v551_v63, -inf }
 0x598   :  { %607 = vmax.xlane.f32.xlu0 %v606_v12  ;;  %v603_v13 = vpop.f32.mrb[18].mxu1 }
 0x599   :  { %v3012_v14 = vpop.f32.mrb[19].mxu1  ;;  %v609_v16 = vsel %vm289_vm2, %v601_v7, -inf }
 0x59a   :  { %610 = vmax.xlane.f32.xlu1 %v609_v16 }
 0x5ab   :  { %680 = vrot.lane.b32.xlu1 %v3639_v5, %s3402_s5 }
 0x5af   :  { %741 = vrot.lane.b32.xlu1 %v3624_v51, %s3403_s6 }
 0x5b3   :  { %791 = vrot.lane.b32.xlu1 %v3626_v54, %s3403_s6 }
 0x5b7   :  { %789 = vrot.lane.b32.xlu1 %v3626_v54, %s4217_s1 }
 0x625   :  { %v608_v17 = vpop.xlane.xlu0 %607 }
 0x626   :  { %v612_v18 = vsub.f32 %v551_v63, %v608_v17 }
 0x627   :  { %v611_v19 = vpop.xlane.xlu1 %610 }
 0x628   :  { %v614_v20 = vmul.f32 1.442695, %v612_v18  ;;  %v613_v21 = vsub.f32 %v601_v7, %v611_v19 }
 0x62a   :  { %3276 = vpow2.f32 %v614_v20  ;;  %v616_v22 = vmul.f32 1.442695, %v613_v21 }
 0x62b   :  { %v681_v24 = vpop.permute.xlu1 %680 }
 0x62c   :  { %3278 = vpow2.f32 %v616_v22  ;;  %v686_v25 = vsel %vm414_vm3, %v681_v24, 0 }
 0x62d   :  { %3020 = vmatpush3.bf16.msra.mxu1 %v686_v25 }
 0x62e   :  { %3031 = vmatprep.subr.bf16.mxu1 %v3398_v15 }
 0x62f   :  { %v742_v39 = vpop.permute.xlu1 %741 }
 0x630   :  { %v747_v45 = vsel %vm289_vm2, %v742_v39, 0 }
 0x633   :  { %v792_v44 = vpop.permute.xlu1 %791 }
 0x634   :  { %v3277_v27 = vpop.eup %3276  ;;  %v797_v47 = vsel %vm289_vm2, %v792_v44, 0 }
 0x635   :  { %v618_v28 = vsel %vm289_vm2, %v3277_v27, 0.0 }
 0x636   :  { %v3279_v30 = vpop.eup %3278  ;;  %619 = vadd.xlane.f32.xlu0 %v618_v28 }
 0x637   :  { %v621_v31 = vsel %vm289_vm2, %v3279_v30, 0.0  ;;  %v790_v49 = vpop.permute.xlu1 %789 }
 0x63a   :  { %622 = vadd.xlane.f32.xlu0 %v621_v31 }
 0x650   :  { %631 = vrot.lane.b32.xlu0 %v3636_v4, %s3402_s5 }
 0x654   :  { %739 = vrot.lane.b32.xlu0 %v3624_v51, %s4217_s1 }
 0x6c3   :  { %v620_v32 = vpop.xlane.xlu0 %619 }
 0x6c4   :  { %3280 = vrcp.f32 %v620_v32 }
 0x6c7   :  { %v623_v33 = vpop.xlane.xlu0 %622 }
 0x6c8   :  { %3282 = vrcp.f32 %v623_v33 }
 0x6cb   :  { %v632_v34 = vpop.permute.xlu0 %631 }
 0x6cc   :  { %v637_v35 = vsel %vm414_vm3, %v632_v34, 0 }
 0x6cd   :  { %3014 = vmatpush3.bf16.msra.mxu0 %v637_v35 }
 0x6ce   :  { %v3281_v36 = vpop.eup %3280  ;;  %3025 = vmatprep.subr.bf16.mxu0 %v3398_v15 }
 0x6cf   :  { %v626_v40 = vmul.f32 %v3281_v36, %v3277_v27  ;;  %v740_v48 = vpop.permute.xlu0 %739 }
 0x6d1   :  { %v628_v41 = vpack.c.bf16 %v626_v40, %v626_v40 }
 0x6d2   :  { %v3283_v42 = vpop.eup %3282 }
 0x6d3   :  { %v627_v43 = vmul.f32 %v3283_v42, %v3279_v30  ;;  %3016 = vmatmul.mubr.msk.bf16.vlgmr.msra.gmra.mrb[12].mxu0 %vm289_vm2, %v628_v41 }
 0x6d4   :  { %3027 = vmatprep.mubr.msk.bf16.mxu0 %vm3399_vm1, %v3398_v15 }
 0x6d5   :  { %v629_v46 = vpack.c.bf16 %v627_v43, %v627_v43 }
 0x6d6   :  { %3026 = vmatpush3.bf16.xpose.msra.mxu0 %v747_v45 }
 0x6d7   :  { %3022 = vmatmul.mubr.msk.bf16.vlgmr.msra.gmra.mrb[20].mxu1 %vm289_vm2, %v629_v46  ;;  %3037 = vmatprep.subr.bf16.mxu0 %v3398_v15 }
 0x6d8   :  { %3032 = vmatpush3.bf16.xpose.msra.mxu1 %v797_v47  ;;  %3033 = vmatprep.mubr.msk.bf16.mxu1 %vm3399_vm1, %v3398_v15 }
 0x6d9   :  { %3043 = vmatprep.subr.bf16.mxu1 %v3398_v15 }
 0x6dd   :  { %3028 = vmatmul.mubr.msk.bf16.vlgmr.msra.gmra.mrb[16].mxu0 %vm289_vm2, %v740_v48 }
 0x6de   :  { %3039 = vmatprep.mubr.msk.bf16.mxu0 %vm3399_vm1, %v3398_v15 }
 0x6df   :  { %3034 = vmatmul.mubr.msk.bf16.vlgmr.msra.gmra.mrb[24].mxu1 %vm289_vm2, %v790_v49 }
 0x6e0   :  { %3045 = vmatprep.mubr.msk.bf16.mxu1 %vm3399_vm1, %v3398_v15 }
 0x7a6   :  { %v3731_v50 = vpop.f32.mrb[12].mxu0 }
 0x7a7   :  { %v3017_v52 = vpop.f32.mrb[13].mxu0 }
 0x7a8   :  { %v676_v53 = vpop.f32.mrb[14].mxu0 }
 0x7a9   :  { %v3018_v55 = vpop.f32.mrb[15].mxu0 }
 0x7aa   :  { %v3733_v56 = vpop.f32.mrb[20].mxu1 }
 0x7ab   :  { %v3023_v57 = vpop.f32.mrb[21].mxu1 }
 0x7ac   :  { %v725_v58 = vpop.f32.mrb[22].mxu1 }
 0x7ad   :  { %v3024_v59 = vpop.f32.mrb[23].mxu1 }
 0x7b0   :  { %v783_v60 = vpop.f32.mrb[16].mxu0 }
 0x7b1   :  { %v784_v61 = vadd.f32 %v783_v60, %v3658_v8  ;;  %v3029_v62 = vpop.f32.mrb[17].mxu0 }
 0x7b2   :  { %v786_v63 = vpop.f32.mrb[18].mxu0  ;;  %v833_v2 = vpop.f32.mrb[24].mxu1 }
 0x7b3   :  { %v834_v3 = vadd.f32 %v833_v2, %v3663_v10  ;;  %v3030_v6 = vpop.f32.mrb[19].mxu0  ;;  %v3035_v7 = vpop.f32.mrb[25].mxu1  ;;  %v839_v9 = vsel %vm289_vm2, %v784_v61, -inf }
 0x7b4   :  { %840 = vmax.xlane.f32.xlu0 %v839_v9  ;;  %v836_v11 = vpop.f32.mrb[26].mxu1 }
 0x7b5   :  { %v3036_v12 = vpop.f32.mrb[27].mxu1  ;;  %v842_v13 = vsel %vm289_vm2, %v834_v3, -inf }
 0x7b6   :  { %843 = vmax.xlane.f32.xlu1 %v842_v13 }
 0x7c7   :  { %911 = vrot.lane.b32.xlu1 %v3639_v5, %s4217_s1 }
 0x7cb   :  { %972 = vrot.lane.b32.xlu1 %v3624_v51, %s3405_s3 }
 0x7cf   :  { %1022 = vrot.lane.b32.xlu1 %v3626_v54, %s3405_s3 }
 0x7d3   :  { %1020 = vrot.lane.b32.xlu1 %v3626_v54, %s4215_s7 }
 0x841   :  { %v841_v14 = vpop.xlane.xlu0 %840 }
 0x842   :  { %v845_v16 = vsub.f32 %v784_v61, %v841_v14 }
 0x843   :  { %v844_v17 = vpop.xlane.xlu1 %843 }
 0x844   :  { %v847_v18 = vmul.f32 1.442695, %v845_v16  ;;  %v846_v19 = vsub.f32 %v834_v3, %v844_v17 }
 0x846   :  { %3284 = vpow2.f32 %v847_v18  ;;  %v849_v20 = vmul.f32 1.442695, %v846_v19 }
 0x847   :  { %v912_v21 = vpop.permute.xlu1 %911 }
 0x848   :  { %3286 = vpow2.f32 %v849_v20  ;;  %v917_v22 = vsel %vm414_vm3, %v912_v21, 0 }
 0x849   :  { %3044 = vmatpush3.bf16.msra.mxu1 %v917_v22 }
 0x84a   :  { %3055 = vmatprep.subr.bf16.mxu1 %v3398_v15 }
 0x84b   :  { %v973_v34 = vpop.permute.xlu1 %972 }
 0x84f   :  { %v1023_v41 = vpop.permute.xlu1 %1022 }
 0x850   :  { %v3285_v24 = vpop.eup %3284  ;;  %v1028_v43 = vsel %vm289_vm2, %v1023_v41, 0 }
 0x851   :  { %v851_v25 = vsel %vm289_vm2, %v3285_v24, 0.0 }
 0x852   :  { %v3287_v27 = vpop.eup %3286  ;;  %852 = vadd.xlane.f32.xlu0 %v851_v25 }
 0x853   :  { %v854_v54 = vsel %vm289_vm2, %v3287_v27, 0.0  ;;  %v1021_v45 = vpop.permute.xlu1 %1020 }
 0x856   :  { %855 = vadd.xlane.f32.xlu0 %v854_v54 }
 0x86c   :  { %863 = vrot.lane.b32.xlu0 %v3636_v4, %s4217_s1 }
 0x870   :  { %970 = vrot.lane.b32.xlu0 %v3624_v51, %s4215_s7  ;;  %v978_v51 = vsel %vm289_vm2, %v973_v34, 0 }
 0x8df   :  { %v853_v28 = vpop.xlane.xlu0 %852 }
 0x8e0   :  { %3288 = vrcp.f32 %v853_v28 }
 0x8e3   :  { %v856_v30 = vpop.xlane.xlu0 %855 }
 0x8e4   :  { %3290 = vrcp.f32 %v856_v30 }
 0x8e7   :  { %v864_v31 = vpop.permute.xlu0 %863 }
 0x8e8   :  { %v869_v32 = vsel %vm414_vm3, %v864_v31, 0 }
 0x8e9   :  { %3038 = vmatpush3.bf16.msra.mxu0 %v869_v32 }
 0x8ea   :  { %v3289_v33 = vpop.eup %3288  ;;  %3049 = vmatprep.subr.bf16.mxu0 %v3398_v15 }
 0x8eb   :  { %v859_v35 = vmul.f32 %v3289_v33, %v3285_v24  ;;  %v971_v44 = vpop.permute.xlu0 %970 }
 0x8ed   :  { %v861_v36 = vpack.c.bf16 %v859_v35, %v859_v35  ;;  %v3248_v35 = vld [vmem:[%s4184_s11] sm:$0xff]  }
 0x8ee   :  { %v3291_v39 = vpop.eup %3290 }
 0x8ef   :  { %v860_v40 = vmul.f32 %v3291_v39, %v3287_v27  ;;  %3040 = vmatmul.mubr.msk.bf16.vlgmr.msra.gmra.mrb[20].mxu0 %vm289_vm2, %v861_v36  ;;  %v3249_v36 = vld [vmem:[%s4184_s11 + $0x8] sm:$0xff]  }
 0x8f0   :  { %3051 = vmatprep.mubr.msk.bf16.mxu0 %vm3399_vm1, %v3398_v15 }
 0x8f1   :  { %v862_v42 = vpack.c.bf16 %v860_v40, %v860_v40 }
 0x8f2   :  { %3050 = vmatpush3.bf16.xpose.msra.mxu0 %v978_v51 }
 0x8f3   :  { %3046 = vmatmul.mubr.msk.bf16.vlgmr.msra.gmra.mrb[28].mxu1 %vm289_vm2, %v862_v42  ;;  %3061 = vmatprep.subr.bf16.mxu0 %v3398_v15 }
 0x8f4   :  { %3056 = vmatpush3.bf16.xpose.msra.mxu1 %v1028_v43  ;;  %3057 = vmatprep.mubr.msk.bf16.mxu1 %vm3399_vm1, %v3398_v15 }
 0x8f5   :  { %3067 = vmatprep.subr.bf16.mxu1 %v3398_v15 }
 0x8f9   :  { %3052 = vmatmul.mubr.msk.bf16.vlgmr.msra.gmra.mrb[24].mxu0 %vm289_vm2, %v971_v44 }
 0x8fa   :  { %3063 = vmatprep.mubr.msk.bf16.mxu0 %vm3399_vm1, %v3398_v15 }
 0x8fb   :  { %3058 = vmatmul.mubr.msk.bf16.vlgmr.msra.gmra.mrb[32].mxu1 %vm289_vm2, %v1021_v45 }
 0x8fc   :  { %3069 = vmatprep.mubr.msk.bf16.mxu1 %vm3399_vm1, %v3398_v15 }
 0x9c2   :  { %v905_v46 = vpop.f32.mrb[20].mxu0 }
 0x9c3   :  { %v3041_v47 = vpop.f32.mrb[21].mxu0 }
 0x9c4   :  { %v908_v48 = vpop.f32.mrb[22].mxu0 }
 0x9c5   :  { %v3042_v49 = vpop.f32.mrb[23].mxu0 }
 0x9c6   :  { %v953_v52 = vpop.f32.mrb[28].mxu1 }
 0x9c7   :  { %v3047_v53 = vpop.f32.mrb[29].mxu1 }
 0x9c8   :  { %v956_v55 = vpop.f32.mrb[30].mxu1  ;;  %v2818_v53 = vld [vmem:[%s4185_s12] ss:$0 sm:$0xff] }
 0x9c9   :  { %v3048_v57 = vpop.f32.mrb[31].mxu1 }
 0x9cc   :  { %v1014_v58 = vpop.f32.mrb[24].mxu0 }
 0x9cd   :  { %v1015_v59 = vadd.f32 %v1014_v58, %v3658_v8  ;;  %v3053_v60 = vpop.f32.mrb[25].mxu0 }
 0x9ce   :  { %v1017_v61 = vpop.f32.mrb[26].mxu0  ;;  %v1064_v62 = vpop.f32.mrb[32].mxu1 }
 0x9cf   :  { %v1065_v63 = vadd.f32 %v1064_v62, %v3663_v10  ;;  %v3054_v2 = vpop.f32.mrb[27].mxu0  ;;  %v3059_v3 = vpop.f32.mrb[33].mxu1  ;;  %v1070_v6 = vsel %vm289_vm2, %v1015_v59, -inf }
 0x9d0   :  { %1071 = vmax.xlane.f32.xlu0 %v1070_v6  ;;  %v1067_v7 = vpop.f32.mrb[34].mxu1 }
 0x9d1   :  { %v3060_v9 = vpop.f32.mrb[35].mxu1  ;;  %v1073_v11 = vsel %vm289_vm2, %v1065_v63, -inf }
 0x9d2   :  { %1074 = vmax.xlane.f32.xlu1 %v1073_v11 }
 0x9e3   :  { %1142 = vrot.lane.b32.xlu1 %v3639_v5, %s4215_s7 }
 0x9e7   :  { %730 = vrot.lane.b32.xlu1 %v3731_v50, %s4213_s28 }
 0x9eb   :  { %732 = vrot.lane.b32.xlu1 %v3733_v56, %s4213_s28  ;;  %s4240_s28 = sld [smem:[#allocation12_spill]] }
 0x9ef   :  { %963 = vrot.lane.b32.xlu1 %v953_v52, %s4211_s8 }
 0xa5d   :  { %v1072_v8 = vpop.xlane.xlu0 %1071 }
 0xa5e   :  { %v1076_v10 = vsub.f32 %v1015_v59, %v1072_v8 }
 0xa5f   :  { %v1075_v12 = vpop.xlane.xlu1 %1074 }
 0xa60   :  { %v1078_v13 = vmul.f32 1.442695, %v1076_v10  ;;  %v1077_v14 = vsub.f32 %v1065_v63, %v1075_v12 }
 0xa62   :  { %3292 = vpow2.f32 %v1078_v13  ;;  %v1080_v16 = vmul.f32 1.442695, %v1077_v14  ;;  %v3250_v14 = vld [vmem:[%s4188_s15] sm:$0xff]  }
 0xa63   :  { %v1143_v17 = vpop.permute.xlu1 %1142 }
 0xa64   :  { %3294 = vpow2.f32 %v1080_v16  ;;  %v1148_v5 = vsel %vm414_vm3, %v1143_v17, 0  ;;  %v3251_v16 = vld [vmem:[%s4188_s15 + $0x8] sm:$0xff]   ;;  %v89_v17 = vld [vmem:[%s4239_s9] sm:$0xff] }
 0xa65   :  { %3068 = vmatpush3.bf16.msra.mxu1 %v1148_v5  ;;  %v90_v5 = vld [vmem:[%s4239_s9 + $0x8] sm:$0xff] }
 0xa66   :  { %3081 = vmatprep.subr.bf16.mxu1 %v3398_v15 }
 0xa67   :  { %v731_v50 = vpop.permute.xlu1 %730 }
 0xa68   :  { %737 = vst.msk [vmem:[#allocation2] sm:$0xff] %vm736_vm4, %v731_v50  ;;  %v95_v50 = vld [vmem:[%s4240_s28] sm:$0xff] }
 0xa6b   :  { %v733_v56 = vpop.permute.xlu1 %732 }
 0xa6c   :  { %v3293_v18 = vpop.eup %3292  ;;  %738 = vst.msk [vmem:[#allocation2 + $0x8] sm:$0xff] %vm736_vm4, %v733_v56  ;;  %v96_v56 = vld [vmem:[%s4240_s28 + $0x8] sm:$0xff] }
 0xa6d   :  { %v1082_v19 = vsel %vm289_vm2, %v3293_v18, 0.0 }
 0xa6e   :  { %v3295_v20 = vpop.eup %3294  ;;  %1083 = vadd.xlane.f32.xlu0 %v1082_v19  ;;  %v1376_v19 = vadd.f32 %v95_v50, %v89_v17  ;;  %v2831_v50 = vld [vmem:[%s4191_s18] ss:$0 sm:$0xff]  ;;  %s4242_s18 = smov 104  }
 0xa6f   :  { %v964_v21 = vpop.permute.xlu1 %963  ;;  %v1085_v22 = vsel %vm289_vm2, %v3295_v20, 0.0 }
 0xa70   :  { %969 = vst.msk [vmem:[#allocation2 + $0x8] sm:$0xff] %vm967_vm5, %v964_v21  ;;  %v92_v21 = vld [vmem:[%s4239_s9 + $0x18] sm:$0xff] }
 0xa72   :  { %1086 = vadd.xlane.f32.xlu0 %v1085_v22  ;;  %v97_v22 = vld [vmem:[%s4240_s28 + $0x10] sm:$0xff] }
 0xa88   :  { %1094 = vrot.lane.b32.xlu0 %v3636_v4, %s4215_s7  ;;  %s4245_s7 = smov 24  }
 0xa8c   :  { %961 = vrot.lane.b32.xlu0 %v905_v46, %s4211_s8 }
 0xafb   :  { %v1084_v24 = vpop.xlane.xlu0 %1083 }
 0xafc   :  { %3296 = vrcp.f32 %v1084_v24  ;;  %v98_v24 = vld [vmem:[%s4240_s28 + $0x18] sm:$0xff] }
 0xaff   :  { %v1087_v25 = vpop.xlane.xlu0 %1086 }
 0xb00   :  { %3298 = vrcp.f32 %v1087_v25 }
 0xb03   :  { %v1095_v27 = vpop.permute.xlu0 %1094 }
 0xb04   :  { %v1100_v54 = vsel %vm414_vm3, %v1095_v27, 0  ;;  %v1379_v27 = vadd.f32 %v98_v24, %v92_v21 }
 0xb05   :  { %3062 = vmatpush3.bf16.msra.mxu0 %v1100_v54 }
 0xb06   :  { %v3297_v28 = vpop.eup %3296  ;;  %3073 = vmatprep.subr.bf16.mxu0 %v3398_v15 }
 0xb07   :  { %v1090_v30 = vmul.f32 %v3297_v28, %v3293_v18  ;;  %v962_v31 = vpop.permute.xlu0 %961  ;;  %v91_v18 = vld [vmem:[%s4239_s9 + $0x10] sm:$0xff] }
 0xb08   :  { %968 = vst.msk [vmem:[#allocation2] sm:$0xff] %vm967_vm5, %v962_v31  ;;  %v1378_v25 = vadd.f32 %v97_v22, %v91_v18  ;;  %v3253_v31 = vld [vmem:[%s4186_s13 + $0x8] sm:$0xff]  }
 0xb09   :  { %v1092_v32 = vpack.c.bf16 %v1090_v30, %v1090_v30  ;;  %v3252_v30 = vld [vmem:[%s4186_s13] sm:$0xff]  }
 0xb0a   :  { %v3299_v33 = vpop.eup %3298  ;;  %v1381_v28 = vpack.c.bf16 %v1379_v27, %v1378_v25 }
 0xb0b   :  { %v1091_v4 = vmul.f32 %v3299_v33, %v3295_v20  ;;  %3064 = vmatmul.mubr.msk.bf16.vlgmr.msra.gmra.mrb[28].mxu0 %vm289_vm2, %v1092_v32  ;;  %v1377_v20 = vadd.f32 %v96_v56, %v90_v5  ;;  %v3254_v32 = vld [vmem:[%s4190_s17] sm:$0xff]  }
 0xb0c   :  { %3077 = vmatprep.mubr.msk.bf16.mxu0 %vm3399_vm1, %v3398_v15  ;;  %3074 = vmatpush3.bf16.msra.mxu0 %v3248_v35 }
 0xb0d   :  { %v1093_v34 = vpack.c.bf16 %v1091_v4, %v1091_v4  ;;  %3075 = vmatprep.subr.bf16.mxu0 %v3398_v15  ;;  %v1380_v54 = vpack.c.bf16 %v1377_v20, %v1376_v19 }
 0xb0f   :  { %3070 = vmatmul.mubr.msk.bf16.vlgmr.msra.gmra.mrb[36].mxu1 %vm289_vm2, %v1093_v34 }
 0xb10   :  { %3085 = vmatprep.mubr.msk.bf16.mxu1 %vm3399_vm1, %v3398_v15  ;;  %3076 = vmatpush3.bf16.msra.mxu0 %v3249_v36 }
 0xb11   :  { %3089 = vmatprep.subr.bf16.mxu0 %v3250_v14  ;;  %3082 = vmatpush3.bf16.msra.mxu1 %v3252_v30 }
 0xb12   :  { %3083 = vmatprep.subr.bf16.mxu1 %v3398_v15 }
 0xb15   :  { %3084 = vmatpush3.bf16.msra.mxu1 %v3253_v31 }
 0xb16   :  { %3097 = vmatprep.subr.bf16.mxu1 %v3254_v32 }
 0xbde   :  { %v1136_v39 = vpop.f32.mrb[28].mxu0 }
 0xbdf   :  { %1192 = vrot.lane.b32.xlu0 %v1136_v39, %s4209_s30  ;;  %v3065_v40 = vpop.f32.mrb[29].mxu0 }
 0xbe0   :  { %v1139_v41 = vpop.f32.mrb[30].mxu0  ;;  %v1296_v40 = vsub.s32 1, %v3580_v23 }
 0xbe1   :  { %v3066_v51 = vpop.f32.mrb[31].mxu0 }
 0xbe2   :  { %v1184_v42 = vpop.f32.mrb[36].mxu1  ;;  %v1297_v41 = vrot.slane %v3586_v26, %v1296_v40  ;;  %v3255_v26 = vld [vmem:[%s4190_s17 + $0x8] sm:$0xff]  }
 0xbe3   :  { %1194 = vrot.lane.b32.xlu1 %v1184_v42, %s4209_s30  ;;  %v3071_v43 = vpop.f32.mrb[37].mxu1 }
 0xbe4   :  { %v1187_v44 = vpop.f32.mrb[38].mxu1 }
 0xbe5   :  { %v3072_v45 = vpop.f32.mrb[39].mxu1  ;;  %v1303_v44 = vrot.slane %v3592_v29, %v1296_v40  ;;  %v1461_v29 = vpack.c.bf16 %v92_v21, %v91_v18 }
 0xc51   :  { %v1193_v46 = vpop.permute.xlu0 %1192 }
 0xc52   :  { %1199 = vst.msk [vmem:[#allocation2] sm:$0xff] %vm1198_vm6, %v1193_v46 }
 0xc55   :  { %v1195_v47 = vpop.permute.xlu1 %1194 }
 0xc56   :  { %1200 = vst.msk [vmem:[#allocation2 + $0x8] sm:$0xff] %vm1198_vm6, %v1195_v47 }
 0xc59   :  { %v1201_v48 = vld [vmem:[#allocation2] sm:$0xff] }
 0xc5d   :  { %v1202_v49 = vld [vmem:[#allocation2 + $0x8] sm:$0xff] }
 0xc5e   :  { %v1203_v52 = vpack.c.bf16 %v1202_v49, %v1201_v48 }
 0xc60   :  { %3078 = vmatmul.mubr.msk.bf16.vlgmr.msra.gmra.mrb[32].mxu0 %vm101_vm0, %v1203_v52 }
 0xc61   :  { %3090 = vmatpush3.bf16.msra.mxu0 %v3250_v14  ;;  %3093 = vmatprep.mubr.msk.bf16.mxu0 %vm101_vm0, %v1380_v54 }
 0xc62   :  { %3091 = vmatprep.subr.bf16.mxu0 %v3251_v16 }
 0xc65   :  { %3092 = vmatpush3.bf16.msra.mxu0 %v3251_v16 }
 0xc66   :  { %3105 = vmatprep.subr.bf16.mxu0 %v3398_v15 }
 0xc68   :  { %3094 = vmatmul.mubr.msk.bf16.vlgmr.msra.gmra.mrb[36].mxu0 %vm101_vm0, %v1381_v28 }
 0xc69   :  { %3107 = vmatprep.mubr.msk.bf16.mxu0 %vm3399_vm1, %v3398_v15 }
 0xd33   :  { %v1259_v55 = vpop.f32.mrb[32].mxu0 }
 0xd34   :  { %v1260_v57 = vadd.f32 %v2818_v53, %v1259_v55  ;;  %v3079_v58 = vpop.f32.mrb[33].mxu0  ;;  %v1460_v55 = vpack.c.bf16 %v90_v5, %v89_v17 }
 0xd35   :  { %v1262_v59 = vpop.f32.mrb[34].mxu0 }
 0xd36   :  { %v3817_v60 = vadd.f32 %v1260_v57, %v3551_v0  ;;  %v1263_v61 = vadd.f32 %v2818_v53, %v1262_v59  ;;  %v3080_v62 = vpop.f32.mrb[35].mxu0 }
 0xd38   :  { %v3820_v63 = vadd.f32 %v1263_v61, %v3556_v1  ;;  %v1268_v2 = vsel %vm101_vm0, %v3817_v60, 0.0 }
 0xd39   :  { %1269 = vadd.xlane.f32.xlu0 %v1268_v2 }
 0xd3a   :  { %v1271_v3 = vsel %vm101_vm0, %v3820_v63, 0.0 }
 0xd3b   :  { %1272 = vadd.xlane.f32.xlu1 %v1271_v3 }
 0xdc6   :  { %v1270_v6 = vpop.xlane.xlu0 %1269 }
 0xdc7   :  { %v1274_v7 = vmul.f32 0.03125, %v1270_v6 }
 0xdc8   :  { %v1273_v9 = vpop.xlane.xlu1 %1272 }
 0xdc9   :  { %v1276_v11 = vsub.f32 %v3817_v60, %v1274_v7  ;;  %v1275_v0 = vmul.f32 0.03125, %v1273_v9 }
 0xdcb   :  { %v1277_v8 = vsub.f32 %v3820_v63, %v1275_v0  ;;  %v1278_v10 = vmul.f32 %v1276_v11, %v1276_v11 }
 0xdcd   :  { %v1280_v1 = vsel %vm101_vm0, %v1278_v10, 0.0  ;;  %v1279_v12 = vmul.f32 %v1277_v8, %v1277_v8 }
 0xdce   :  { %1281 = vadd.xlane.f32.xlu0 %v1280_v1 }
 0xdcf   :  { %v1283_v13 = vsel %vm101_vm0, %v1279_v12, 0.0 }
 0xdd2   :  { %1284 = vadd.xlane.f32.xlu0 %v1283_v13 }
 0xe5b   :  { %v1282_v33 = vpop.xlane.xlu0 %1281 }
 0xe5c   :  { %v1286_v4 = vmul.f32 0.03125, %v1282_v33 }
 0xe5e   :  { %v1288_v34 = vadd.f32 1e-05, %v1286_v4 }
 0xe5f   :  { %v1285_v35 = vpop.xlane.xlu0 %1284 }
 0xe60   :  { %3300 = vrsqrt.f32 %v1288_v34  ;;  %v1287_v36 = vmul.f32 0.03125, %v1285_v35 }
 0xe62   :  { %v1289_v39 = vadd.f32 1e-05, %v1287_v36 }
 0xe64   :  { %3302 = vrsqrt.f32 %v1289_v39 }
 0xe6a   :  { %v3301_v51 = vpop.eup %3300 }
 0xe6b   :  { %v1292_v42 = vmul.f32 %v3301_v51, %v1276_v11 }
 0xe6d   :  { %v1298_v43 = vadd.f32 %v1297_v41, %v1292_v42 }
 0xe6e   :  { %v3303_v45 = vpop.eup %3302 }
 0xe6f   :  { %v1293_v46 = vmul.f32 %v3303_v45, %v1277_v8  ;;  %v1304_v48 = vmul.f32 %v1303_v44, %v1298_v43  ;;  %v2822_v8 = vld [vmem:[%s4187_s14] ss:$0 sm:$0xff]  ;;  %s4241_s14 = smov 112  }
 0xe71   :  { %v1299_v47 = vadd.f32 %v1297_v41, %v1293_v46  ;;  %v1306_v52 = vadd.f32 %v1304_v48, %v3598_v37  ;;  %v2826_v37 = vld [vmem:[%s4189_s16] ss:$0 sm:$0xff] }
 0xe73   :  { %v1305_v49 = vmul.f32 %v1303_v44, %v1299_v47 }
 0xe75   :  { %v1307_v53 = vadd.f32 %v1305_v49, %v3603_v38  ;;  %v3095_v38 = vpop.f32.mrb[36].mxu0 }
 0xe76   :  { %v1454_v58 = vadd.f32 %v3095_v38, %v2826_v37  ;;  %v1445_v59 = vpop.f32.mrb[37].mxu0 }
 0xe77   :  { %v1308_v57 = vpack.c.bf16 %v1307_v53, %v1306_v52  ;;  %v1446_v61 = vadd.f32 %v2826_v37, %v1445_v59  ;;  %v3096_v62 = vpop.f32.mrb[38].mxu0 }
 0xe78   :  { %v1457_v2 = vadd.f32 %v3096_v62, %v2826_v37  ;;  %v1448_v3 = vpop.f32.mrb[39].mxu0 }
 0xe79   :  { %3086 = vmatmul.mubr.msk.bf16.vlgmr.msra.gmra.mrb[40].mxu1 %vm101_vm0, %v1308_v57  ;;  %v1449_v6 = vadd.f32 %v2826_v37, %v1448_v3 }
 0xe7a   :  { %3098 = vmatpush3.bf16.msra.mxu1 %v3254_v32  ;;  %3101 = vmatprep.mubr.msk.bf16.mxu1 %vm101_vm0, %v1460_v55  ;;  %v3892_v7 = vpack.c.bf16 %v1457_v2, %v1454_v58 }
 0xe7b   :  { %3099 = vmatprep.subr.bf16.mxu1 %v3255_v26  ;;  %v3894_v9 = vpack.c.bf16 %v1449_v6, %v1446_v61 }
 0xe7c   :  { %v1599_v11 = vsel %vm289_vm2, %v3892_v7, 0 }
 0xe7d   :  { %v1553_v0 = vsel %vm289_vm2, %v3894_v9, 0 }
 0xe7e   :  { %3100 = vmatpush3.bf16.msra.mxu1 %v3255_v26  ;;  %3106 = vmatpush3.bf16.xpose.msra.mxu0 %v1553_v0 }
 0xe7f   :  { %3111 = vmatprep.subr.bf16.mxu1 %v3398_v15  ;;  %3117 = vmatprep.subr.bf16.mxu0 %v3398_v15 }
 0xe81   :  { %3102 = vmatmul.mubr.msk.bf16.vlgmr.msra.gmra.mrb[44].mxu1 %vm101_vm0, %v1461_v29 }
 0xe82   :  { %3113 = vmatprep.mubr.msk.bf16.mxu1 %vm3399_vm1, %v3398_v15 }
 0xe87   :  { %3112 = vmatpush3.bf16.xpose.msra.mxu1 %v1599_v11 }
 0xe88   :  { %3123 = vmatprep.subr.bf16.mxu1 %v3398_v15 }
 0xf4c   :  { %v1369_v10 = vpop.f32.mrb[40].mxu1 }
 0xf4d   :  { %v1370_v1 = vadd.f32 %v2822_v8, %v1369_v10  ;;  %v3087_v12 = vpop.f32.mrb[41].mxu1 }
 0xf4e   :  { %v1372_v13 = vpop.f32.mrb[42].mxu1 }
 0xf4f   :  { %v3905_v14 = vpack.c.bf16 %v1370_v1, %v1370_v1  ;;  %v1373_v16 = vadd.f32 %v2822_v8, %v1372_v13  ;;  %v3088_v17 = vpop.f32.mrb[43].mxu1 }
 0xf51   :  { %v3907_v5 = vpack.c.bf16 %v1373_v16, %v1373_v16  ;;  %3108 = vmatmul.mubr.msk.bf16.vlgmr.msra.gmra.mrb[40].mxu0 %vm289_vm2, %v3905_v14 }
 0xf52   :  { %3119 = vmatprep.mubr.msk.bf16.mxu0 %vm3399_vm1, %v3398_v15 }
 0xf53   :  { %3114 = vmatmul.mubr.msk.bf16.vlgmr.msra.gmra.mrb[48].mxu1 %vm289_vm2, %v3907_v5 }
 0xf54   :  { %v3103_v56 = vpop.f32.mrb[44].mxu1  ;;  %3125 = vmatprep.mubr.msk.bf16.mxu1 %vm3399_vm1, %v3398_v15 }
 0xf55   :  { %v1534_v18 = vadd.f32 %v3103_v56, %v2831_v50  ;;  %v1525_v19 = vpop.f32.mrb[45].mxu1 }
 0xf56   :  { %v1526_v20 = vadd.f32 %v2831_v50, %v1525_v19  ;;  %v3104_v21 = vpop.f32.mrb[46].mxu1 }
 0xf57   :  { %v1537_v22 = vadd.f32 %v3104_v21, %v2831_v50  ;;  %v1528_v24 = vpop.f32.mrb[47].mxu1 }
 0xf58   :  { %v1529_v25 = vadd.f32 %v2831_v50, %v1528_v24 }
 0xf59   :  { %v3920_v27 = vpack.c.bf16 %v1537_v22, %v1534_v18 }
 0xf5a   :  { %v3922_v54 = vpack.c.bf16 %v1529_v25, %v1526_v20 }
 0xf5b   :  { %3124 = vmatpush3.bf16.msra.mxu1 %v3920_v27 }
 0xf5c   :  { %3118 = vmatpush3.bf16.msra.mxu0 %v3922_v54  ;;  %3135 = vmatprep.subr.bf16.mxu1 %v3398_v15 }
 0xf5d   :  { %3129 = vmatprep.subr.bf16.mxu0 %v3398_v15 }
0x1024   :  { %v1589_v28 = vpop.f32.mrb[40].mxu0 }
0x1025   :  { %v3109_v30 = vpop.f32.mrb[41].mxu0  ;;  %v1642_v31 = vsel %vm1641_vm7, %v1589_v28, -inf }
0x1026   :  { %1643 = vmax.xlane.f32.xlu0 %v1642_v31  ;;  %v1592_v32 = vpop.f32.mrb[42].mxu0  ;;  %v1635_v33 = vpop.f32.mrb[48].mxu1 }
0x1027   :  { %v3110_v4 = vpop.f32.mrb[43].mxu0  ;;  %v3115_v34 = vpop.f32.mrb[49].mxu1  ;;  %v1645_v35 = vsel %vm1641_vm7, %v1635_v33, -inf }
0x1028   :  { %1646 = vmax.xlane.f32.xlu1 %v1645_v35  ;;  %v1638_v36 = vpop.f32.mrb[50].mxu1 }
0x1029   :  { %v3116_v39 = vpop.f32.mrb[51].mxu1 }
0x1039   :  { %1812 = vrot.lane.b32.xlu1 %v3892_v7, %s3402_s5 }
0x10b3   :  { %v1644_v40 = vpop.xlane.xlu0 %1643 }
0x10b4   :  { %v1648_v41 = vsub.f32 %v1589_v28, %v1644_v40 }
0x10b5   :  { %v1647_v51 = vpop.xlane.xlu1 %1646 }
0x10b6   :  { %v1650_v42 = vmul.f32 1.442695, %v1648_v41  ;;  %v1649_v43 = vsub.f32 %v1635_v33, %v1647_v51 }
0x10b8   :  { %3304 = vpow2.f32 %v1650_v42  ;;  %v1652_v44 = vmul.f32 1.442695, %v1649_v43 }
0x10b9   :  { %v1813_v49 = vpop.permute.xlu1 %1812 }
0x10ba   :  { %3306 = vpow2.f32 %v1652_v44  ;;  %v1818_v61 = vsel %vm289_vm2, %v1813_v49, 0 }
0x10c2   :  { %v3305_v45 = vpop.eup %3304 }
0x10c3   :  { %v1654_v46 = vsel %vm1641_vm7, %v3305_v45, 0.0 }
0x10c4   :  { %v3307_v47 = vpop.eup %3306  ;;  %1655 = vadd.xlane.f32.xlu0 %v1654_v46 }
0x10c5   :  { %v1657_v48 = vsel %vm1641_vm7, %v3307_v47, 0.0 }
0x10c6   :  { %1658 = vadd.xlane.f32.xlu1 %v1657_v48 }
0x10d7   :  { %1757 = vrot.lane.b32.xlu1 %v3905_v14, %s3402_s5 }
0x10da   :  { %1760 = vrot.lane.b32.xlu0 %v3894_v9, %s3402_s5 }
0x10db   :  { %1809 = vrot.lane.b32.xlu1 %v3907_v5, %s3402_s5 }
0x1151   :  { %v1656_v52 = vpop.xlane.xlu0 %1655 }
0x1152   :  { %3308 = vrcp.f32 %v1656_v52 }
0x1153   :  { %v1659_v53 = vpop.xlane.xlu1 %1658 }
0x1154   :  { %3310 = vrcp.f32 %v1659_v53 }
0x1155   :  { %v1761_v29 = vpop.permute.xlu0 %1760 }
0x1156   :  { %v1766_v58 = vsel %vm289_vm2, %v1761_v29, 0 }
0x1157   :  { %v1758_v62 = vpop.permute.xlu1 %1757 }
0x115b   :  { %v1810_v2 = vpop.permute.xlu1 %1809 }
0x115c   :  { %v3309_v55 = vpop.eup %3308 }
0x115d   :  { %v1662_v57 = vmul.f32 %v3309_v55, %v3305_v45 }
0x115e   :  { %v3311_v26 = vpop.eup %3310 }
0x115f   :  { %v1663_v37 = vmul.f32 %v3311_v26, %v3307_v47  ;;  %v1664_v38 = vpack.c.bf16 %v1662_v57, %v1662_v57 }
0x1161   :  { %3120 = vmatmul.mubr.msk.bf16.vlgmr.msra.gmra.mrb[44].mxu0 %vm1641_vm7, %v1664_v38  ;;  %v1665_v59 = vpack.c.bf16 %v1663_v37, %v1663_v37 }
0x1162   :  { %3130 = vmatpush3.bf16.xpose.msra.mxu0 %v1766_v58  ;;  %3131 = vmatprep.mubr.msk.bf16.mxu0 %vm3399_vm1, %v3398_v15 }
0x1163   :  { %3126 = vmatmul.mubr.msk.bf16.vlgmr.msra.gmra.mrb[52].mxu1 %vm1641_vm7, %v1665_v59  ;;  %3141 = vmatprep.subr.bf16.mxu0 %v3398_v15 }
0x1164   :  { %3136 = vmatpush3.bf16.xpose.msra.mxu1 %v1818_v61  ;;  %3137 = vmatprep.mubr.msk.bf16.mxu1 %vm3399_vm1, %v3398_v15 }
0x1165   :  { %3147 = vmatprep.subr.bf16.mxu1 %v3398_v15 }
0x1169   :  { %3132 = vmatmul.mubr.msk.bf16.vlgmr.msra.gmra.mrb[48].mxu0 %vm289_vm2, %v1758_v62 }
0x116a   :  { %3143 = vmatprep.mubr.msk.bf16.mxu0 %vm3399_vm1, %v3398_v15 }
0x116b   :  { %3138 = vmatmul.mubr.msk.bf16.vlgmr.msra.gmra.mrb[56].mxu1 %vm289_vm2, %v1810_v2 }
0x116c   :  { %3149 = vmatprep.mubr.msk.bf16.mxu1 %vm3399_vm1, %v3398_v15 }
0x1234   :  { %v1705_v3 = vpop.f32.mrb[44].mxu0 }
0x1235   :  { %1754 = vst.msk [vmem:[#allocation2] sm:$0xff] %vm289_vm2, %v1705_v3  ;;  %v3121_v6 = vpop.f32.mrb[45].mxu0 }
0x1236   :  { %v1708_v11 = vpop.f32.mrb[46].mxu0  ;;  %v1748_v0 = vpop.f32.mrb[52].mxu1 }
0x1237   :  { %1755 = vst.msk [vmem:[#allocation2 + $0x8] sm:$0xff] %vm289_vm2, %v1748_v0  ;;  %v3122_v8 = vpop.f32.mrb[47].mxu0  ;;  %v3127_v10 = vpop.f32.mrb[53].mxu1 }
0x1238   :  { %v1751_v1 = vpop.f32.mrb[54].mxu1 }
0x1239   :  { %v3128_v12 = vpop.f32.mrb[55].mxu1 }
0x123c   :  { %v1802_v13 = vpop.f32.mrb[48].mxu0 }
0x123d   :  { %v3133_v16 = vpop.f32.mrb[49].mxu0  ;;  %v1860_v17 = vsel %vm1641_vm7, %v1802_v13, -inf }
0x123e   :  { %v1854_v50 = vpop.f32.mrb[56].mxu1  ;;  %1861 = vmax.xlane.f32.xlu0 %v1860_v17  ;;  %v1805_v56 = vpop.f32.mrb[50].mxu0 }
0x123f   :  { %v3134_v18 = vpop.f32.mrb[51].mxu0  ;;  %v3139_v19 = vpop.f32.mrb[57].mxu1  ;;  %v1863_v20 = vsel %vm1641_vm7, %v1854_v50, -inf }
0x1240   :  { %1864 = vmax.xlane.f32.xlu1 %v1863_v20  ;;  %v1857_v21 = vpop.f32.mrb[58].mxu1 }
0x1241   :  { %v3140_v22 = vpop.f32.mrb[59].mxu1 }
0x1251   :  { %1932 = vrot.lane.b32.xlu1 %v3920_v27, %s3402_s5 }
0x1255   :  { %1990 = vrot.lane.b32.xlu1 %v3894_v9, %s4241_s14 }
0x1259   :  { %2040 = vrot.lane.b32.xlu1 %v3892_v7, %s4241_s14 }
0x125d   :  { %2038 = vrot.lane.b32.xlu1 %v3907_v5, %s4241_s14 }
0x12cb   :  { %v1862_v24 = vpop.xlane.xlu0 %1861 }
0x12cc   :  { %v1866_v25 = vsub.f32 %v1802_v13, %v1862_v24 }
0x12cd   :  { %v1865_v28 = vpop.xlane.xlu1 %1864 }
0x12ce   :  { %v1868_v30 = vmul.f32 1.442695, %v1866_v25  ;;  %v1867_v31 = vsub.f32 %v1854_v50, %v1865_v28 }
0x12d0   :  { %3312 = vpow2.f32 %v1868_v30  ;;  %v1870_v32 = vmul.f32 1.442695, %v1867_v31 }
0x12d1   :  { %v1933_v33 = vpop.permute.xlu1 %1932 }
0x12d2   :  { %3314 = vpow2.f32 %v1870_v32  ;;  %3148 = vmatpush3.bf16.msra.mxu1 %v1933_v33 }
0x12d3   :  { %3159 = vmatprep.subr.bf16.mxu1 %v3398_v15 }
0x12d5   :  { %v1991_v42 = vpop.permute.xlu1 %1990 }
0x12d6   :  { %v1996_v47 = vsel %vm289_vm2, %v1991_v42, 0 }
0x12d9   :  { %v2041_v48 = vpop.permute.xlu1 %2040 }
0x12da   :  { %v3313_v4 = vpop.eup %3312  ;;  %v2046_v52 = vsel %vm289_vm2, %v2041_v48, 0 }
0x12db   :  { %v1872_v34 = vsel %vm1641_vm7, %v3313_v4, 0.0 }
0x12dc   :  { %v3315_v35 = vpop.eup %3314  ;;  %1873 = vadd.xlane.f32.xlu0 %v1872_v34 }
0x12dd   :  { %v1875_v36 = vsel %vm1641_vm7, %v3315_v35, 0.0  ;;  %v2039_v55 = vpop.permute.xlu1 %2038 }
0x12e0   :  { %1876 = vadd.xlane.f32.xlu0 %v1875_v36 }
0x12f6   :  { %1885 = vrot.lane.b32.xlu0 %v3922_v54, %s3402_s5  ;;  %s4243_s5 = smov 8  }
0x12fa   :  { %1988 = vrot.lane.b32.xlu0 %v3905_v14, %s4241_s14 }
0x1369   :  { %v1874_v39 = vpop.xlane.xlu0 %1873 }
0x136a   :  { %3316 = vrcp.f32 %v1874_v39 }
0x136d   :  { %v1877_v40 = vpop.xlane.xlu0 %1876 }
0x136e   :  { %3318 = vrcp.f32 %v1877_v40 }
0x1371   :  { %v1886_v41 = vpop.permute.xlu0 %1885 }
0x1372   :  { %3142 = vmatpush3.bf16.msra.mxu0 %v1886_v41 }
0x1373   :  { %3153 = vmatprep.subr.bf16.mxu0 %v3398_v15 }
0x1374   :  { %v3317_v51 = vpop.eup %3316 }
0x1375   :  { %v1880_v43 = vmul.f32 %v3317_v51, %v3313_v4  ;;  %v1989_v53 = vpop.permute.xlu0 %1988 }
0x1377   :  { %v1882_v44 = vpack.c.bf16 %v1880_v43, %v1880_v43 }
0x1378   :  { %v3319_v45 = vpop.eup %3318 }
0x1379   :  { %v1881_v46 = vmul.f32 %v3319_v45, %v3315_v35  ;;  %3144 = vmatmul.mubr.msk.bf16.vlgmr.msra.gmra.mrb[52].mxu0 %vm1641_vm7, %v1882_v44 }
0x137a   :  { %3155 = vmatprep.mubr.msk.bf16.mxu0 %vm3399_vm1, %v3398_v15 }
0x137b   :  { %3154 = vmatpush3.bf16.xpose.msra.mxu0 %v1996_v47  ;;  %v1883_v49 = vpack.c.bf16 %v1881_v46, %v1881_v46 }
0x137c   :  { %3165 = vmatprep.subr.bf16.mxu0 %v3398_v15 }
0x137d   :  { %3150 = vmatmul.mubr.msk.bf16.vlgmr.msra.gmra.mrb[60].mxu1 %vm1641_vm7, %v1883_v49 }
0x137e   :  { %3160 = vmatpush3.bf16.xpose.msra.mxu1 %v2046_v52  ;;  %3161 = vmatprep.mubr.msk.bf16.mxu1 %vm3399_vm1, %v3398_v15 }
0x137f   :  { %3171 = vmatprep.subr.bf16.mxu1 %v3398_v15 }
0x1382   :  { %3156 = vmatmul.mubr.msk.bf16.vlgmr.msra.gmra.mrb[56].mxu0 %vm289_vm2, %v1989_v53 }
0x1383   :  { %3167 = vmatprep.mubr.msk.bf16.mxu0 %vm3399_vm1, %v3398_v15 }
0x1385   :  { %3162 = vmatmul.mubr.msk.bf16.vlgmr.msra.gmra.mrb[64].mxu1 %vm289_vm2, %v2039_v55 }
0x1386   :  { %3173 = vmatprep.mubr.msk.bf16.mxu1 %vm3399_vm1, %v3398_v15 }
0x144c   :  { %v3992_v57 = vpop.f32.mrb[52].mxu0 }
0x144d   :  { %v3145_v26 = vpop.f32.mrb[53].mxu0 }
0x144e   :  { %v1928_v29 = vpop.f32.mrb[54].mxu0 }
0x144f   :  { %v3146_v37 = vpop.f32.mrb[55].mxu0 }
0x1450   :  { %v3994_v38 = vpop.f32.mrb[60].mxu1 }
0x1451   :  { %v3151_v58 = vpop.f32.mrb[61].mxu1 }
0x1452   :  { %v1975_v59 = vpop.f32.mrb[62].mxu1 }
0x1453   :  { %v3152_v61 = vpop.f32.mrb[63].mxu1 }
0x1455   :  { %v2032_v62 = vpop.f32.mrb[56].mxu0 }
0x1456   :  { %v3157_v2 = vpop.f32.mrb[57].mxu0  ;;  %v2088_v3 = vsel %vm1641_vm7, %v2032_v62, -inf }
0x1457   :  { %2089 = vmax.xlane.f32.xlu0 %v2088_v3  ;;  %v2035_v6 = vpop.f32.mrb[58].mxu0 }
0x1458   :  { %v3158_v11 = vpop.f32.mrb[59].mxu0  ;;  %v2082_v0 = vpop.f32.mrb[64].mxu1 }
0x1459   :  { %v3163_v8 = vpop.f32.mrb[65].mxu1  ;;  %v2091_v10 = vsel %vm1641_vm7, %v2082_v0, -inf }
0x145a   :  { %2092 = vmax.xlane.f32.xlu1 %v2091_v10  ;;  %v2085_v1 = vpop.f32.mrb[66].mxu1 }
0x145b   :  { %v3164_v12 = vpop.f32.mrb[67].mxu1 }
0x146b   :  { %2158 = vrot.lane.b32.xlu1 %v3920_v27, %s4241_s14 }
0x146f   :  { %2216 = vrot.lane.b32.xlu1 %v3894_v9, %s4242_s18 }
0x1473   :  { %2266 = vrot.lane.b32.xlu1 %v3892_v7, %s4242_s18 }
0x1477   :  { %2264 = vrot.lane.b32.xlu1 %v3907_v5, %s4242_s18 }
0x14e4   :  { %v2090_v13 = vpop.xlane.xlu0 %2089 }
0x14e5   :  { %v2094_v16 = vsub.f32 %v2032_v62, %v2090_v13 }
0x14e7   :  { %v2096_v17 = vmul.f32 1.442695, %v2094_v16  ;;  %v2093_v50 = vpop.xlane.xlu1 %2092 }
0x14e8   :  { %v2095_v56 = vsub.f32 %v2082_v0, %v2093_v50 }
0x14e9   :  { %3320 = vpow2.f32 %v2096_v17 }
0x14ea   :  { %v2098_v18 = vmul.f32 1.442695, %v2095_v56 }
0x14eb   :  { %v2159_v19 = vpop.permute.xlu1 %2158 }
0x14ec   :  { %3322 = vpow2.f32 %v2098_v18  ;;  %3172 = vmatpush3.bf16.msra.mxu1 %v2159_v19 }
0x14ed   :  { %3183 = vmatprep.subr.bf16.mxu1 %v3398_v15 }
0x14ef   :  { %v2217_v28 = vpop.permute.xlu1 %2216 }
0x14f0   :  { %v2222_v4 = vsel %vm289_vm2, %v2217_v28, 0 }
0x14f3   :  { %v3321_v20 = vpop.eup %3320  ;;  %v2267_v34 = vpop.permute.xlu1 %2266 }
0x14f4   :  { %v2100_v9 = vsel %vm1641_vm7, %v3321_v20, 0.0  ;;  %v2272_v35 = vsel %vm289_vm2, %v2267_v34, 0 }
0x14f5   :  { %2101 = vadd.xlane.f32.xlu0 %v2100_v9  ;;  %v3256_v9 = vld [vmem:[%s4192_s19] sm:$0xff]  }
0x14f6   :  { %v3323_v7 = vpop.eup %3322 }
0x14f7   :  { %v2103_v21 = vsel %vm1641_vm7, %v3323_v7, 0.0  ;;  %v2265_v39 = vpop.permute.xlu1 %2264 }
0x14f9   :  { %2104 = vadd.xlane.f32.xlu0 %v2103_v21 }
0x150f   :  { %2112 = vrot.lane.b32.xlu0 %v3922_v54, %s4241_s14 }
0x1513   :  { %2214 = vrot.lane.b32.xlu0 %v3905_v14, %s4242_s18 }
0x1582   :  { %v2102_v5 = vpop.xlane.xlu0 %2101 }
0x1583   :  { %3324 = vrcp.f32 %v2102_v5 }
0x1586   :  { %v2105_v22 = vpop.xlane.xlu0 %2104 }
0x1587   :  { %3326 = vrcp.f32 %v2105_v22 }
0x158a   :  { %v2113_v24 = vpop.permute.xlu0 %2112 }
0x158b   :  { %3166 = vmatpush3.bf16.msra.mxu0 %v2113_v24 }
0x158c   :  { %3177 = vmatprep.subr.bf16.mxu0 %v3398_v15 }
0x158d   :  { %v3325_v25 = vpop.eup %3324 }
0x158e   :  { %v2108_v30 = vmul.f32 %v3325_v25, %v3321_v20  ;;  %v2215_v36 = vpop.permute.xlu0 %2214 }
0x1590   :  { %v2110_v31 = vpack.c.bf16 %v2108_v30, %v2108_v30 }
0x1591   :  { %v3327_v32 = vpop.eup %3326 }
0x1592   :  { %v2109_v33 = vmul.f32 %v3327_v32, %v3323_v7  ;;  %3168 = vmatmul.mubr.msk.bf16.vlgmr.msra.gmra.mrb[60].mxu0 %vm1641_vm7, %v2110_v31  ;;  %v3257_v7 = vld [vmem:[%s4192_s19 + $0x8] sm:$0xff]  }
0x1593   :  { %3179 = vmatprep.mubr.msk.bf16.mxu0 %vm3399_vm1, %v3398_v15 }
0x1594   :  { %3178 = vmatpush3.bf16.xpose.msra.mxu0 %v2222_v4  ;;  %v2111_v14 = vpack.c.bf16 %v2109_v33, %v2109_v33 }
0x1595   :  { %3189 = vmatprep.subr.bf16.mxu0 %v3398_v15 }
0x1596   :  { %3174 = vmatmul.mubr.msk.bf16.vlgmr.msra.gmra.mrb[68].mxu1 %vm1641_vm7, %v2111_v14 }
0x1597   :  { %3184 = vmatpush3.bf16.xpose.msra.mxu1 %v2272_v35  ;;  %3185 = vmatprep.mubr.msk.bf16.mxu1 %vm3399_vm1, %v3398_v15  ;;  %v2852_v35 = vld [vmem:[%s4193_s20] ss:$0 sm:$0xff] }
0x1598   :  { %3195 = vmatprep.subr.bf16.mxu1 %v3398_v15 }
0x159b   :  { %3180 = vmatmul.mubr.msk.bf16.vlgmr.msra.gmra.mrb[64].mxu0 %vm289_vm2, %v2215_v36 }
0x159c   :  { %3191 = vmatprep.mubr.msk.bf16.mxu0 %vm3399_vm1, %v3398_v15 }
0x159e   :  { %3186 = vmatmul.mubr.msk.bf16.vlgmr.msra.gmra.mrb[72].mxu1 %vm289_vm2, %v2265_v39 }
0x159f   :  { %3197 = vmatprep.mubr.msk.bf16.mxu1 %vm3399_vm1, %v3398_v15 }
0x1665   :  { %v2152_v40 = vpop.f32.mrb[60].mxu0 }
0x1666   :  { %v3169_v41 = vpop.f32.mrb[61].mxu0 }
0x1667   :  { %v2155_v51 = vpop.f32.mrb[62].mxu0 }
0x1668   :  { %v3170_v42 = vpop.f32.mrb[63].mxu0 }
0x1669   :  { %v2198_v43 = vpop.f32.mrb[68].mxu1 }
0x166a   :  { %v3175_v44 = vpop.f32.mrb[69].mxu1 }
0x166b   :  { %v2201_v45 = vpop.f32.mrb[70].mxu1 }
0x166c   :  { %v3176_v46 = vpop.f32.mrb[71].mxu1 }
0x166e   :  { %v2258_v47 = vpop.f32.mrb[64].mxu0 }
0x166f   :  { %v3181_v48 = vpop.f32.mrb[65].mxu0  ;;  %v2314_v49 = vsel %vm1641_vm7, %v2258_v47, -inf }
0x1670   :  { %2315 = vmax.xlane.f32.xlu0 %v2314_v49  ;;  %v2261_v52 = vpop.f32.mrb[66].mxu0 }
0x1671   :  { %v3182_v53 = vpop.f32.mrb[67].mxu0  ;;  %v2308_v55 = vpop.f32.mrb[72].mxu1 }
0x1672   :  { %v3187_v26 = vpop.f32.mrb[73].mxu1  ;;  %v2317_v29 = vsel %vm1641_vm7, %v2308_v55, -inf }
0x1673   :  { %2318 = vmax.xlane.f32.xlu1 %v2317_v29  ;;  %v2311_v37 = vpop.f32.mrb[74].mxu1 }
0x1674   :  { %v3188_v58 = vpop.f32.mrb[75].mxu1  ;;  %v3258_v37 = vld [vmem:[%s4194_s21] sm:$0xff]  }
0x1675   :  { %v3259_v58 = vld [vmem:[%s4194_s21 + $0x8] sm:$0xff]  }
0x1684   :  { %2384 = vrot.lane.b32.xlu1 %v3920_v27, %s4242_s18 }
0x1688   :  { %1980 = vrot.lane.b32.xlu1 %v3992_v57, %s4243_s5 }
0x168c   :  { %1982 = vrot.lane.b32.xlu1 %v3994_v38, %s4243_s5 }
0x1690   :  { %2208 = vrot.lane.b32.xlu1 %v2198_v43, %s4244_s4 }
0x16fd   :  { %v2316_v59 = vpop.xlane.xlu0 %2315 }
0x16fe   :  { %v2320_v61 = vsub.f32 %v2258_v47, %v2316_v59 }
0x1700   :  { %v2322_v62 = vmul.f32 1.442695, %v2320_v61  ;;  %v2319_v2 = vpop.xlane.xlu1 %2318 }
0x1701   :  { %v2321_v3 = vsub.f32 %v2308_v55, %v2319_v2 }
0x1702   :  { %3328 = vpow2.f32 %v2322_v62 }
0x1703   :  { %v2324_v6 = vmul.f32 1.442695, %v2321_v3 }
0x1704   :  { %v2385_v11 = vpop.permute.xlu1 %2384 }
0x1705   :  { %3330 = vpow2.f32 %v2324_v6  ;;  %3196 = vmatpush3.bf16.msra.mxu1 %v2385_v11  ;;  %v2535_v11 = vsub.s32 2, %v3580_v23 }
0x1706   :  { %3209 = vmatprep.subr.bf16.mxu1 %v3398_v15 }
0x1708   :  { %v1981_v27 = vpop.permute.xlu1 %1980 }
0x1709   :  { %1986 = vst.msk [vmem:[#allocation2] sm:$0xff] %vm736_vm4, %v1981_v27 }
0x170c   :  { %v3329_v57 = vpop.eup %3328  ;;  %v1983_v0 = vpop.permute.xlu1 %1982 }
0x170d   :  { %1987 = vst.msk [vmem:[#allocation2 + $0x8] sm:$0xff] %vm736_vm4, %v1983_v0  ;;  %v2326_v38 = vsel %vm1641_vm7, %v3329_v57, 0.0 }
0x170e   :  { %2327 = vadd.xlane.f32.xlu0 %v2326_v38 }
0x170f   :  { %v3331_v8 = vpop.eup %3330 }
0x1710   :  { %v2209_v10 = vpop.permute.xlu1 %2208  ;;  %v2329_v1 = vsel %vm1641_vm7, %v3331_v8, 0.0 }
0x1711   :  { %2213 = vst.msk [vmem:[#allocation2 + $0x8] sm:$0xff] %vm967_vm5, %v2209_v10 }
0x1712   :  { %2330 = vadd.xlane.f32.xlu0 %v2329_v1 }
0x1728   :  { %2338 = vrot.lane.b32.xlu0 %v3922_v54, %s4242_s18 }
0x172c   :  { %2206 = vrot.lane.b32.xlu0 %v2152_v40, %s4244_s4 }
0x179b   :  { %v2328_v12 = vpop.xlane.xlu0 %2327 }
0x179c   :  { %3332 = vrcp.f32 %v2328_v12  ;;  %v4105_v12 = vld [vmem:[%s4233_s27] sm:$0xf] }
0x179f   :  { %v2331_v13 = vpop.xlane.xlu0 %2330 }
0x17a0   :  { %3334 = vrcp.f32 %v2331_v13  ;;  %v2542_v13 = vrot.slane %v4105_v12, %v2535_v11 }
0x17a3   :  { %v2339_v16 = vpop.permute.xlu0 %2338 }
0x17a4   :  { %3190 = vmatpush3.bf16.msra.mxu0 %v2339_v16 }
0x17a5   :  { %3201 = vmatprep.subr.bf16.mxu0 %v3398_v15 }
0x17a6   :  { %v3333_v17 = vpop.eup %3332 }
0x17a7   :  { %v2334_v50 = vmul.f32 %v3333_v17, %v3329_v57  ;;  %v2207_v56 = vpop.permute.xlu0 %2206  ;;  %v4099_v57 = vld [vmem:[%s4232_s10] sm:$0xf] }
0x17a8   :  { %2212 = vst.msk [vmem:[#allocation2] sm:$0xff] %vm967_vm5, %v2207_v56  ;;  %v2536_v0 = vrot.slane %v4099_v57, %v2535_v11 }
0x17a9   :  { %v2336_v18 = vpack.c.bf16 %v2334_v50, %v2334_v50 }
0x17aa   :  { %v3335_v19 = vpop.eup %3334 }
0x17ab   :  { %v2335_v20 = vmul.f32 %v3335_v19, %v3331_v8  ;;  %3192 = vmatmul.mubr.msk.bf16.vlgmr.msra.gmra.mrb[68].mxu0 %vm1641_vm7, %v2336_v18  ;;  %v3260_v18 = vld [vmem:[%s4196_s23] sm:$0xff]   ;;  %v3261_v19 = vld [vmem:[%s4196_s23 + $0x8] sm:$0xff]  }
0x17ac   :  { %3205 = vmatprep.mubr.msk.bf16.mxu0 %vm3399_vm1, %v3398_v15  ;;  %3202 = vmatpush3.bf16.msra.mxu0 %v3256_v9  ;;  %v2856_v9 = vld [vmem:[%s4195_s22] ss:$0 sm:$0xff] }
0x17ad   :  { %v2337_v54 = vpack.c.bf16 %v2335_v20, %v2335_v20  ;;  %3203 = vmatprep.subr.bf16.mxu0 %v3398_v15  ;;  %v3262_v20 = vld [vmem:[%s4196_s23 + $0x10] sm:$0xff]  }
0x17af   :  { %3198 = vmatmul.mubr.msk.bf16.vlgmr.msra.gmra.mrb[76].mxu1 %vm1641_vm7, %v2337_v54  ;;  %v3263_v54 = vld [vmem:[%s4196_s23 + $0x18] sm:$0xff]  }
0x17b0   :  { %3213 = vmatprep.mubr.msk.bf16.mxu1 %vm3399_vm1, %v3398_v15  ;;  %3204 = vmatpush3.bf16.msra.mxu0 %v3257_v7 }
0x17b1   :  { %3217 = vmatprep.subr.bf16.mxu0 %v3398_v15  ;;  %3210 = vmatpush3.bf16.msra.mxu1 %v3258_v37 }
0x17b2   :  { %3211 = vmatprep.subr.bf16.mxu1 %v3398_v15 }
0x17b5   :  { %3212 = vmatpush3.bf16.msra.mxu1 %v3259_v58 }
0x187e   :  { %v2378_v21 = vpop.f32.mrb[68].mxu0 }
0x187f   :  { %2432 = vrot.lane.b32.xlu0 %v2378_v21, %s4245_s7  ;;  %v3193_v5 = vpop.f32.mrb[69].mxu0 }
0x1880   :  { %v2381_v22 = vpop.f32.mrb[70].mxu0 }
0x1881   :  { %v3194_v24 = vpop.f32.mrb[71].mxu0 }
0x1882   :  { %v2424_v25 = vpop.f32.mrb[76].mxu1 }
0x1883   :  { %2434 = vrot.lane.b32.xlu1 %v2424_v25, %s4245_s7  ;;  %v3199_v28 = vpop.f32.mrb[77].mxu1 }
0x1884   :  { %v2427_v30 = vpop.f32.mrb[78].mxu1 }
0x1885   :  { %v3200_v31 = vpop.f32.mrb[79].mxu1 }
0x18f1   :  { %v2433_v32 = vpop.permute.xlu0 %2432 }
0x18f2   :  { %2438 = vst.msk [vmem:[#allocation2] sm:$0xff] %vm1198_vm6, %v2433_v32 }
0x18f5   :  { %v2435_v33 = vpop.permute.xlu1 %2434 }
0x18f6   :  { %2439 = vst.msk [vmem:[#allocation2 + $0x8] sm:$0xff] %vm1198_vm6, %v2435_v33 }
0x18f9   :  { %v2440_v4 = vld [vmem:[#allocation2] sm:$0xff] }
0x18fd   :  { %v2441_v34 = vld [vmem:[#allocation2 + $0x8] sm:$0xff] }
0x18fe   :  { %v2442_v14 = vpack.c.bf16 %v2441_v34, %v2440_v4 }
0x1900   :  { %3206 = vmatmul.mubr.msk.bf16.vlgmr.msra.gmra.mrb[72].mxu0 %vm101_vm0, %v2442_v14 }
0x1901   :  { %3225 = vmatprep.mubr.msk.bf16.mxu0 %vm3399_vm1, %v3398_v15  ;;  %3218 = vmatpush3.bf16.msra.mxu0 %v3260_v18 }
0x1902   :  { %3219 = vmatprep.subr.bf16.mxu0 %v3398_v15 }
0x1905   :  { %3220 = vmatpush3.bf16.msra.mxu0 %v3261_v19 }
0x1906   :  { %3221 = vmatprep.subr.bf16.mxu0 %v3398_v15 }
0x1909   :  { %3222 = vmatpush3.bf16.msra.mxu0 %v3262_v20 }
0x190a   :  { %3223 = vmatprep.subr.bf16.mxu0 %v3398_v15 }
0x190d   :  { %3224 = vmatpush3.bf16.msra.mxu0 %v3263_v54 }
0x19d3   :  { %v2498_v36 = vpop.f32.mrb[72].mxu0 }
0x19d4   :  { %v2499_v39 = vadd.f32 %v2852_v35, %v2498_v36  ;;  %v3207_v40 = vpop.f32.mrb[73].mxu0 }
0x19d5   :  { %v2501_v41 = vpop.f32.mrb[74].mxu0 }
0x19d6   :  { %v4075_v51 = vadd.f32 %v2499_v39, %v3817_v60  ;;  %v2502_v42 = vadd.f32 %v2852_v35, %v2501_v41  ;;  %v3208_v43 = vpop.f32.mrb[75].mxu0 }
0x19d8   :  { %v4078_v44 = vadd.f32 %v2502_v42, %v3820_v63  ;;  %v2507_v45 = vsel %vm101_vm0, %v4075_v51, 0.0 }
0x19d9   :  { %2508 = vadd.xlane.f32.xlu0 %v2507_v45 }
0x19da   :  { %v2510_v46 = vsel %vm101_vm0, %v4078_v44, 0.0 }
0x19db   :  { %2511 = vadd.xlane.f32.xlu1 %v2510_v46 }
0x1a66   :  { %v2509_v47 = vpop.xlane.xlu0 %2508 }
0x1a67   :  { %v2513_v48 = vmul.f32 0.03125, %v2509_v47 }
0x1a68   :  { %v2512_v49 = vpop.xlane.xlu1 %2511 }
0x1a69   :  { %v2515_v52 = vsub.f32 %v4075_v51, %v2513_v48  ;;  %v2514_v60 = vmul.f32 0.03125, %v2512_v49  ;;  %v2865_v49 = vld [vmem:[%s4197_s24] ss:$0 sm:$0xff]  ;;  %s3410_s24 = smov [#allocation3]  }
0x1a6a   :  { %s2767_s29 = sshll.u32 %s3410_s24, 4  ;;  %s2768_s29 = int_to_ptr.vmem [resolvable:$true] %s2767_s29 }
0x1a6b   :  { %v2516_v53 = vsub.f32 %v4078_v44, %v2514_v60  ;;  %v2517_v55 = vmul.f32 %v2515_v52, %v2515_v52  ;;  %s3350_s8 = scalar_lea.vmem %s2768_s29, 256  ;;  %p3355_p1 = scmp.lt.s32.totalorder %s2768_s29, %s2768_s29 }
0x1a6c   :  { %p3351_p0 = scmp.ne.s32.totalorder %s2768_s29, %s3350_s8  ;;  %p3356_p2 = scmp.lt.s32.totalorder %s3350_s8, %s3350_s8 }
0x1a6d   :  { %v2519_v63 = vsel %vm101_vm0, %v2517_v55, 0.0  ;;  %v2518_v26 = vmul.f32 %v2516_v53, %v2516_v53 }
0x1a6e   :  { %2520 = vadd.xlane.f32.xlu0 %v2519_v63  ;;  %p3357_p3 = por %p3356_p2, %p3355_p1 }
0x1a6f   :  { %v2522_v29 = vsel %vm101_vm0, %v2518_v26, 0.0 }
0x1a70   :  { %p3358_p4 = pnand %p3357_p3, %p3351_p0 }
0x1a72   :  { %2523 = vadd.xlane.f32.xlu0 %v2522_v29 }
0x1afb   :  { %v2521_v59 = vpop.xlane.xlu0 %2520 }
0x1afc   :  { %v2525_v61 = vmul.f32 0.03125, %v2521_v59 }
0x1afe   :  { %v2527_v62 = vadd.f32 1e-05, %v2525_v61 }
0x1aff   :  { %v2524_v2 = vpop.xlane.xlu0 %2523 }
0x1b00   :  { %3336 = vrsqrt.f32 %v2527_v62  ;;  %v2526_v3 = vmul.f32 0.03125, %v2524_v2 }
0x1b02   :  { %v2528_v6 = vadd.f32 1e-05, %v2526_v3 }
0x1b04   :  { %3338 = vrsqrt.f32 %v2528_v6 }
0x1b0a   :  { %v3337_v27 = vpop.eup %3336 }
0x1b0b   :  { %v2531_v38 = vmul.f32 %v3337_v27, %v2515_v52 }
0x1b0d   :  { %v2537_v10 = vadd.f32 %v2536_v0, %v2531_v38 }
0x1b0e   :  { %v3339_v8 = vpop.eup %3338 }
0x1b0f   :  { %v2532_v1 = vmul.f32 %v3339_v8, %v2516_v53  ;;  %v2543_v17 = vmul.f32 %v2542_v13, %v2537_v10 }
0x1b11   :  { %v2538_v16 = vadd.f32 %v2536_v0, %v2532_v1 }
0x1b13   :  { %v2544_v50 = vmul.f32 %v2542_v13, %v2538_v16 }
0x1b15   :  { %v2545_v56 = vpack.c.bf16 %v2544_v50, %v2543_v17 }
0x1b17   :  { %3214 = vmatmul.mubr.msk.bf16.vlgmr.msra.gmra.mrb[80].mxu1 %vm101_vm0, %v2545_v56 }
0x1bea   :  { %v2606_v7 = vpop.f32.mrb[80].mxu1 }
0x1beb   :  { %v2607_v21 = vadd.f32 %v2856_v9, %v2606_v7  ;;  %v3215_v5 = vpop.f32.mrb[81].mxu1 }
0x1bec   :  { %v2609_v22 = vpop.f32.mrb[82].mxu1 }
0x1bed   :  { %v2615_v24 = vmul.f32 0.044715, %v2607_v21  ;;  %v2610_v25 = vadd.f32 %v2856_v9, %v2609_v22  ;;  %v3216_v28 = vpop.f32.mrb[83].mxu1  ;;  %v2613_v41 = vmul.f32 0.5, %v2607_v21 }
0x1bef   :  { %v2617_v30 = vmul.f32 %v2615_v24, %v2607_v21  ;;  %v2616_v31 = vmul.f32 0.044715, %v2610_v25  ;;  %v2614_v42 = vmul.f32 0.5, %v2610_v25 }
0x1bf1   :  { %v2619_v32 = vmul.f32 %v2617_v30, %v2607_v21  ;;  %v2618_v33 = vmul.f32 %v2616_v31, %v2610_v25 }
0x1bf3   :  { %v2621_v4 = vadd.f32 %v2619_v32, %v2607_v21  ;;  %v2620_v34 = vmul.f32 %v2618_v33, %v2610_v25 }
0x1bf5   :  { %v2623_v14 = vmul.f32 0.7978846, %v2621_v4  ;;  %v2622_v15 = vadd.f32 %v2620_v34, %v2610_v25 }
0x1bf7   :  { %3340 = vtanh.f32 %v2623_v14  ;;  %v2624_v35 = vmul.f32 0.7978846, %v2622_v15 }
0x1bf9   :  { %3342 = vtanh.f32 %v2624_v35 }
0x1c01   :  { %v3341_v36 = vpop.eup %3340 }
0x1c02   :  { %v2627_v39 = vadd.f32 1.0, %v3341_v36 }
0x1c03   :  { %v3343_v40 = vpop.eup %3342 }
0x1c04   :  { %v2628_v43 = vadd.f32 1.0, %v3343_v40  ;;  %v2629_v45 = vmul.f32 %v2627_v39, %v2613_v41 }
0x1c06   :  { %v2630_v46 = vmul.f32 %v2628_v43, %v2614_v42 }
0x1c08   :  { %v2631_v47 = vpack.c.bf16 %v2630_v46, %v2629_v45 }
0x1c0a   :  { %3226 = vmatmul.mubr.msk.bf16.vlgmr.msra.gmra.mrb[76].mxu0 %vm2664_vm8, %v2631_v47 }
0x1cdd   :  { %v2702_v48 = vpop.f32.mrb[76].mxu0 }
0x1cde   :  { %v2709_v52 = vadd.f32 %v2702_v48, %v4075_v51  ;;  %v3227_v60 = vpop.f32.mrb[77].mxu0 }
0x1cdf   :  { %v2705_v53 = vpop.f32.mrb[78].mxu0 }
0x1ce0   :  { %v2718_v55 = vadd.f32 %v2865_v49, %v2709_v52  ;;  %v2710_v63 = vadd.f32 %v2705_v53, %v4078_v44  ;;  %v3228_v26 = vpop.f32.mrb[79].mxu0 }
0x1ce2   :  { %2720 = vst.msk [vmem:[#allocation3] sm:$0xff] %vm101_vm0, %v2718_v55  ;;  %v2719_v29 = vadd.f32 %v2865_v49, %v2710_v63  ;;  %v2722_v37 = vsel %vm101_vm0, %v2718_v55, 0.0 }
0x1ce3   :  { %2723 = vadd.xlane.f32.xlu0 %v2722_v37 }
0x1ce4   :  { %2721 = vst.msk [vmem:[#allocation3 + $0x8] sm:$0xff] %vm101_vm0, %v2719_v29  ;;  %v2725_v58 = vsel %vm101_vm0, %v2719_v29, 0.0 }
0x1ce5   :  { %2726 = vadd.xlane.f32.xlu1 %v2725_v58 }
0x1d70   :  { %v2724_v59 = vpop.xlane.xlu0 %2723 }
0x1d71   :  { %v2728_v61 = vmul.f32 0.03125, %v2724_v59 }
0x1d72   :  { %v2727_v51 = vpop.xlane.xlu1 %2726 }
0x1d73   :  { %v2730_v62 = vsub.f32 %v2718_v55, %v2728_v61  ;;  %v2729_v2 = vmul.f32 0.03125, %v2727_v51 }
0x1d75   :  { %v2731_v3 = vsub.f32 %v2719_v29, %v2729_v2  ;;  %v2732_v6 = vmul.f32 %v2730_v62, %v2730_v62 }
0x1d77   :  { %v2734_v44 = vsel %vm101_vm0, %v2732_v6, 0.0  ;;  %v2733_v11 = vmul.f32 %v2731_v3, %v2731_v3 }
0x1d78   :  { %2735 = vadd.xlane.f32.xlu0 %v2734_v44 }
0x1d79   :  { %v2737_v27 = vsel %vm101_vm0, %v2733_v11, 0.0 }
0x1d7a   :  { %2738 = vadd.xlane.f32.xlu1 %v2737_v27 }
0x1d7b   :  { %3361 = shalt.err (!%p3358_p4)
}
0x1d7c   :  { %s3362_s7 = scalar_lea.hbm %s4198_s25, 256 }
0x1d7d   :  { %p3363_p5 = scmp.ne.s32.totalorder %s4198_s25, %s3362_s7  ;;  %p3366_p6 = scmp.lt.u32.totalorder %s3362_s7, %s4198_s25 }
0x1d7f   :  { %p3368_p7 = pnand %p3366_p6, %p3363_p5 }
0x1d81   :  { %3371 = shalt.err (!%p3368_p7)
}
0x1d82   :  { %s3411_s9 = smov 128   ;;  %v2750_v16 = vsub.s32 3, %v3580_v23 }
0x1d83   :  { %2773 = dma.vmem_to_hbm [thread:$0]  %s2768_s29, 256, %s4198_s25, [#allocation4], %s3411_s9, %s3411_s9, %s4243_s5  }
0x1d84   :  { %v2751_v17 = vrot.slane %v4099_v57, %v2750_v16  ;;  %v2757_v18 = vrot.slane %v4105_v12, %v2750_v16  ;;  %s3412_s25 = smov [#allocation5]  }
0x1d85   :  { %s2779_s2 = sshll.u32 %s3412_s25, 4  ;;  %s2780_s2 = int_to_ptr.vmem [resolvable:$true] %s2779_s2 }
0x1d86   :  { %s3372_s21 = scalar_lea.vmem %s2780_s2, 256  ;;  %p3377_p9 = scmp.lt.s32.totalorder %s2780_s2, %s2780_s2 }
0x1d87   :  { %p3373_p8 = scmp.ne.s32.totalorder %s2780_s2, %s3372_s21  ;;  %p3378_p10 = scmp.lt.s32.totalorder %s3372_s21, %s3372_s21 }
0x1d89   :  { %p3379_p11 = por %p3378_p10, %p3377_p9 }
0x1d8b   :  { %p3380_p12 = pnand %p3379_p11, %p3373_p8 }
0x1e05   :  { %v2736_v0 = vpop.xlane.xlu0 %2735 }
0x1e06   :  { %v2740_v38 = vmul.f32 0.03125, %v2736_v0 }
0x1e07   :  { %v2739_v8 = vpop.xlane.xlu1 %2738 }
0x1e08   :  { %v2742_v10 = vadd.f32 1e-05, %v2740_v38  ;;  %v2741_v1 = vmul.f32 0.03125, %v2739_v8 }
0x1e0a   :  { %3344 = vrsqrt.f32 %v2742_v10  ;;  %v2743_v13 = vadd.f32 1e-05, %v2741_v1 }
0x1e0c   :  { %3346 = vrsqrt.f32 %v2743_v13 }
0x1e14   :  { %v3345_v50 = vpop.eup %3344 }
0x1e15   :  { %v2746_v56 = vmul.f32 %v3345_v50, %v2730_v62 }
0x1e16   :  { %v3347_v19 = vpop.eup %3346 }
0x1e17   :  { %v2747_v20 = vmul.f32 %v3347_v19, %v2731_v3  ;;  %v2752_v54 = vadd.f32 %v2751_v17, %v2746_v56 }
0x1e19   :  { %v2753_v9 = vadd.f32 %v2751_v17, %v2747_v20  ;;  %v2758_v7 = vmul.f32 %v2757_v18, %v2752_v54 }
0x1e1b   :  { %v2759_v21 = vmul.f32 %v2757_v18, %v2753_v9  ;;  %2760 = vst.msk [vmem:[#allocation5] sm:$0xff] %vm101_vm0, %v2758_v7 }
0x1e1d   :  { %2761 = vst.msk [vmem:[#allocation5 + $0x8] sm:$0xff] %vm101_vm0, %v2759_v21 }
0x1e1e   :  { %3383 = shalt.err (!%p3380_p12)
}
0x1e1f   :  { %s3384_s6 = scalar_lea.hbm %s4199_s26, 256 }
0x1e20   :  { %p3385_p13 = scmp.ne.s32.totalorder %s4199_s26, %s3384_s6  ;;  %p3388_p0 = scmp.lt.u32.totalorder %s3384_s6, %s4199_s26 }
0x1e22   :  { %p3390_p1 = pnand %p3388_p0, %p3385_p13 }
0x1e24   :  { %3393 = shalt.err (!%p3390_p1)
}
0x1e25   :  { %2785 = dma.vmem_to_hbm [thread:$0]  %s2780_s2, 256, %s4199_s26, [#allocation6], %s3411_s9, %s3411_s9, %s4243_s5  }
0x1e26   :  { %3394 = dma.done.wait [#allocation4], 256  }
0x1e27   :  { %3395 = vsyncadd [#allocation4], 4294967040 }
0x1e28   :  { %3396 = dma.done.wait [#allocation6], 256  }
0x1e29   :  { %3397 = vsyncadd [#allocation6], 4294967040 }
0x1e2a   :  { %2792 = vsyncpa [#allocation4], 1 }
0x1e2b   :  { %2793 = vsyncpa [#allocation6], 1 }

// kernel: transformer_decoder_forward.2
= control target key start
LH: loop header
LB: loop body
LE: loop exit
PB: predicated region body
PF: predicated region fallthrough
CT: control target
= control target key end

     0   :  { %s4657_s0 = inlined_call_operand.vmem [shape: f32[2,8,32], index: 0, kind: input, shape index: {}]   ;;  %s4658_s1 = inlined_call_operand.vmem [shape: f32[2,16,32], index: 1, kind: input, shape index: {}]   ;;  %s4659_s2 = inlined_call_operand.vmem [shape: f32[2,8,32], index: 2, kind: input, shape index: {}]   ;;  %s4660_s3 = inlined_call_operand.vmem [shape: f32[2,16,32], index: 3, kind: input, shape index: {}]   ;;  %s4661_s4 = inlined_call_operand.vmem [shape: f32[2,8,8], index: 4, kind: input, shape index: {}]   ;;  %s4662_s5 = inlined_call_operand.hbm [shape: f32[4,32], index: 5, kind: input, shape index: {}]   ;;  %s4663_s6 = inlined_call_operand.hbm [shape: f32[4,32], index: 6, kind: input, shape index: {}]   ;;  %s4664_s7 = inlined_call_operand.vmem [shape: bf16[32,64], index: 7, kind: input, shape index: {}]   ;;  %s4665_s8 = inlined_call_operand.vmem [shape: f32[1,64], index: 8, kind: input, shape index: {}]   ;;  %s4666_s9 = inlined_call_operand.vmem [shape: bf16[32,32], index: 9, kind: input, shape index: {}]   ;;  %s4667_s10 = inlined_call_operand.vmem [shape: f32[1,32], index: 10, kind: input, shape index: {}]   ;;  %s4668_s11 = inlined_call_operand.hbm [shape: bf16[32,32], index: 11, kind: input, shape index: {}]   ;;  %s4669_s12 = inlined_call_operand.vmem [shape: f32[1,32], index: 12, kind: input, shape index: {}]   ;;  %s4670_s13 = inlined_call_operand.hbm [shape: bf16[32,32], index: 13, kind: input, shape index: {}]   ;;  %s4671_s14 = inlined_call_operand.hbm [shape: f32[1,32], index: 14, kind: input, shape index: {}]   ;;  %s4672_s15 = inlined_call_operand.hbm [shape: bf16[32,32], index: 15, kind: input, shape index: {}]   ;;  %s4673_s16 = inlined_call_operand.hbm [shape: f32[1,32], index: 16, kind: input, shape index: {}]   ;;  %s4674_s17 = inlined_call_operand.hbm [shape: bf16[32,32], index: 17, kind: input, shape index: {}]   ;;  %s4675_s18 = inlined_call_operand.hbm [shape: f32[1,32], index: 18, kind: input, shape index: {}]   ;;  %s4676_s19 = inlined_call_operand.hbm [shape: bf16[32,32], index: 19, kind: input, shape index: {}]   ;;  %s4677_s20 = inlined_call_operand.hbm [shape: f32[1,32], index: 20, kind: input, shape index: {}]   ;;  %s4678_s21 = inlined_call_operand.hbm [shape: bf16[32,64], index: 21, kind: input, shape index: {}]   ;;  %s4679_s22 = inlined_call_operand.hbm [shape: f32[1,64], index: 22, kind: input, shape index: {}]   ;;  %s4680_s23 = inlined_call_operand.vmem [shape: bf16[64,32], index: 23, kind: input, shape index: {}]   ;;  %s4681_s24 = inlined_call_operand.hbm [shape: f32[1,32], index: 24, kind: input, shape index: {}]   ;;  %s4682_s25 = inlined_call_operand.vmem [shape: f32[2,8,32], index: 25, kind: output, shape index: {}]  }
   0x1   :  { %4692 = sst [smem:[#allocation33_spill]] %s4657_s0 }
   0x2   :  { %4693 = sst [smem:[#allocation34_spill]] %s4658_s1 }
   0x3   :  { %4694 = sst [smem:[#allocation35_spill]] %s4659_s2 }
   0x4   :  { %4695 = sst [smem:[#allocation36_spill]] %s4660_s3 }
   0x5   :  { %4696 = sst [smem:[#allocation37_spill]] %s4661_s4 }
   0x6   :  { %4697 = sst [smem:[#allocation38_spill]] %s4662_s5 }
   0x7   :  { %4698 = sst [smem:[#allocation39_spill]] %s4663_s6 }
   0x8   :  { %4699 = sst [smem:[#allocation40_spill]] %s4664_s7 }
   0x9   :  { %4700 = sst [smem:[#allocation41_spill]] %s4665_s8 }
   0xa   :  { %4701 = sst [smem:[#allocation42_spill]] %s4666_s9 }
   0xb   :  { %30 = vsyncpa [#allocation4], 0 }
   0xc   :  { %31 = vsyncpa [#allocation6], 0 }
   0xd   :  { %32 = vsyncpa [#allocation9], 0 }
   0xe   :  { %33 = vsyncpa [#allocation12], 0 }
   0xf   :  { %34 = vsyncpa [#allocation15], 0 }
  0x10   :  { %35 = vsyncpa [#allocation18], 0 }
  0x11   :  { %36 = vsyncpa [#allocation21], 0 }
  0x12   :  { %37 = vsyncpa [#allocation24], 0  ;;  %s3793_s29 = smov [#allocation5]   ;;  %s4702_s7 = sld [smem:[#allocation39_spill]] }
  0x13   :  { %s64_s2 = sshll.u32 %s3793_s29, 4  ;;  %s65_s2 = int_to_ptr.vmem [resolvable:$true] %s64_s2 }
  0x18   :  { %s3469_s3 = scalar_lea.hbm %s4702_s7, 64 }
  0x19   :  { %p3470_p0 = scmp.ne.s32.totalorder %s4702_s7, %s3469_s3  ;;  %p3473_p1 = scmp.lt.u32.totalorder %s3469_s3, %s4702_s7 }
  0x1b   :  { %p3475_p2 = pnand %p3473_p1, %p3470_p0 }
  0x1d   :  { %3478 = shalt.err (!%p3475_p2)
}
  0x1e   :  { %s3479_s4 = scalar_lea.vmem %s65_s2, 64  ;;  %p3484_p4 = scmp.lt.s32.totalorder %s65_s2, %s65_s2 }
  0x1f   :  { %p3480_p3 = scmp.ne.s32.totalorder %s65_s2, %s3479_s4  ;;  %p3485_p5 = scmp.lt.s32.totalorder %s3479_s4, %s3479_s4 }
  0x21   :  { %p3486_p6 = por %p3485_p5, %p3484_p4 }
  0x23   :  { %p3487_p7 = pnand %p3486_p6, %p3480_p3 }
  0x25   :  { %3490 = shalt.err (!%p3487_p7)
}
  0x26   :  { %67 = dma.hbm_to_vmem [thread:$0]  %s4702_s7, 64, %s65_s2, [#allocation6]  }
  0x27   :  { %s3794_s5 = smov [#allocation8]   ;;  %s3795_s29 = smov [#allocation11]  }
  0x28   :  { %s95_s0 = sshll.u32 %s3794_s5, 4  ;;  %s117_s6 = sshll.u32 %s3795_s29, 4  ;;  %s96_s0 = int_to_ptr.vmem [resolvable:$true] %s95_s0  ;;  %s118_s6 = int_to_ptr.vmem [resolvable:$true] %s117_s6 }
  0x29   :  { %s3491_s26 = scalar_lea.hbm %s4670_s13, 256 }
  0x2a   :  { %p3492_p8 = scmp.ne.s32.totalorder %s4670_s13, %s3491_s26  ;;  %p3495_p9 = scmp.lt.u32.totalorder %s3491_s26, %s4670_s13 }
  0x2c   :  { %p3497_p10 = pnand %p3495_p9, %p3492_p8 }
  0x2e   :  { %3500 = shalt.err (!%p3497_p10)
}
  0x2f   :  { %s3501_s2 = scalar_lea.vmem %s96_s0, 256  ;;  %p3506_p12 = scmp.lt.s32.totalorder %s96_s0, %s96_s0 }
  0x30   :  { %p3502_p11 = scmp.ne.s32.totalorder %s96_s0, %s3501_s2  ;;  %p3507_p13 = scmp.lt.s32.totalorder %s3501_s2, %s3501_s2 }
  0x32   :  { %p3508_p0 = por %p3507_p13, %p3506_p12 }
  0x34   :  { %p3509_p1 = pnand %p3508_p0, %p3502_p11 }
  0x36   :  { %3512 = shalt.err (!%p3509_p1)
}
  0x37   :  { %s3796_s7 = smov 64   ;;  %s3797_s28 = smov 4  }
  0x38   :  { %101 = dma.hbm_to_vmem [thread:$0]  %s4670_s13, 256, %s96_s0, [#allocation9], %s3796_s7, %s3796_s7, %s3797_s28  }
  0x39   :  { %s3513_s3 = scalar_lea.hbm %s4672_s15, 256 }
  0x3a   :  { %p3514_p2 = scmp.ne.s32.totalorder %s4672_s15, %s3513_s3  ;;  %p3517_p3 = scmp.lt.u32.totalorder %s3513_s3, %s4672_s15 }
  0x3c   :  { %p3519_p4 = pnand %p3517_p3, %p3514_p2 }
  0x3e   :  { %3522 = shalt.err (!%p3519_p4)
}
  0x3f   :  { %s3523_s4 = scalar_lea.vmem %s118_s6, 256  ;;  %p3528_p6 = scmp.lt.s32.totalorder %s118_s6, %s118_s6 }
  0x40   :  { %p3524_p5 = scmp.ne.s32.totalorder %s118_s6, %s3523_s4  ;;  %p3529_p7 = scmp.lt.s32.totalorder %s3523_s4, %s3523_s4 }
  0x42   :  { %p3530_p8 = por %p3529_p7, %p3528_p6 }
  0x44   :  { %p3531_p9 = pnand %p3530_p8, %p3524_p5 }
  0x46   :  { %3534 = shalt.err (!%p3531_p9)
}
  0x47   :  { %123 = dma.hbm_to_vmem [thread:$0]  %s4672_s15, 256, %s118_s6, [#allocation12], %s3796_s7, %s3796_s7, %s3797_s28  }
  0x48   :  { %s3798_s2 = smov [#allocation14]   ;;  %s3799_s5 = smov [#allocation17]  }
  0x49   :  { %s139_s9 = sshll.u32 %s3798_s2, 4  ;;  %s161_s29 = sshll.u32 %s3799_s5, 4  ;;  %s140_s9 = int_to_ptr.vmem [resolvable:$true] %s139_s9  ;;  %s162_s29 = int_to_ptr.vmem [resolvable:$true] %s161_s29 }
  0x4a   :  { %s3535_s26 = scalar_lea.hbm %s4674_s17, 256 }
  0x4b   :  { %p3536_p10 = scmp.ne.s32.totalorder %s4674_s17, %s3535_s26  ;;  %p3539_p11 = scmp.lt.u32.totalorder %s3535_s26, %s4674_s17 }
  0x4d   :  { %p3541_p12 = pnand %p3539_p11, %p3536_p10 }
  0x4f   :  { %3544 = shalt.err (!%p3541_p12)
}
  0x50   :  { %s3545_s15 = scalar_lea.vmem %s140_s9, 256  ;;  %p3550_p0 = scmp.lt.s32.totalorder %s140_s9, %s140_s9 }
  0x51   :  { %p3546_p13 = scmp.ne.s32.totalorder %s140_s9, %s3545_s15  ;;  %p3551_p1 = scmp.lt.s32.totalorder %s3545_s15, %s3545_s15 }
  0x53   :  { %p3552_p2 = por %p3551_p1, %p3550_p0 }
  0x55   :  { %p3553_p3 = pnand %p3552_p2, %p3546_p13 }
  0x57   :  { %3556 = shalt.err (!%p3553_p3)
}
  0x58   :  { %145 = dma.hbm_to_vmem [thread:$0]  %s4674_s17, 256, %s140_s9, [#allocation15], %s3796_s7, %s3796_s7, %s3797_s28  }
  0x59   :  { %s3557_s5 = scalar_lea.hbm %s4676_s19, 256 }
  0x5a   :  { %p3558_p4 = scmp.ne.s32.totalorder %s4676_s19, %s3557_s5  ;;  %p3561_p5 = scmp.lt.u32.totalorder %s3557_s5, %s4676_s19 }
  0x5c   :  { %p3563_p6 = pnand %p3561_p5, %p3558_p4 }
  0x5e   :  { %3566 = shalt.err (!%p3563_p6)
}
  0x5f   :  { %s3567_s8 = scalar_lea.vmem %s162_s29, 256  ;;  %p3572_p8 = scmp.lt.s32.totalorder %s162_s29, %s162_s29 }
  0x60   :  { %p3568_p7 = scmp.ne.s32.totalorder %s162_s29, %s3567_s8  ;;  %p3573_p9 = scmp.lt.s32.totalorder %s3567_s8, %s3567_s8 }
  0x62   :  { %p3574_p10 = por %p3573_p9, %p3572_p8 }
  0x64   :  { %p3575_p11 = pnand %p3574_p10, %p3568_p7 }
  0x66   :  { %3578 = shalt.err (!%p3575_p11)
}
  0x67   :  { %167 = dma.hbm_to_vmem [thread:$0]  %s4676_s19, 256, %s162_s29, [#allocation18], %s3796_s7, %s3796_s7, %s3797_s28  }
  0x68   :  { %s3800_s27 = smov [#allocation20]   ;;  %s3801_s15 = smov [#allocation3]  }
  0x69   :  { %s183_s4 = sshll.u32 %s3800_s27, 4  ;;  %s54_s6 = sshll.u32 %s3801_s15, 4  ;;  %s184_s4 = int_to_ptr.vmem [resolvable:$true] %s183_s4  ;;  %s55_s6 = int_to_ptr.vmem [resolvable:$true] %s54_s6 }
  0x6a   :  { %s3579_s2 = scalar_lea.hbm %s4678_s21, 256 }
  0x6b   :  { %p3580_p12 = scmp.ne.s32.totalorder %s4678_s21, %s3579_s2  ;;  %p3583_p13 = scmp.lt.u32.totalorder %s3579_s2, %s4678_s21 }
  0x6d   :  { %p3585_p0 = pnand %p3583_p13, %p3580_p12 }
  0x6f   :  { %3588 = shalt.err (!%p3585_p0)
}
  0x70   :  { %s3589_s19 = scalar_lea.vmem %s184_s4, 256  ;;  %p3594_p2 = scmp.lt.s32.totalorder %s184_s4, %s184_s4 }
  0x71   :  { %p3590_p1 = scmp.ne.s32.totalorder %s184_s4, %s3589_s19  ;;  %p3595_p3 = scmp.lt.s32.totalorder %s3589_s19, %s3589_s19 }
  0x73   :  { %p3596_p4 = por %p3595_p3, %p3594_p2 }
  0x75   :  { %p3597_p5 = pnand %p3596_p4, %p3590_p1 }
  0x77   :  { %3600 = shalt.err (!%p3597_p5)
}
  0x78   :  { %189 = dma.hbm_to_vmem [thread:$0]  %s4678_s21, 256, %s184_s4, [#allocation21], %s3796_s7, %s3796_s7, %s3797_s28  }
  0x79   :  { %s4703_s9 = sld [smem:[#allocation38_spill]] }
  0x7f   :  { %s3601_s27 = scalar_lea.hbm %s4703_s9, 64 }
  0x80   :  { %p3602_p6 = scmp.ne.s32.totalorder %s4703_s9, %s3601_s27  ;;  %p3605_p7 = scmp.lt.u32.totalorder %s3601_s27, %s4703_s9 }
  0x82   :  { %p3607_p8 = pnand %p3605_p7, %p3602_p6 }
  0x84   :  { %3610 = shalt.err (!%p3607_p8)
}
  0x85   :  { %s3611_s5 = scalar_lea.vmem %s55_s6, 64  ;;  %p3616_p10 = scmp.lt.s32.totalorder %s55_s6, %s55_s6 }
  0x86   :  { %p3612_p9 = scmp.ne.s32.totalorder %s55_s6, %s3611_s5  ;;  %p3617_p11 = scmp.lt.s32.totalorder %s3611_s5, %s3611_s5 }
  0x88   :  { %p3618_p12 = por %p3617_p11, %p3616_p10 }
  0x8a   :  { %p3619_p13 = pnand %p3618_p12, %p3612_p9 }
  0x8c   :  { %3622 = shalt.err (!%p3619_p13)
}
  0x8d   :  { %57 = dma.hbm_to_vmem [thread:$0]  %s4703_s9, 64, %s55_s6, [#allocation4]  }
  0x8e   :  { %s3802_s30 = smov [#allocation7]   ;;  %s3803_s26 = smov [#allocation10]  }
  0x8f   :  { %s81_s3 = sshll.u32 %s3802_s30, 4  ;;  %s108_s19 = sshll.u32 %s3803_s26, 4  ;;  %s82_s3 = int_to_ptr.vmem [resolvable:$true] %s81_s3  ;;  %s109_s19 = int_to_ptr.vmem [resolvable:$true] %s108_s19 }
  0x90   :  { %s3623_s8 = scalar_lea.hbm %s4668_s11, 256 }
  0x91   :  { %p3624_p0 = scmp.ne.s32.totalorder %s4668_s11, %s3623_s8  ;;  %p3627_p1 = scmp.lt.u32.totalorder %s3623_s8, %s4668_s11 }
  0x93   :  { %p3629_p2 = pnand %p3627_p1, %p3624_p0 }
  0x95   :  { %3632 = shalt.err (!%p3629_p2)
}
  0x96   :  { %s3633_s6 = scalar_lea.vmem %s82_s3, 256  ;;  %p3638_p4 = scmp.lt.s32.totalorder %s82_s3, %s82_s3 }
  0x97   :  { %p3634_p3 = scmp.ne.s32.totalorder %s82_s3, %s3633_s6  ;;  %p3639_p5 = scmp.lt.s32.totalorder %s3633_s6, %s3633_s6 }
  0x99   :  { %p3640_p6 = por %p3639_p5, %p3638_p4 }
  0x9b   :  { %p3641_p7 = pnand %p3640_p6, %p3634_p3 }
  0x9d   :  { %3644 = shalt.err (!%p3641_p7)
}
  0x9e   :  { %87 = dma.hbm_to_vmem [thread:$0]  %s4668_s11, 256, %s82_s3, [#allocation6], %s3796_s7, %s3796_s7, %s3797_s28  }
  0x9f   :  { %s3645_s21 = scalar_lea.hbm %s4671_s14, 16 }
  0xa0   :  { %p3646_p8 = scmp.ne.s32.totalorder %s4671_s14, %s3645_s21  ;;  %p3649_p9 = scmp.lt.u32.totalorder %s3645_s21, %s4671_s14 }
  0xa2   :  { %p3651_p10 = pnand %p3649_p9, %p3646_p8 }
  0xa4   :  { %3654 = shalt.err (!%p3651_p10)
}
  0xa5   :  { %s3655_s1 = scalar_lea.vmem %s109_s19, 16  ;;  %s3659_s8 = scalar_lea.vmem %s109_s19, 32 }
  0xa6   :  { %p3656_p11 = scmp.ne.s32.totalorder %s109_s19, %s3655_s1  ;;  %p3660_p12 = scmp.lt.s32.totalorder %s109_s19, %s109_s19 }
  0xa7   :  { %p3661_p13 = scmp.lt.s32.totalorder %s3659_s8, %s3655_s1 }
  0xa9   :  { %p3662_p0 = por %p3661_p13, %p3660_p12 }
  0xab   :  { %p3663_p1 = pnand %p3662_p0, %p3656_p11 }
  0xad   :  { %3666 = shalt.err (!%p3663_p1)
}
  0xae   :  { %111 = dma.hbm_to_vmem [thread:$0]  %s4671_s14, 16, %s109_s19, [#allocation9]  }
  0xaf   :  { %s3804_s28 = smov [#allocation13]   ;;  %s3805_s17 = smov [#allocation16]  }
  0xb0   :  { %s130_s3 = sshll.u32 %s3804_s28, 4  ;;  %s152_s27 = sshll.u32 %s3805_s17, 4  ;;  %s131_s3 = int_to_ptr.vmem [resolvable:$true] %s130_s3  ;;  %s153_s27 = int_to_ptr.vmem [resolvable:$true] %s152_s27 }
  0xb1   :  { %s3667_s6 = scalar_lea.hbm %s4673_s16, 16 }
  0xb2   :  { %p3668_p2 = scmp.ne.s32.totalorder %s4673_s16, %s3667_s6  ;;  %p3671_p3 = scmp.lt.u32.totalorder %s3667_s6, %s4673_s16 }
  0xb4   :  { %p3673_p4 = pnand %p3671_p3, %p3668_p2 }
  0xb6   :  { %3676 = shalt.err (!%p3673_p4)
}
  0xb7   :  { %s3677_s14 = scalar_lea.vmem %s131_s3, 16  ;;  %s3681_s19 = scalar_lea.vmem %s131_s3, 32 }
  0xb8   :  { %p3678_p5 = scmp.ne.s32.totalorder %s131_s3, %s3677_s14  ;;  %p3682_p6 = scmp.lt.s32.totalorder %s131_s3, %s131_s3 }
  0xb9   :  { %p3683_p7 = scmp.lt.s32.totalorder %s3681_s19, %s3677_s14 }
  0xbb   :  { %p3684_p8 = por %p3683_p7, %p3682_p6 }
  0xbd   :  { %p3685_p9 = pnand %p3684_p8, %p3678_p5 }
  0xbf   :  { %3688 = shalt.err (!%p3685_p9)
}
  0xc0   :  { %133 = dma.hbm_to_vmem [thread:$0]  %s4673_s16, 16, %s131_s3, [#allocation12]  }
  0xc1   :  { %s3689_s29 = scalar_lea.hbm %s4675_s18, 16 }
  0xc2   :  { %p3690_p10 = scmp.ne.s32.totalorder %s4675_s18, %s3689_s29  ;;  %p3693_p11 = scmp.lt.u32.totalorder %s3689_s29, %s4675_s18 }
  0xc4   :  { %p3695_p12 = pnand %p3693_p11, %p3690_p10 }
  0xc6   :  { %3698 = shalt.err (!%p3695_p12)
}
  0xc7   :  { %s3699_s28 = scalar_lea.vmem %s153_s27, 16  ;;  %s3703_s17 = scalar_lea.vmem %s153_s27, 32 }
  0xc8   :  { %p3700_p13 = scmp.ne.s32.totalorder %s153_s27, %s3699_s28  ;;  %p3704_p0 = scmp.lt.s32.totalorder %s153_s27, %s153_s27 }
  0xc9   :  { %p3705_p1 = scmp.lt.s32.totalorder %s3703_s17, %s3699_s28 }
  0xcb   :  { %p3706_p2 = por %p3705_p1, %p3704_p0 }
  0xcd   :  { %p3707_p3 = pnand %p3706_p2, %p3700_p13 }
  0xcf   :  { %3710 = shalt.err (!%p3707_p3)
}
  0xd0   :  { %155 = dma.hbm_to_vmem [thread:$0]  %s4675_s18, 16, %s153_s27, [#allocation15]  }
  0xd1   :  { %s3806_s15 = smov [#allocation19]   ;;  %s3807_s6 = smov [#allocation22]  }
  0xd2   :  { %s174_s13 = sshll.u32 %s3806_s15, 4  ;;  %s196_s9 = sshll.u32 %s3807_s6, 4  ;;  %s175_s13 = int_to_ptr.vmem [resolvable:$true] %s174_s13  ;;  %s197_s9 = int_to_ptr.vmem [resolvable:$true] %s196_s9 }
  0xd3   :  { %s3711_s5 = scalar_lea.hbm %s4677_s20, 16 }
  0xd4   :  { %p3712_p4 = scmp.ne.s32.totalorder %s4677_s20, %s3711_s5  ;;  %p3715_p5 = scmp.lt.u32.totalorder %s3711_s5, %s4677_s20 }
  0xd6   :  { %p3717_p6 = pnand %p3715_p5, %p3712_p4 }
  0xd8   :  { %3720 = shalt.err (!%p3717_p6)
}
  0xd9   :  { %s3721_s18 = scalar_lea.vmem %s175_s13, 16  ;;  %s3725_s27 = scalar_lea.vmem %s175_s13, 32 }
  0xda   :  { %p3722_p7 = scmp.ne.s32.totalorder %s175_s13, %s3721_s18  ;;  %p3726_p8 = scmp.lt.s32.totalorder %s175_s13, %s175_s13 }
  0xdb   :  { %p3727_p9 = scmp.lt.s32.totalorder %s3725_s27, %s3721_s18 }
  0xdd   :  { %p3728_p10 = por %p3727_p9, %p3726_p8 }
  0xdf   :  { %p3729_p11 = pnand %p3728_p10, %p3722_p7 }
  0xe1   :  { %3732 = shalt.err (!%p3729_p11)
}
  0xe2   :  { %177 = dma.hbm_to_vmem [thread:$0]  %s4677_s20, 16, %s175_s13, [#allocation18]  }
  0xe3   :  { %s3733_s8 = scalar_lea.hbm %s4679_s22, 16 }
  0xe4   :  { %p3734_p12 = scmp.ne.s32.totalorder %s4679_s22, %s3733_s8  ;;  %p3737_p13 = scmp.lt.u32.totalorder %s3733_s8, %s4679_s22 }
  0xe6   :  { %p3739_p0 = pnand %p3737_p13, %p3734_p12 }
  0xe8   :  { %3742 = shalt.err (!%p3739_p0)
}
  0xe9   :  { %s3743_s16 = scalar_lea.vmem %s197_s9, 16  ;;  %s3747_s3 = scalar_lea.vmem %s197_s9, 32 }
  0xea   :  { %p3744_p1 = scmp.ne.s32.totalorder %s197_s9, %s3743_s16  ;;  %p3748_p2 = scmp.lt.s32.totalorder %s197_s9, %s197_s9 }
  0xeb   :  { %p3749_p3 = scmp.lt.s32.totalorder %s3747_s3, %s3743_s16 }
  0xed   :  { %p3750_p4 = por %p3749_p3, %p3748_p2 }
  0xef   :  { %p3751_p5 = pnand %p3750_p4, %p3744_p1 }
  0xf1   :  { %3754 = shalt.err (!%p3751_p5)
}
  0xf2   :  { %199 = dma.hbm_to_vmem [thread:$0]  %s4679_s22, 16, %s197_s9, [#allocation21]  }
  0xf3   :  { %s3808_s13 = smov [#allocation23]   ;;  %s3755_s5 = scalar_lea.hbm %s4681_s24, 16 }
  0xf4   :  { %s208_s6 = sshll.u32 %s3808_s13, 4  ;;  %p3756_p6 = scmp.ne.s32.totalorder %s4681_s24, %s3755_s5  ;;  %s209_s6 = int_to_ptr.vmem [resolvable:$true] %s208_s6 }
  0xf5   :  { %p3759_p7 = scmp.lt.u32.totalorder %s3755_s5, %s4681_s24 }
  0xf7   :  { %p3761_p8 = pnand %p3759_p7, %p3756_p6 }
  0xf9   :  { %3764 = shalt.err (!%p3761_p8)
}
  0xfa   :  { %s3765_s18 = scalar_lea.vmem %s209_s6, 16  ;;  %s3769_s22 = scalar_lea.vmem %s209_s6, 32 }
  0xfb   :  { %p3766_p9 = scmp.ne.s32.totalorder %s209_s6, %s3765_s18  ;;  %p3770_p10 = scmp.lt.s32.totalorder %s209_s6, %s209_s6 }
  0xfc   :  { %p3771_p11 = scmp.lt.s32.totalorder %s3769_s22, %s3765_s18 }
  0xfe   :  { %p3772_p12 = por %p3771_p11, %p3770_p10 }
 0x100   :  { %p3773_p13 = pnand %p3772_p12, %p3766_p9 }
 0x102   :  { %3776 = shalt.err (!%p3773_p13)
}
 0x103   :  { %211 = dma.hbm_to_vmem [thread:$0]  %s4681_s24, 16, %s209_s6, [#allocation24]  }
 0x104   :  { %3777 = dma.done.wait [#allocation4], 64  }
 0x105   :  { %3778 = vsyncadd [#allocation4], 4294967232 }
 0x106   :  { %3779 = dma.done.wait [#allocation6], 320  }
 0x107   :  { %3780 = vsyncadd [#allocation6], 4294966976 }
 0x108   :  { %3781 = dma.done.wait [#allocation9], 272  }
 0x109   :  { %3782 = vsyncadd [#allocation9], 4294967024 }
 0x10a   :  { %3783 = dma.done.wait [#allocation12], 272  }
 0x10b   :  { %3784 = vsyncadd [#allocation12], 4294967024 }
 0x10c   :  { %3785 = dma.done.wait [#allocation15], 272  }
 0x10d   :  { %3786 = vsyncadd [#allocation15], 4294967024 }
 0x10e   :  { %3787 = dma.done.wait [#allocation18], 272  }
 0x10f   :  { %3788 = vsyncadd [#allocation18], 4294967024 }
 0x110   :  { %3789 = dma.done.wait [#allocation21], 272  }
 0x111   :  { %3790 = vsyncadd [#allocation21], 4294967024 }
 0x112   :  { %3791 = dma.done.wait [#allocation24], 16  }
 0x113   :  { %3792 = vsyncadd [#allocation24], 4294967280  ;;  %vm271_vm0 = vcmask 261120   ;;  %s4704_s24 = sld [smem:[#allocation33_spill]]  ;;  %s4705_s7 = sld [smem:[#allocation40_spill]]  ;;  %v3809_v15 = vmov 0.0   ;;  %v299_v19 = vlaneseq }
 0x114   :  { %3071 = vmatprep.subr.bf16.mxu1 %v3809_v15  ;;  %vm3810_vm1 = vmmov 0   ;;  %3087 = vmatprep.subr.bf16.mxu0 %v3809_v15  ;;  %v4172_v26 = vld [vmem:[#allocation5] sm:$0xf]  ;;  %v4175_v29 = vld [vmem:[#allocation3] sm:$0xf]  ;;  %s4706_s20 = sld [smem:[#allocation35_spill]] }
 0x115   :  { %3075 = vmatprep.mubr.msk.bf16.mxu1 %vm3810_vm1, %v3809_v15  ;;  %3089 = vmatprep.mubr.msk.bf16.mxu0 %vm3810_vm1, %v3809_v15  ;;  %v4169_v23 = vshrl.u32 %v299_v19, 7  ;;  %s4707_s2 = sld [smem:[#allocation42_spill]]  ;;  %s4708_s4 = sld [smem:[#allocation41_spill]]  ;;  %v2908_v59 = vld [vmem:[%s4667_s10] ss:$0 sm:$0xff]  ;;  %vm459_vm2 = vcmask 64512  }
 0x116   :  { %s3811_s18 = smov 96   ;;  %vm584_vm3 = vcmask 1043456   ;;  %s4709_s30 = sld [smem:[#allocation37_spill]]  ;;  %vm906_vm4 = vcmask 130112   ;;  %vm1137_vm5 = vcmask 195712   ;;  %vm1368_vm6 = vcmask 261312  }
 0x117   :  { %v301_v25 = vsub.s32 0, %v4169_v23  ;;  %s3812_s29 = smov 88   ;;  %s3813_s1 = smov 120   ;;  %vm1811_vm7 = vcmask 130048   ;;  %vm2834_vm8 = vcmask 523264  }
 0x118   :  { %s3814_s8 = smov 80   ;;  %s3815_s11 = smov 112  }
 0x119   :  { %v4140_v0 = vld [vmem:[%s4704_s24] sm:$0xff]  ;;  %v4145_v1 = vld [vmem:[%s4704_s24 + $0x8] sm:$0xff]  ;;  %v302_v27 = vrot.slane %v4172_v26, %v301_v25  ;;  %v308_v32 = vrot.slane %v4175_v29, %v301_v25  ;;  %s3817_s28 = smov 104   ;;  %s3818_s17 = smov 8  }
 0x11a   :  { %v272_v2 = vsel %vm271_vm0, %v4140_v0, 0.0  ;;  %v275_v3 = vsel %vm271_vm0, %v4145_v1, 0.0  ;;  %v3367_v14 = vld [vmem:[%s4705_s7] sm:$0xff]   ;;  %v3368_v16 = vld [vmem:[%s4705_s7 + $0x8] sm:$0xff]   ;;  %s3816_s7 = smov 72   ;;  %s3819_s16 = smov 16  }
 0x11b   :  { %273 = vadd.xlane.f32.xlu0 %v272_v2  ;;  %3072 = vmatpush3.bf16.msra.mxu1 %v3367_v14  ;;  %v4181_v37 = vld [vmem:[%s4706_s20] sm:$0xff]  ;;  %v4186_v38 = vld [vmem:[%s4706_s20 + $0x8] sm:$0xff]  ;;  %s3820_s3 = smov 24   ;;  %s4710_s6 = sld [smem:[#allocation34_spill]] }
 0x11c   :  { %3073 = vmatprep.subr.bf16.mxu1 %v3809_v15  ;;  %v3369_v42 = vld [vmem:[%s4707_s2] sm:$0xff]   ;;  %v3370_v44 = vld [vmem:[%s4707_s2 + $0x8] sm:$0xff]   ;;  %s4711_s19 = sld [smem:[#allocation36_spill]] }
 0x11d   :  { %v2904_v46 = vld [vmem:[%s4708_s4] ss:$0 sm:$0xff] }
 0x11f   :  { %276 = vadd.xlane.f32.xlu0 %v275_v3  ;;  %3074 = vmatpush3.bf16.msra.mxu1 %v3368_v16 }
 0x120   :  { %3079 = vmatprep.subr.bf16.mxu1 %v3809_v15 }
 0x1a8   :  { %v274_v4 = vpop.xlane.xlu0 %273 }
 0x1a9   :  { %v279_v5 = vmul.f32 0.03125, %v274_v4 }
 0x1ab   :  { %v281_v6 = vsub.f32 %v4140_v0, %v279_v5 }
 0x1ac   :  { %v277_v7 = vpop.xlane.xlu0 %276 }
 0x1ad   :  { %v280_v8 = vmul.f32 0.03125, %v277_v7  ;;  %v283_v9 = vmul.f32 %v281_v6, %v281_v6 }
 0x1af   :  { %v282_v10 = vsub.f32 %v4145_v1, %v280_v8  ;;  %v285_v11 = vsel %vm271_vm0, %v283_v9, 0.0  ;;  %v4241_v8 = vld [vmem:[%s4709_s30] sm:$0xff] }
 0x1b0   :  { %286 = vadd.xlane.f32.xlu1 %v285_v11 }
 0x1b1   :  { %v284_v12 = vmul.f32 %v282_v10, %v282_v10 }
 0x1b3   :  { %v288_v13 = vsel %vm271_vm0, %v284_v12, 0.0 }
 0x1b4   :  { %289 = vadd.xlane.f32.xlu1 %v288_v13 }
 0x23d   :  { %v287_v17 = vpop.xlane.xlu1 %286 }
 0x23e   :  { %v291_v18 = vmul.f32 0.03125, %v287_v17 }
 0x240   :  { %v293_v20 = vadd.f32 1e-05, %v291_v18 }
 0x241   :  { %v290_v21 = vpop.xlane.xlu1 %289 }
 0x242   :  { %3387 = vrsqrt.f32 %v293_v20  ;;  %v292_v22 = vmul.f32 0.03125, %v290_v21 }
 0x244   :  { %v294_v24 = vadd.f32 1e-05, %v292_v22 }
 0x246   :  { %3389 = vrsqrt.f32 %v294_v24 }
 0x24c   :  { %v3388_v28 = vpop.eup %3387 }
 0x24d   :  { %v297_v30 = vmul.f32 %v3388_v28, %v281_v6 }
 0x24f   :  { %v303_v31 = vadd.f32 %v302_v27, %v297_v30 }
 0x250   :  { %v3390_v33 = vpop.eup %3389 }
 0x251   :  { %v298_v34 = vmul.f32 %v3390_v33, %v282_v10  ;;  %v309_v36 = vmul.f32 %v308_v32, %v303_v31  ;;  %v4246_v10 = vld [vmem:[%s4709_s30 + $0x8] sm:$0xff] }
 0x253   :  { %v304_v35 = vadd.f32 %v302_v27, %v298_v34  ;;  %v311_v40 = vadd.f32 %v309_v36, %v4181_v37 }
 0x255   :  { %v310_v39 = vmul.f32 %v308_v32, %v304_v35 }
 0x257   :  { %v312_v41 = vadd.f32 %v310_v39, %v4186_v38  ;;  %v381_v45 = vpack.c.bf16 %v310_v39, %v309_v36 }
 0x259   :  { %v313_v43 = vpack.c.bf16 %v312_v41, %v311_v40 }
 0x25b   :  { %3076 = vmatmul.mubr.msk.bf16.vlgmr.msra.gmra.mrb[0].mxu1 %vm271_vm0, %v313_v43 }
 0x25c   :  { %3080 = vmatpush3.bf16.msra.mxu1 %v3369_v42  ;;  %3083 = vmatprep.mubr.msk.bf16.mxu1 %vm3810_vm1, %v3809_v15 }
 0x25d   :  { %3081 = vmatprep.subr.bf16.mxu1 %v3809_v15 }
 0x260   :  { %3082 = vmatpush3.bf16.msra.mxu1 %v3370_v44 }
 0x261   :  { %3093 = vmatprep.subr.bf16.mxu1 %v3809_v15 }
 0x263   :  { %3084 = vmatmul.mubr.msk.bf16.vlgmr.msra.gmra.mrb[4].mxu1 %vm271_vm0, %v381_v45 }
 0x264   :  { %3095 = vmatprep.mubr.msk.bf16.mxu1 %vm3810_vm1, %v3809_v15 }
 0x32e   :  { %v374_v47 = vpop.f32.mrb[0].mxu1 }
 0x32f   :  { %v375_v48 = vadd.f32 %v2904_v46, %v374_v47  ;;  %v3077_v49 = vpop.f32.mrb[1].mxu1 }
 0x330   :  { %v377_v50 = vpop.f32.mrb[2].mxu1 }
 0x331   :  { %v4207_v51 = vpack.c.bf16 %v375_v48, %v375_v48  ;;  %v378_v52 = vadd.f32 %v2904_v46, %v377_v50  ;;  %v3078_v53 = vpop.f32.mrb[3].mxu1 }
 0x333   :  { %v4209_v54 = vpack.c.bf16 %v378_v52, %v378_v52  ;;  %457 = vrot.lane.b32.xlu0 %v4207_v51, %s3811_s18 }
 0x335   :  { %507 = vrot.lane.b32.xlu1 %v4209_v54, %s3811_s18 }
 0x336   :  { %v442_v55 = vpop.f32.mrb[4].mxu1 }
 0x337   :  { %v3085_v56 = vpop.f32.mrb[5].mxu1  ;;  %v443_v61 = vadd.f32 %v2908_v59, %v442_v55 }
 0x338   :  { %v445_v57 = vpop.f32.mrb[6].mxu1 }
 0x339   :  { %v3086_v58 = vpop.f32.mrb[7].mxu1  ;;  %v446_v2 = vadd.f32 %v2908_v59, %v445_v57  ;;  %v4219_v4 = vpack.c.bf16 %v443_v61, %v443_v61 }
 0x33b   :  { %v4222_v5 = vpack.c.bf16 %v446_v2, %v446_v2  ;;  %v586_v6 = vsel %vm584_vm3, %v4219_v4, 0 }
 0x33d   :  { %v632_v7 = vsel %vm584_vm3, %v4222_v5, 0 }
 0x3a5   :  { %v458_v60 = vpop.permute.xlu0 %457 }
 0x3a6   :  { %v464_v62 = vsel %vm459_vm2, %v458_v60, 0 }
 0x3a7   :  { %3088 = vmatpush3.bf16.xpose.msra.mxu0 %v464_v62  ;;  %v508_v63 = vpop.permute.xlu1 %507 }
 0x3a8   :  { %v513_v3 = vsel %vm459_vm2, %v508_v63, 0  ;;  %3099 = vmatprep.subr.bf16.mxu0 %v3809_v15 }
 0x3a9   :  { %3094 = vmatpush3.bf16.xpose.msra.mxu1 %v513_v3 }
 0x3aa   :  { %3105 = vmatprep.subr.bf16.mxu1 %v3809_v15 }
 0x3ae   :  { %3090 = vmatmul.mubr.msk.bf16.vlgmr.msra.gmra.mrb[0].mxu0 %vm459_vm2, %v4207_v51 }
 0x3af   :  { %3100 = vmatpush3.bf16.msra.mxu0 %v586_v6  ;;  %3101 = vmatprep.mubr.msk.bf16.mxu0 %vm3810_vm1, %v3809_v15 }
 0x3b0   :  { %3096 = vmatmul.mubr.msk.bf16.vlgmr.msra.gmra.mrb[8].mxu1 %vm459_vm2, %v4209_v54  ;;  %3111 = vmatprep.subr.bf16.mxu0 %v3809_v15 }
 0x3b1   :  { %3106 = vmatpush3.bf16.msra.mxu1 %v632_v7  ;;  %3107 = vmatprep.mubr.msk.bf16.mxu1 %vm3810_vm1, %v3809_v15 }
 0x3b2   :  { %3117 = vmatprep.subr.bf16.mxu1 %v3809_v15 }
 0x481   :  { %v500_v9 = vpop.f32.mrb[0].mxu0 }
 0x482   :  { %v501_v11 = vadd.f32 %v500_v9, %v4241_v8  ;;  %v3091_v12 = vpop.f32.mrb[1].mxu0 }
 0x483   :  { %v503_v13 = vpop.f32.mrb[2].mxu0  ;;  %v549_v14 = vpop.f32.mrb[8].mxu1 }
 0x484   :  { %v550_v16 = vadd.f32 %v549_v14, %v4246_v10  ;;  %v3092_v17 = vpop.f32.mrb[3].mxu0  ;;  %v3097_v18 = vpop.f32.mrb[9].mxu1  ;;  %v555_v19 = vsel %vm459_vm2, %v501_v11, -inf }
 0x485   :  { %v552_v20 = vpop.f32.mrb[10].mxu1  ;;  %556 = vmax.xlane.f32.xlu1 %v555_v19 }
 0x486   :  { %v3098_v21 = vpop.f32.mrb[11].mxu1  ;;  %v558_v22 = vsel %vm459_vm2, %v550_v16, -inf }
 0x487   :  { %559 = vmax.xlane.f32.xlu0 %v558_v22 }
 0x496   :  { %728 = vrot.lane.b32.xlu1 %v4209_v54, %s3812_s29 }
 0x512   :  { %v557_v24 = vpop.xlane.xlu1 %556 }
 0x513   :  { %v561_v25 = vsub.f32 %v501_v11, %v557_v24 }
 0x514   :  { %v560_v27 = vpop.xlane.xlu0 %559 }
 0x515   :  { %v563_v28 = vmul.f32 1.442695, %v561_v25  ;;  %v562_v30 = vsub.f32 %v550_v16, %v560_v27 }
 0x516   :  { %v729_v36 = vpop.permute.xlu1 %728 }
 0x517   :  { %3391 = vpow2.f32 %v563_v28  ;;  %v565_v31 = vmul.f32 1.442695, %v562_v30  ;;  %v734_v49 = vsel %vm459_vm2, %v729_v36, 0 }
 0x519   :  { %3393 = vpow2.f32 %v565_v31 }
 0x521   :  { %v3392_v32 = vpop.eup %3391 }
 0x522   :  { %v567_v33 = vsel %vm459_vm2, %v3392_v32, 0.0 }
 0x523   :  { %v3394_v34 = vpop.eup %3393  ;;  %568 = vadd.xlane.f32.xlu0 %v567_v33 }
 0x524   :  { %v570_v35 = vsel %vm459_vm2, %v3394_v34, 0.0 }
 0x525   :  { %571 = vadd.xlane.f32.xlu1 %v570_v35 }
 0x536   :  { %676 = vrot.lane.b32.xlu1 %v4207_v51, %s3813_s1 }
 0x539   :  { %678 = vrot.lane.b32.xlu0 %v4207_v51, %s3812_s29 }
 0x53a   :  { %726 = vrot.lane.b32.xlu1 %v4209_v54, %s3813_s1 }
 0x5b0   :  { %v569_v39 = vpop.xlane.xlu0 %568 }
 0x5b1   :  { %3395 = vrcp.f32 %v569_v39 }
 0x5b2   :  { %v572_v40 = vpop.xlane.xlu1 %571 }
 0x5b3   :  { %3397 = vrcp.f32 %v572_v40 }
 0x5b4   :  { %v679_v44 = vpop.permute.xlu0 %678 }
 0x5b5   :  { %v684_v47 = vsel %vm459_vm2, %v679_v44, 0 }
 0x5b6   :  { %v677_v50 = vpop.permute.xlu1 %676 }
 0x5ba   :  { %v727_v52 = vpop.permute.xlu1 %726 }
 0x5bb   :  { %v3396_v41 = vpop.eup %3395 }
 0x5bc   :  { %v575_v42 = vmul.f32 %v3396_v41, %v3392_v32 }
 0x5bd   :  { %v3398_v43 = vpop.eup %3397 }
 0x5be   :  { %v576_v45 = vmul.f32 %v3398_v43, %v3394_v34  ;;  %v577_v46 = vpack.c.bf16 %v575_v42, %v575_v42 }
 0x5c0   :  { %3102 = vmatmul.mubr.msk.bf16.vlgmr.msra.gmra.mrb[4].mxu0 %vm459_vm2, %v577_v46  ;;  %v578_v48 = vpack.c.bf16 %v576_v45, %v576_v45 }
 0x5c1   :  { %3112 = vmatpush3.bf16.xpose.msra.mxu0 %v684_v47  ;;  %3113 = vmatprep.mubr.msk.bf16.mxu0 %vm3810_vm1, %v3809_v15 }
 0x5c2   :  { %3108 = vmatmul.mubr.msk.bf16.vlgmr.msra.gmra.mrb[12].mxu1 %vm459_vm2, %v578_v48  ;;  %3123 = vmatprep.subr.bf16.mxu0 %v3809_v15 }
 0x5c3   :  { %3118 = vmatpush3.bf16.xpose.msra.mxu1 %v734_v49  ;;  %3119 = vmatprep.mubr.msk.bf16.mxu1 %vm3810_vm1, %v3809_v15 }
 0x5c4   :  { %3129 = vmatprep.subr.bf16.mxu1 %v3809_v15 }
 0x5c8   :  { %3114 = vmatmul.mubr.msk.bf16.vlgmr.msra.gmra.mrb[8].mxu0 %vm459_vm2, %v677_v50 }
 0x5c9   :  { %3125 = vmatprep.mubr.msk.bf16.mxu0 %vm3810_vm1, %v3809_v15 }
 0x5ca   :  { %3120 = vmatmul.mubr.msk.bf16.vlgmr.msra.gmra.mrb[16].mxu1 %vm459_vm2, %v727_v52 }
 0x5cb   :  { %3131 = vmatprep.mubr.msk.bf16.mxu1 %vm3810_vm1, %v3809_v15 }
 0x693   :  { %v622_v53 = vpop.f32.mrb[4].mxu0 }
 0x694   :  { %674 = vst.msk [vmem:[#allocation2] sm:$0xff] %vm459_vm2, %v622_v53  ;;  %v3103_v55 = vpop.f32.mrb[5].mxu0 }
 0x695   :  { %v625_v56 = vpop.f32.mrb[6].mxu0  ;;  %v668_v57 = vpop.f32.mrb[12].mxu1 }
 0x696   :  { %675 = vst.msk [vmem:[#allocation2 + $0x8] sm:$0xff] %vm459_vm2, %v668_v57  ;;  %v3104_v58 = vpop.f32.mrb[7].mxu0  ;;  %v3109_v59 = vpop.f32.mrb[13].mxu1 }
 0x697   :  { %v671_v60 = vpop.f32.mrb[14].mxu1 }
 0x698   :  { %v3110_v61 = vpop.f32.mrb[15].mxu1 }
 0x69b   :  { %v720_v62 = vpop.f32.mrb[8].mxu0 }
 0x69c   :  { %v721_v63 = vadd.f32 %v720_v62, %v4241_v8  ;;  %v3115_v2 = vpop.f32.mrb[9].mxu0 }
 0x69d   :  { %v723_v3 = vpop.f32.mrb[10].mxu0  ;;  %v770_v6 = vpop.f32.mrb[16].mxu1 }
 0x69e   :  { %v771_v7 = vadd.f32 %v770_v6, %v4246_v10  ;;  %v3116_v9 = vpop.f32.mrb[11].mxu0  ;;  %v3121_v11 = vpop.f32.mrb[17].mxu1  ;;  %v776_v12 = vsel %vm459_vm2, %v721_v63, -inf }
 0x69f   :  { %777 = vmax.xlane.f32.xlu0 %v776_v12  ;;  %v773_v13 = vpop.f32.mrb[18].mxu1 }
 0x6a0   :  { %v3122_v14 = vpop.f32.mrb[19].mxu1  ;;  %v779_v16 = vsel %vm459_vm2, %v771_v7, -inf }
 0x6a1   :  { %780 = vmax.xlane.f32.xlu1 %v779_v16 }
 0x6b2   :  { %850 = vrot.lane.b32.xlu1 %v4222_v5, %s3813_s1 }
 0x6b6   :  { %911 = vrot.lane.b32.xlu1 %v4207_v51, %s3814_s8 }
 0x6ba   :  { %961 = vrot.lane.b32.xlu1 %v4209_v54, %s3814_s8 }
 0x6be   :  { %959 = vrot.lane.b32.xlu1 %v4209_v54, %s3815_s11 }
 0x72c   :  { %v778_v17 = vpop.xlane.xlu0 %777 }
 0x72d   :  { %v782_v18 = vsub.f32 %v721_v63, %v778_v17 }
 0x72e   :  { %v781_v19 = vpop.xlane.xlu1 %780 }
 0x72f   :  { %v784_v20 = vmul.f32 1.442695, %v782_v18  ;;  %v783_v21 = vsub.f32 %v771_v7, %v781_v19 }
 0x731   :  { %3399 = vpow2.f32 %v784_v20  ;;  %v786_v22 = vmul.f32 1.442695, %v783_v21 }
 0x732   :  { %v851_v24 = vpop.permute.xlu1 %850 }
 0x733   :  { %3401 = vpow2.f32 %v786_v22  ;;  %v856_v25 = vsel %vm584_vm3, %v851_v24, 0 }
 0x734   :  { %3130 = vmatpush3.bf16.msra.mxu1 %v856_v25 }
 0x735   :  { %3141 = vmatprep.subr.bf16.mxu1 %v3809_v15 }
 0x736   :  { %v912_v39 = vpop.permute.xlu1 %911 }
 0x737   :  { %v917_v45 = vsel %vm459_vm2, %v912_v39, 0 }
 0x73a   :  { %v962_v44 = vpop.permute.xlu1 %961 }
 0x73b   :  { %v3400_v27 = vpop.eup %3399  ;;  %v967_v47 = vsel %vm459_vm2, %v962_v44, 0 }
 0x73c   :  { %v788_v28 = vsel %vm459_vm2, %v3400_v27, 0.0 }
 0x73d   :  { %v3402_v30 = vpop.eup %3401  ;;  %789 = vadd.xlane.f32.xlu0 %v788_v28 }
 0x73e   :  { %v791_v31 = vsel %vm459_vm2, %v3402_v30, 0.0  ;;  %v960_v49 = vpop.permute.xlu1 %959 }
 0x741   :  { %792 = vadd.xlane.f32.xlu0 %v791_v31 }
 0x757   :  { %801 = vrot.lane.b32.xlu0 %v4219_v4, %s3813_s1 }
 0x75b   :  { %909 = vrot.lane.b32.xlu0 %v4207_v51, %s3815_s11 }
 0x7ca   :  { %v790_v32 = vpop.xlane.xlu0 %789 }
 0x7cb   :  { %3403 = vrcp.f32 %v790_v32 }
 0x7ce   :  { %v793_v33 = vpop.xlane.xlu0 %792 }
 0x7cf   :  { %3405 = vrcp.f32 %v793_v33 }
 0x7d2   :  { %v802_v34 = vpop.permute.xlu0 %801 }
 0x7d3   :  { %v807_v35 = vsel %vm584_vm3, %v802_v34, 0 }
 0x7d4   :  { %3124 = vmatpush3.bf16.msra.mxu0 %v807_v35 }
 0x7d5   :  { %v3404_v36 = vpop.eup %3403  ;;  %3135 = vmatprep.subr.bf16.mxu0 %v3809_v15 }
 0x7d6   :  { %v796_v40 = vmul.f32 %v3404_v36, %v3400_v27  ;;  %v910_v48 = vpop.permute.xlu0 %909 }
 0x7d8   :  { %v798_v41 = vpack.c.bf16 %v796_v40, %v796_v40 }
 0x7d9   :  { %v3406_v42 = vpop.eup %3405 }
 0x7da   :  { %v797_v43 = vmul.f32 %v3406_v42, %v3402_v30  ;;  %3126 = vmatmul.mubr.msk.bf16.vlgmr.msra.gmra.mrb[12].mxu0 %vm459_vm2, %v798_v41 }
 0x7db   :  { %3137 = vmatprep.mubr.msk.bf16.mxu0 %vm3810_vm1, %v3809_v15 }
 0x7dc   :  { %v799_v46 = vpack.c.bf16 %v797_v43, %v797_v43 }
 0x7dd   :  { %3136 = vmatpush3.bf16.xpose.msra.mxu0 %v917_v45 }
 0x7de   :  { %3132 = vmatmul.mubr.msk.bf16.vlgmr.msra.gmra.mrb[20].mxu1 %vm459_vm2, %v799_v46  ;;  %3147 = vmatprep.subr.bf16.mxu0 %v3809_v15 }
 0x7df   :  { %3142 = vmatpush3.bf16.xpose.msra.mxu1 %v967_v47  ;;  %3143 = vmatprep.mubr.msk.bf16.mxu1 %vm3810_vm1, %v3809_v15 }
 0x7e0   :  { %3153 = vmatprep.subr.bf16.mxu1 %v3809_v15 }
 0x7e4   :  { %3138 = vmatmul.mubr.msk.bf16.vlgmr.msra.gmra.mrb[16].mxu0 %vm459_vm2, %v910_v48 }
 0x7e5   :  { %3149 = vmatprep.mubr.msk.bf16.mxu0 %vm3810_vm1, %v3809_v15 }
 0x7e6   :  { %3144 = vmatmul.mubr.msk.bf16.vlgmr.msra.gmra.mrb[24].mxu1 %vm459_vm2, %v960_v49 }
 0x7e7   :  { %3155 = vmatprep.mubr.msk.bf16.mxu1 %vm3810_vm1, %v3809_v15 }
 0x8ad   :  { %v4314_v50 = vpop.f32.mrb[12].mxu0 }
 0x8ae   :  { %v3127_v52 = vpop.f32.mrb[13].mxu0 }
 0x8af   :  { %v846_v53 = vpop.f32.mrb[14].mxu0 }
 0x8b0   :  { %v3128_v55 = vpop.f32.mrb[15].mxu0 }
 0x8b1   :  { %v4316_v56 = vpop.f32.mrb[20].mxu1 }
 0x8b2   :  { %v3133_v57 = vpop.f32.mrb[21].mxu1 }
 0x8b3   :  { %v895_v58 = vpop.f32.mrb[22].mxu1 }
 0x8b4   :  { %v3134_v59 = vpop.f32.mrb[23].mxu1 }
 0x8b7   :  { %v953_v60 = vpop.f32.mrb[16].mxu0 }
 0x8b8   :  { %v954_v61 = vadd.f32 %v953_v60, %v4241_v8  ;;  %v3139_v62 = vpop.f32.mrb[17].mxu0 }
 0x8b9   :  { %v956_v63 = vpop.f32.mrb[18].mxu0  ;;  %v1003_v2 = vpop.f32.mrb[24].mxu1 }
 0x8ba   :  { %v1004_v3 = vadd.f32 %v1003_v2, %v4246_v10  ;;  %v3140_v6 = vpop.f32.mrb[19].mxu0  ;;  %v3145_v7 = vpop.f32.mrb[25].mxu1  ;;  %v1009_v9 = vsel %vm459_vm2, %v954_v61, -inf }
 0x8bb   :  { %1010 = vmax.xlane.f32.xlu0 %v1009_v9  ;;  %v1006_v11 = vpop.f32.mrb[26].mxu1 }
 0x8bc   :  { %v3146_v12 = vpop.f32.mrb[27].mxu1  ;;  %v1012_v13 = vsel %vm459_vm2, %v1004_v3, -inf }
 0x8bd   :  { %1013 = vmax.xlane.f32.xlu1 %v1012_v13 }
 0x8ce   :  { %1081 = vrot.lane.b32.xlu1 %v4222_v5, %s3815_s11 }
 0x8d2   :  { %1142 = vrot.lane.b32.xlu1 %v4207_v51, %s3816_s7 }
 0x8d6   :  { %1192 = vrot.lane.b32.xlu1 %v4209_v54, %s3816_s7 }
 0x8da   :  { %1190 = vrot.lane.b32.xlu1 %v4209_v54, %s3817_s28 }
 0x948   :  { %v1011_v14 = vpop.xlane.xlu0 %1010 }
 0x949   :  { %v1015_v16 = vsub.f32 %v954_v61, %v1011_v14 }
 0x94a   :  { %v1014_v17 = vpop.xlane.xlu1 %1013 }
 0x94b   :  { %v1017_v18 = vmul.f32 1.442695, %v1015_v16  ;;  %v1016_v19 = vsub.f32 %v1004_v3, %v1014_v17 }
 0x94d   :  { %3407 = vpow2.f32 %v1017_v18  ;;  %v1019_v20 = vmul.f32 1.442695, %v1016_v19 }
 0x94e   :  { %v1082_v21 = vpop.permute.xlu1 %1081 }
 0x94f   :  { %3409 = vpow2.f32 %v1019_v20  ;;  %v1087_v22 = vsel %vm584_vm3, %v1082_v21, 0 }
 0x950   :  { %3154 = vmatpush3.bf16.msra.mxu1 %v1087_v22 }
 0x951   :  { %3165 = vmatprep.subr.bf16.mxu1 %v3809_v15 }
 0x952   :  { %v1143_v34 = vpop.permute.xlu1 %1142 }
 0x956   :  { %v1193_v41 = vpop.permute.xlu1 %1192 }
 0x957   :  { %v3408_v24 = vpop.eup %3407  ;;  %v1198_v43 = vsel %vm459_vm2, %v1193_v41, 0 }
 0x958   :  { %v1021_v25 = vsel %vm459_vm2, %v3408_v24, 0.0 }
 0x959   :  { %v3410_v27 = vpop.eup %3409  ;;  %1022 = vadd.xlane.f32.xlu0 %v1021_v25 }
 0x95a   :  { %v1024_v54 = vsel %vm459_vm2, %v3410_v27, 0.0  ;;  %v1191_v45 = vpop.permute.xlu1 %1190 }
 0x95d   :  { %1025 = vadd.xlane.f32.xlu0 %v1024_v54 }
 0x973   :  { %1033 = vrot.lane.b32.xlu0 %v4219_v4, %s3815_s11 }
 0x977   :  { %1140 = vrot.lane.b32.xlu0 %v4207_v51, %s3817_s28  ;;  %v1148_v51 = vsel %vm459_vm2, %v1143_v34, 0 }
 0x9e6   :  { %v1023_v28 = vpop.xlane.xlu0 %1022 }
 0x9e7   :  { %3411 = vrcp.f32 %v1023_v28 }
 0x9ea   :  { %v1026_v30 = vpop.xlane.xlu0 %1025 }
 0x9eb   :  { %3413 = vrcp.f32 %v1026_v30 }
 0x9ee   :  { %v1034_v31 = vpop.permute.xlu0 %1033 }
 0x9ef   :  { %v1039_v32 = vsel %vm584_vm3, %v1034_v31, 0 }
 0x9f0   :  { %3148 = vmatpush3.bf16.msra.mxu0 %v1039_v32 }
 0x9f1   :  { %v3412_v33 = vpop.eup %3411  ;;  %3159 = vmatprep.subr.bf16.mxu0 %v3809_v15 }
 0x9f2   :  { %v1029_v35 = vmul.f32 %v3412_v33, %v3408_v24  ;;  %v1141_v44 = vpop.permute.xlu0 %1140 }
 0x9f4   :  { %v1031_v36 = vpack.c.bf16 %v1029_v35, %v1029_v35  ;;  %v3371_v35 = vld [vmem:[#allocation7] sm:$0xff]  }
 0x9f5   :  { %v3414_v39 = vpop.eup %3413 }
 0x9f6   :  { %v1030_v40 = vmul.f32 %v3414_v39, %v3410_v27  ;;  %3150 = vmatmul.mubr.msk.bf16.vlgmr.msra.gmra.mrb[20].mxu0 %vm459_vm2, %v1031_v36  ;;  %v3372_v36 = vld [vmem:[#allocation7 + $0x8] sm:$0xff]  }
 0x9f7   :  { %3161 = vmatprep.mubr.msk.bf16.mxu0 %vm3810_vm1, %v3809_v15 }
 0x9f8   :  { %v1032_v42 = vpack.c.bf16 %v1030_v40, %v1030_v40 }
 0x9f9   :  { %3160 = vmatpush3.bf16.xpose.msra.mxu0 %v1148_v51 }
 0x9fa   :  { %3156 = vmatmul.mubr.msk.bf16.vlgmr.msra.gmra.mrb[28].mxu1 %vm459_vm2, %v1032_v42  ;;  %3171 = vmatprep.subr.bf16.mxu0 %v3809_v15 }
 0x9fb   :  { %3166 = vmatpush3.bf16.xpose.msra.mxu1 %v1198_v43  ;;  %3167 = vmatprep.mubr.msk.bf16.mxu1 %vm3810_vm1, %v3809_v15 }
 0x9fc   :  { %3177 = vmatprep.subr.bf16.mxu1 %v3809_v15 }
 0xa00   :  { %3162 = vmatmul.mubr.msk.bf16.vlgmr.msra.gmra.mrb[24].mxu0 %vm459_vm2, %v1141_v44 }
 0xa01   :  { %3173 = vmatprep.mubr.msk.bf16.mxu0 %vm3810_vm1, %v3809_v15 }
 0xa02   :  { %3168 = vmatmul.mubr.msk.bf16.vlgmr.msra.gmra.mrb[32].mxu1 %vm459_vm2, %v1191_v45 }
 0xa03   :  { %3179 = vmatprep.mubr.msk.bf16.mxu1 %vm3810_vm1, %v3809_v15 }
 0xac9   :  { %v1075_v46 = vpop.f32.mrb[20].mxu0 }
 0xaca   :  { %v3151_v47 = vpop.f32.mrb[21].mxu0 }
 0xacb   :  { %v1078_v48 = vpop.f32.mrb[22].mxu0 }
 0xacc   :  { %v3152_v49 = vpop.f32.mrb[23].mxu0 }
 0xacd   :  { %v1123_v52 = vpop.f32.mrb[28].mxu1 }
 0xace   :  { %v3157_v53 = vpop.f32.mrb[29].mxu1 }
 0xacf   :  { %v1126_v55 = vpop.f32.mrb[30].mxu1  ;;  %v2928_v53 = vld [vmem:[%s4669_s12] ss:$0 sm:$0xff] }
 0xad0   :  { %v3158_v57 = vpop.f32.mrb[31].mxu1 }
 0xad3   :  { %v1184_v58 = vpop.f32.mrb[24].mxu0 }
 0xad4   :  { %v1185_v59 = vadd.f32 %v1184_v58, %v4241_v8  ;;  %v3163_v60 = vpop.f32.mrb[25].mxu0 }
 0xad5   :  { %v1187_v61 = vpop.f32.mrb[26].mxu0  ;;  %v1234_v62 = vpop.f32.mrb[32].mxu1 }
 0xad6   :  { %v1235_v63 = vadd.f32 %v1234_v62, %v4246_v10  ;;  %v3164_v2 = vpop.f32.mrb[27].mxu0  ;;  %v3169_v3 = vpop.f32.mrb[33].mxu1  ;;  %v1240_v6 = vsel %vm459_vm2, %v1185_v59, -inf }
 0xad7   :  { %1241 = vmax.xlane.f32.xlu0 %v1240_v6  ;;  %v1237_v7 = vpop.f32.mrb[34].mxu1 }
 0xad8   :  { %v3170_v9 = vpop.f32.mrb[35].mxu1  ;;  %v1243_v11 = vsel %vm459_vm2, %v1235_v63, -inf }
 0xad9   :  { %1244 = vmax.xlane.f32.xlu1 %v1243_v11 }
 0xaea   :  { %1312 = vrot.lane.b32.xlu1 %v4222_v5, %s3817_s28 }
 0xaee   :  { %900 = vrot.lane.b32.xlu1 %v4314_v50, %s3818_s17 }
 0xaf2   :  { %902 = vrot.lane.b32.xlu1 %v4316_v56, %s3818_s17 }
 0xaf6   :  { %1133 = vrot.lane.b32.xlu1 %v1123_v52, %s3819_s16 }
 0xb64   :  { %v1242_v8 = vpop.xlane.xlu0 %1241 }
 0xb65   :  { %v1246_v10 = vsub.f32 %v1185_v59, %v1242_v8 }
 0xb66   :  { %v1245_v12 = vpop.xlane.xlu1 %1244 }
 0xb67   :  { %v1248_v13 = vmul.f32 1.442695, %v1246_v10  ;;  %v1247_v14 = vsub.f32 %v1235_v63, %v1245_v12 }
 0xb69   :  { %3415 = vpow2.f32 %v1248_v13  ;;  %v1250_v16 = vmul.f32 1.442695, %v1247_v14  ;;  %v3373_v14 = vld [vmem:[#allocation11] sm:$0xff]  }
 0xb6a   :  { %v1313_v17 = vpop.permute.xlu1 %1312 }
 0xb6b   :  { %3417 = vpow2.f32 %v1250_v16  ;;  %v1318_v5 = vsel %vm584_vm3, %v1313_v17, 0  ;;  %v3374_v16 = vld [vmem:[#allocation11 + $0x8] sm:$0xff]  }
 0xb6c   :  { %3178 = vmatpush3.bf16.msra.mxu1 %v1318_v5  ;;  %v259_v17 = vld [vmem:[%s4710_s6] sm:$0xff]  ;;  %v260_v5 = vld [vmem:[%s4710_s6 + $0x8] sm:$0xff] }
 0xb6d   :  { %3191 = vmatprep.subr.bf16.mxu1 %v3809_v15 }
 0xb6e   :  { %v901_v50 = vpop.permute.xlu1 %900 }
 0xb6f   :  { %907 = vst.msk [vmem:[#allocation2] sm:$0xff] %vm906_vm4, %v901_v50  ;;  %v265_v50 = vld [vmem:[%s4711_s19] sm:$0xff] }
 0xb72   :  { %v903_v56 = vpop.permute.xlu1 %902 }
 0xb73   :  { %v3416_v18 = vpop.eup %3415  ;;  %908 = vst.msk [vmem:[#allocation2 + $0x8] sm:$0xff] %vm906_vm4, %v903_v56  ;;  %v266_v56 = vld [vmem:[%s4711_s19 + $0x8] sm:$0xff] }
 0xb74   :  { %v1252_v19 = vsel %vm459_vm2, %v3416_v18, 0.0 }
 0xb75   :  { %v3418_v20 = vpop.eup %3417  ;;  %1253 = vadd.xlane.f32.xlu0 %v1252_v19  ;;  %v1546_v19 = vadd.f32 %v265_v50, %v259_v17  ;;  %v2941_v50 = vld [vmem:[#allocation16] ss:$0 sm:$0xff] }
 0xb76   :  { %v1134_v21 = vpop.permute.xlu1 %1133  ;;  %v1255_v22 = vsel %vm459_vm2, %v3418_v20, 0.0 }
 0xb77   :  { %1139 = vst.msk [vmem:[#allocation2 + $0x8] sm:$0xff] %vm1137_vm5, %v1134_v21  ;;  %v262_v21 = vld [vmem:[%s4710_s6 + $0x18] sm:$0xff] }
 0xb79   :  { %1256 = vadd.xlane.f32.xlu0 %v1255_v22  ;;  %v267_v22 = vld [vmem:[%s4711_s19 + $0x10] sm:$0xff] }
 0xb8f   :  { %1264 = vrot.lane.b32.xlu0 %v4219_v4, %s3817_s28 }
 0xb93   :  { %1131 = vrot.lane.b32.xlu0 %v1075_v46, %s3819_s16 }
 0xc02   :  { %v1254_v24 = vpop.xlane.xlu0 %1253 }
 0xc03   :  { %3419 = vrcp.f32 %v1254_v24  ;;  %v268_v24 = vld [vmem:[%s4711_s19 + $0x18] sm:$0xff] }
 0xc06   :  { %v1257_v25 = vpop.xlane.xlu0 %1256 }
 0xc07   :  { %3421 = vrcp.f32 %v1257_v25 }
 0xc0a   :  { %v1265_v27 = vpop.permute.xlu0 %1264 }
 0xc0b   :  { %v1270_v54 = vsel %vm584_vm3, %v1265_v27, 0  ;;  %v1549_v27 = vadd.f32 %v268_v24, %v262_v21 }
 0xc0c   :  { %3172 = vmatpush3.bf16.msra.mxu0 %v1270_v54 }
 0xc0d   :  { %v3420_v28 = vpop.eup %3419  ;;  %3183 = vmatprep.subr.bf16.mxu0 %v3809_v15 }
 0xc0e   :  { %v1260_v30 = vmul.f32 %v3420_v28, %v3416_v18  ;;  %v1132_v31 = vpop.permute.xlu0 %1131  ;;  %v261_v18 = vld [vmem:[%s4710_s6 + $0x10] sm:$0xff] }
 0xc0f   :  { %1138 = vst.msk [vmem:[#allocation2] sm:$0xff] %vm1137_vm5, %v1132_v31  ;;  %v1548_v25 = vadd.f32 %v267_v22, %v261_v18  ;;  %v3376_v31 = vld [vmem:[#allocation8 + $0x8] sm:$0xff]  }
 0xc10   :  { %v1262_v32 = vpack.c.bf16 %v1260_v30, %v1260_v30  ;;  %v3375_v30 = vld [vmem:[#allocation8] sm:$0xff]  }
 0xc11   :  { %v3422_v33 = vpop.eup %3421  ;;  %v1551_v28 = vpack.c.bf16 %v1549_v27, %v1548_v25 }
 0xc12   :  { %v1261_v4 = vmul.f32 %v3422_v33, %v3418_v20  ;;  %3174 = vmatmul.mubr.msk.bf16.vlgmr.msra.gmra.mrb[28].mxu0 %vm459_vm2, %v1262_v32  ;;  %v1547_v20 = vadd.f32 %v266_v56, %v260_v5  ;;  %v3377_v32 = vld [vmem:[#allocation14] sm:$0xff]  }
 0xc13   :  { %3187 = vmatprep.mubr.msk.bf16.mxu0 %vm3810_vm1, %v3809_v15  ;;  %3184 = vmatpush3.bf16.msra.mxu0 %v3371_v35 }
 0xc14   :  { %v1263_v34 = vpack.c.bf16 %v1261_v4, %v1261_v4  ;;  %3185 = vmatprep.subr.bf16.mxu0 %v3809_v15  ;;  %v1550_v54 = vpack.c.bf16 %v1547_v20, %v1546_v19 }
 0xc16   :  { %3180 = vmatmul.mubr.msk.bf16.vlgmr.msra.gmra.mrb[36].mxu1 %vm459_vm2, %v1263_v34 }
 0xc17   :  { %3195 = vmatprep.mubr.msk.bf16.mxu1 %vm3810_vm1, %v3809_v15  ;;  %3186 = vmatpush3.bf16.msra.mxu0 %v3372_v36 }
 0xc18   :  { %3199 = vmatprep.subr.bf16.mxu0 %v3373_v14  ;;  %3192 = vmatpush3.bf16.msra.mxu1 %v3375_v30 }
 0xc19   :  { %3193 = vmatprep.subr.bf16.mxu1 %v3809_v15 }
 0xc1c   :  { %3194 = vmatpush3.bf16.msra.mxu1 %v3376_v31 }
 0xc1d   :  { %3207 = vmatprep.subr.bf16.mxu1 %v3377_v32 }
 0xce5   :  { %v1306_v39 = vpop.f32.mrb[28].mxu0 }
 0xce6   :  { %1362 = vrot.lane.b32.xlu0 %v1306_v39, %s3820_s3  ;;  %v3175_v40 = vpop.f32.mrb[29].mxu0 }
 0xce7   :  { %v1309_v41 = vpop.f32.mrb[30].mxu0  ;;  %v1466_v40 = vsub.s32 1, %v4169_v23 }
 0xce8   :  { %v3176_v51 = vpop.f32.mrb[31].mxu0 }
 0xce9   :  { %v1354_v42 = vpop.f32.mrb[36].mxu1  ;;  %v1467_v41 = vrot.slane %v4172_v26, %v1466_v40  ;;  %v1631_v26 = vpack.c.bf16 %v262_v21, %v261_v18 }
 0xcea   :  { %1364 = vrot.lane.b32.xlu1 %v1354_v42, %s3820_s3  ;;  %v3181_v43 = vpop.f32.mrb[37].mxu1 }
 0xceb   :  { %v1357_v44 = vpop.f32.mrb[38].mxu1 }
 0xcec   :  { %v3182_v45 = vpop.f32.mrb[39].mxu1  ;;  %v1473_v44 = vrot.slane %v4175_v29, %v1466_v40  ;;  %v2936_v29 = vld [vmem:[#allocation13] ss:$0 sm:$0xff] }
 0xd58   :  { %v1363_v46 = vpop.permute.xlu0 %1362 }
 0xd59   :  { %1369 = vst.msk [vmem:[#allocation2] sm:$0xff] %vm1368_vm6, %v1363_v46 }
 0xd5c   :  { %v1365_v47 = vpop.permute.xlu1 %1364 }
 0xd5d   :  { %1370 = vst.msk [vmem:[#allocation2 + $0x8] sm:$0xff] %vm1368_vm6, %v1365_v47 }
 0xd60   :  { %v1371_v48 = vld [vmem:[#allocation2] sm:$0xff] }
 0xd64   :  { %v1372_v49 = vld [vmem:[#allocation2 + $0x8] sm:$0xff] }
 0xd65   :  { %v1373_v52 = vpack.c.bf16 %v1372_v49, %v1371_v48 }
 0xd67   :  { %3188 = vmatmul.mubr.msk.bf16.vlgmr.msra.gmra.mrb[32].mxu0 %vm271_vm0, %v1373_v52 }
 0xd68   :  { %3200 = vmatpush3.bf16.msra.mxu0 %v3373_v14  ;;  %3203 = vmatprep.mubr.msk.bf16.mxu0 %vm271_vm0, %v1550_v54 }
 0xd69   :  { %3201 = vmatprep.subr.bf16.mxu0 %v3374_v16 }
 0xd6c   :  { %3202 = vmatpush3.bf16.msra.mxu0 %v3374_v16 }
 0xd6d   :  { %3215 = vmatprep.subr.bf16.mxu0 %v3809_v15 }
 0xd6f   :  { %3204 = vmatmul.mubr.msk.bf16.vlgmr.msra.gmra.mrb[36].mxu0 %vm271_vm0, %v1551_v28 }
 0xd70   :  { %3217 = vmatprep.mubr.msk.bf16.mxu0 %vm3810_vm1, %v3809_v15 }
 0xe3a   :  { %v1429_v55 = vpop.f32.mrb[32].mxu0 }
 0xe3b   :  { %v1430_v57 = vadd.f32 %v2928_v53, %v1429_v55  ;;  %v3189_v58 = vpop.f32.mrb[33].mxu0  ;;  %v1630_v55 = vpack.c.bf16 %v260_v5, %v259_v17 }
 0xe3c   :  { %v1432_v59 = vpop.f32.mrb[34].mxu0  ;;  %v3378_v58 = vld [vmem:[#allocation14 + $0x8] sm:$0xff]  }
 0xe3d   :  { %v4394_v60 = vadd.f32 %v1430_v57, %v4140_v0  ;;  %v1433_v61 = vadd.f32 %v2928_v53, %v1432_v59  ;;  %v3190_v62 = vpop.f32.mrb[35].mxu0 }
 0xe3f   :  { %v4397_v63 = vadd.f32 %v1433_v61, %v4145_v1  ;;  %v1438_v2 = vsel %vm271_vm0, %v4394_v60, 0.0 }
 0xe40   :  { %1439 = vadd.xlane.f32.xlu0 %v1438_v2 }
 0xe41   :  { %v1441_v3 = vsel %vm271_vm0, %v4397_v63, 0.0 }
 0xe42   :  { %1442 = vadd.xlane.f32.xlu1 %v1441_v3 }
 0xecd   :  { %v1440_v6 = vpop.xlane.xlu0 %1439 }
 0xece   :  { %v1444_v7 = vmul.f32 0.03125, %v1440_v6 }
 0xecf   :  { %v1443_v9 = vpop.xlane.xlu1 %1442 }
 0xed0   :  { %v1446_v11 = vsub.f32 %v4394_v60, %v1444_v7  ;;  %v1445_v0 = vmul.f32 0.03125, %v1443_v9 }
 0xed2   :  { %v1447_v8 = vsub.f32 %v4397_v63, %v1445_v0  ;;  %v1448_v10 = vmul.f32 %v1446_v11, %v1446_v11 }
 0xed4   :  { %v1450_v1 = vsel %vm271_vm0, %v1448_v10, 0.0  ;;  %v1449_v12 = vmul.f32 %v1447_v8, %v1447_v8 }
 0xed5   :  { %1451 = vadd.xlane.f32.xlu0 %v1450_v1 }
 0xed6   :  { %v1453_v13 = vsel %vm271_vm0, %v1449_v12, 0.0 }
 0xed9   :  { %1454 = vadd.xlane.f32.xlu0 %v1453_v13 }
 0xf62   :  { %v1452_v33 = vpop.xlane.xlu0 %1451 }
 0xf63   :  { %v1456_v4 = vmul.f32 0.03125, %v1452_v33 }
 0xf65   :  { %v1458_v34 = vadd.f32 1e-05, %v1456_v4 }
 0xf66   :  { %v1455_v35 = vpop.xlane.xlu0 %1454 }
 0xf67   :  { %3423 = vrsqrt.f32 %v1458_v34  ;;  %v1457_v36 = vmul.f32 0.03125, %v1455_v35 }
 0xf69   :  { %v1459_v39 = vadd.f32 1e-05, %v1457_v36 }
 0xf6b   :  { %3425 = vrsqrt.f32 %v1459_v39 }
 0xf71   :  { %v3424_v51 = vpop.eup %3423 }
 0xf72   :  { %v1462_v42 = vmul.f32 %v3424_v51, %v1446_v11 }
 0xf74   :  { %v1468_v43 = vadd.f32 %v1467_v41, %v1462_v42 }
 0xf75   :  { %v3426_v45 = vpop.eup %3425 }
 0xf76   :  { %v1463_v46 = vmul.f32 %v3426_v45, %v1447_v8  ;;  %v1474_v48 = vmul.f32 %v1473_v44, %v1468_v43  ;;  %v2932_v8 = vld [vmem:[#allocation10] ss:$0 sm:$0xff] }
 0xf78   :  { %v1469_v47 = vadd.f32 %v1467_v41, %v1463_v46  ;;  %v1476_v52 = vadd.f32 %v1474_v48, %v4181_v37  ;;  %v3205_v37 = vpop.f32.mrb[36].mxu0 }
 0xf79   :  { %v1615_v59 = vpop.f32.mrb[37].mxu0 }
 0xf7a   :  { %v1475_v49 = vmul.f32 %v1473_v44, %v1469_v47  ;;  %v1616_v61 = vadd.f32 %v2936_v29, %v1615_v59  ;;  %v3206_v62 = vpop.f32.mrb[38].mxu0 }
 0xf7b   :  { %v1627_v2 = vadd.f32 %v3206_v62, %v2936_v29  ;;  %v1618_v3 = vpop.f32.mrb[39].mxu0 }
 0xf7c   :  { %v1477_v53 = vadd.f32 %v1475_v49, %v4186_v38  ;;  %v1624_v38 = vadd.f32 %v3205_v37, %v2936_v29  ;;  %v1619_v6 = vadd.f32 %v2936_v29, %v1618_v3 }
 0xf7e   :  { %v1478_v57 = vpack.c.bf16 %v1477_v53, %v1476_v52  ;;  %v4448_v7 = vpack.c.bf16 %v1627_v2, %v1624_v38  ;;  %v4450_v9 = vpack.c.bf16 %v1619_v6, %v1616_v61 }
 0xf80   :  { %3196 = vmatmul.mubr.msk.bf16.vlgmr.msra.gmra.mrb[40].mxu1 %vm271_vm0, %v1478_v57  ;;  %v1769_v11 = vsel %vm459_vm2, %v4448_v7, 0  ;;  %v1723_v0 = vsel %vm459_vm2, %v4450_v9, 0 }
 0xf81   :  { %3208 = vmatpush3.bf16.msra.mxu1 %v3377_v32  ;;  %3211 = vmatprep.mubr.msk.bf16.mxu1 %vm271_vm0, %v1630_v55 }
 0xf82   :  { %3209 = vmatprep.subr.bf16.mxu1 %v3378_v58  ;;  %3216 = vmatpush3.bf16.xpose.msra.mxu0 %v1723_v0 }
 0xf83   :  { %3227 = vmatprep.subr.bf16.mxu0 %v3809_v15 }
 0xf85   :  { %3210 = vmatpush3.bf16.msra.mxu1 %v3378_v58 }
 0xf86   :  { %3221 = vmatprep.subr.bf16.mxu1 %v3809_v15 }
 0xf88   :  { %3212 = vmatmul.mubr.msk.bf16.vlgmr.msra.gmra.mrb[44].mxu1 %vm271_vm0, %v1631_v26 }
 0xf89   :  { %3223 = vmatprep.mubr.msk.bf16.mxu1 %vm3810_vm1, %v3809_v15 }
 0xf8e   :  { %3222 = vmatpush3.bf16.xpose.msra.mxu1 %v1769_v11 }
 0xf8f   :  { %3233 = vmatprep.subr.bf16.mxu1 %v3809_v15 }
0x1053   :  { %v1539_v10 = vpop.f32.mrb[40].mxu1 }
0x1054   :  { %v1540_v1 = vadd.f32 %v2932_v8, %v1539_v10  ;;  %v3197_v12 = vpop.f32.mrb[41].mxu1 }
0x1055   :  { %v1542_v13 = vpop.f32.mrb[42].mxu1 }
0x1056   :  { %v4458_v14 = vpack.c.bf16 %v1540_v1, %v1540_v1  ;;  %v1543_v16 = vadd.f32 %v2932_v8, %v1542_v13  ;;  %v3198_v17 = vpop.f32.mrb[43].mxu1 }
0x1058   :  { %v4460_v5 = vpack.c.bf16 %v1543_v16, %v1543_v16  ;;  %3218 = vmatmul.mubr.msk.bf16.vlgmr.msra.gmra.mrb[40].mxu0 %vm459_vm2, %v4458_v14 }
0x1059   :  { %3229 = vmatprep.mubr.msk.bf16.mxu0 %vm3810_vm1, %v3809_v15 }
0x105a   :  { %3224 = vmatmul.mubr.msk.bf16.vlgmr.msra.gmra.mrb[48].mxu1 %vm459_vm2, %v4460_v5 }
0x105b   :  { %v3213_v56 = vpop.f32.mrb[44].mxu1  ;;  %3235 = vmatprep.mubr.msk.bf16.mxu1 %vm3810_vm1, %v3809_v15 }
0x105c   :  { %v1704_v18 = vadd.f32 %v3213_v56, %v2941_v50  ;;  %v1695_v19 = vpop.f32.mrb[45].mxu1 }
0x105d   :  { %v1696_v20 = vadd.f32 %v2941_v50, %v1695_v19  ;;  %v3214_v21 = vpop.f32.mrb[46].mxu1 }
0x105e   :  { %v1707_v22 = vadd.f32 %v3214_v21, %v2941_v50  ;;  %v1698_v24 = vpop.f32.mrb[47].mxu1 }
0x105f   :  { %v1699_v25 = vadd.f32 %v2941_v50, %v1698_v24 }
0x1060   :  { %v4470_v27 = vpack.c.bf16 %v1707_v22, %v1704_v18 }
0x1061   :  { %v4472_v54 = vpack.c.bf16 %v1699_v25, %v1696_v20 }
0x1062   :  { %3234 = vmatpush3.bf16.msra.mxu1 %v4470_v27 }
0x1063   :  { %3228 = vmatpush3.bf16.msra.mxu0 %v4472_v54  ;;  %3245 = vmatprep.subr.bf16.mxu1 %v3809_v15 }
0x1064   :  { %3239 = vmatprep.subr.bf16.mxu0 %v3809_v15 }
0x112b   :  { %v1759_v28 = vpop.f32.mrb[40].mxu0 }
0x112c   :  { %v3219_v30 = vpop.f32.mrb[41].mxu0  ;;  %v1812_v31 = vsel %vm1811_vm7, %v1759_v28, -inf }
0x112d   :  { %1813 = vmax.xlane.f32.xlu0 %v1812_v31  ;;  %v1762_v32 = vpop.f32.mrb[42].mxu0  ;;  %v1805_v33 = vpop.f32.mrb[48].mxu1 }
0x112e   :  { %v3220_v4 = vpop.f32.mrb[43].mxu0  ;;  %v3225_v34 = vpop.f32.mrb[49].mxu1  ;;  %v1815_v35 = vsel %vm1811_vm7, %v1805_v33, -inf }
0x112f   :  { %1816 = vmax.xlane.f32.xlu1 %v1815_v35  ;;  %v1808_v36 = vpop.f32.mrb[50].mxu1 }
0x1130   :  { %v3226_v39 = vpop.f32.mrb[51].mxu1 }
0x1140   :  { %1982 = vrot.lane.b32.xlu1 %v4448_v7, %s3813_s1 }
0x11ba   :  { %v1814_v40 = vpop.xlane.xlu0 %1813 }
0x11bb   :  { %v1818_v41 = vsub.f32 %v1759_v28, %v1814_v40 }
0x11bc   :  { %v1817_v51 = vpop.xlane.xlu1 %1816 }
0x11bd   :  { %v1820_v42 = vmul.f32 1.442695, %v1818_v41  ;;  %v1819_v43 = vsub.f32 %v1805_v33, %v1817_v51 }
0x11bf   :  { %3427 = vpow2.f32 %v1820_v42  ;;  %v1822_v44 = vmul.f32 1.442695, %v1819_v43 }
0x11c0   :  { %v1983_v49 = vpop.permute.xlu1 %1982 }
0x11c1   :  { %3429 = vpow2.f32 %v1822_v44  ;;  %v1988_v61 = vsel %vm459_vm2, %v1983_v49, 0 }
0x11c9   :  { %v3428_v45 = vpop.eup %3427 }
0x11ca   :  { %v1824_v46 = vsel %vm1811_vm7, %v3428_v45, 0.0 }
0x11cb   :  { %v3430_v47 = vpop.eup %3429  ;;  %1825 = vadd.xlane.f32.xlu0 %v1824_v46 }
0x11cc   :  { %v1827_v48 = vsel %vm1811_vm7, %v3430_v47, 0.0 }
0x11cd   :  { %1828 = vadd.xlane.f32.xlu1 %v1827_v48 }
0x11de   :  { %1927 = vrot.lane.b32.xlu1 %v4458_v14, %s3813_s1 }
0x11e1   :  { %1930 = vrot.lane.b32.xlu0 %v4450_v9, %s3813_s1 }
0x11e2   :  { %1979 = vrot.lane.b32.xlu1 %v4460_v5, %s3813_s1 }
0x1258   :  { %v1826_v52 = vpop.xlane.xlu0 %1825 }
0x1259   :  { %3431 = vrcp.f32 %v1826_v52 }
0x125a   :  { %v1829_v53 = vpop.xlane.xlu1 %1828 }
0x125b   :  { %3433 = vrcp.f32 %v1829_v53 }
0x125c   :  { %v1931_v26 = vpop.permute.xlu0 %1930 }
0x125d   :  { %v1936_v38 = vsel %vm459_vm2, %v1931_v26, 0 }
0x125e   :  { %v1928_v62 = vpop.permute.xlu1 %1927 }
0x1262   :  { %v1980_v2 = vpop.permute.xlu1 %1979 }
0x1263   :  { %v3432_v55 = vpop.eup %3431 }
0x1264   :  { %v1832_v57 = vmul.f32 %v3432_v55, %v3428_v45 }
0x1265   :  { %v3434_v58 = vpop.eup %3433 }
0x1266   :  { %v1833_v29 = vmul.f32 %v3434_v58, %v3430_v47  ;;  %v1834_v37 = vpack.c.bf16 %v1832_v57, %v1832_v57 }
0x1268   :  { %3230 = vmatmul.mubr.msk.bf16.vlgmr.msra.gmra.mrb[44].mxu0 %vm1811_vm7, %v1834_v37  ;;  %v1835_v59 = vpack.c.bf16 %v1833_v29, %v1833_v29 }
0x1269   :  { %3240 = vmatpush3.bf16.xpose.msra.mxu0 %v1936_v38  ;;  %3241 = vmatprep.mubr.msk.bf16.mxu0 %vm3810_vm1, %v3809_v15 }
0x126a   :  { %3236 = vmatmul.mubr.msk.bf16.vlgmr.msra.gmra.mrb[52].mxu1 %vm1811_vm7, %v1835_v59  ;;  %3251 = vmatprep.subr.bf16.mxu0 %v3809_v15 }
0x126b   :  { %3246 = vmatpush3.bf16.xpose.msra.mxu1 %v1988_v61  ;;  %3247 = vmatprep.mubr.msk.bf16.mxu1 %vm3810_vm1, %v3809_v15 }
0x126c   :  { %3257 = vmatprep.subr.bf16.mxu1 %v3809_v15 }
0x1270   :  { %3242 = vmatmul.mubr.msk.bf16.vlgmr.msra.gmra.mrb[48].mxu0 %vm459_vm2, %v1928_v62 }
0x1271   :  { %3253 = vmatprep.mubr.msk.bf16.mxu0 %vm3810_vm1, %v3809_v15 }
0x1272   :  { %3248 = vmatmul.mubr.msk.bf16.vlgmr.msra.gmra.mrb[56].mxu1 %vm459_vm2, %v1980_v2 }
0x1273   :  { %3259 = vmatprep.mubr.msk.bf16.mxu1 %vm3810_vm1, %v3809_v15 }
0x133b   :  { %v1875_v3 = vpop.f32.mrb[44].mxu0 }
0x133c   :  { %1924 = vst.msk [vmem:[#allocation2] sm:$0xff] %vm459_vm2, %v1875_v3  ;;  %v3231_v6 = vpop.f32.mrb[45].mxu0 }
0x133d   :  { %v1878_v11 = vpop.f32.mrb[46].mxu0  ;;  %v1918_v0 = vpop.f32.mrb[52].mxu1 }
0x133e   :  { %1925 = vst.msk [vmem:[#allocation2 + $0x8] sm:$0xff] %vm459_vm2, %v1918_v0  ;;  %v3232_v8 = vpop.f32.mrb[47].mxu0  ;;  %v3237_v10 = vpop.f32.mrb[53].mxu1 }
0x133f   :  { %v1921_v1 = vpop.f32.mrb[54].mxu1 }
0x1340   :  { %v3238_v12 = vpop.f32.mrb[55].mxu1 }
0x1343   :  { %v1972_v13 = vpop.f32.mrb[48].mxu0 }
0x1344   :  { %v3243_v16 = vpop.f32.mrb[49].mxu0  ;;  %v2030_v17 = vsel %vm1811_vm7, %v1972_v13, -inf }
0x1345   :  { %v2024_v50 = vpop.f32.mrb[56].mxu1  ;;  %2031 = vmax.xlane.f32.xlu0 %v2030_v17  ;;  %v1975_v56 = vpop.f32.mrb[50].mxu0 }
0x1346   :  { %v3244_v18 = vpop.f32.mrb[51].mxu0  ;;  %v3249_v19 = vpop.f32.mrb[57].mxu1  ;;  %v2033_v20 = vsel %vm1811_vm7, %v2024_v50, -inf }
0x1347   :  { %2034 = vmax.xlane.f32.xlu1 %v2033_v20  ;;  %v2027_v21 = vpop.f32.mrb[58].mxu1 }
0x1348   :  { %v3250_v22 = vpop.f32.mrb[59].mxu1 }
0x1358   :  { %2102 = vrot.lane.b32.xlu1 %v4470_v27, %s3813_s1 }
0x135c   :  { %2160 = vrot.lane.b32.xlu1 %v4450_v9, %s3815_s11 }
0x1360   :  { %2210 = vrot.lane.b32.xlu1 %v4448_v7, %s3815_s11 }
0x1364   :  { %2208 = vrot.lane.b32.xlu1 %v4460_v5, %s3815_s11 }
0x13d2   :  { %v2032_v24 = vpop.xlane.xlu0 %2031 }
0x13d3   :  { %v2036_v25 = vsub.f32 %v1972_v13, %v2032_v24 }
0x13d4   :  { %v2035_v28 = vpop.xlane.xlu1 %2034 }
0x13d5   :  { %v2038_v30 = vmul.f32 1.442695, %v2036_v25  ;;  %v2037_v31 = vsub.f32 %v2024_v50, %v2035_v28 }
0x13d7   :  { %3435 = vpow2.f32 %v2038_v30  ;;  %v2040_v32 = vmul.f32 1.442695, %v2037_v31 }
0x13d8   :  { %v2103_v33 = vpop.permute.xlu1 %2102 }
0x13d9   :  { %3437 = vpow2.f32 %v2040_v32  ;;  %3258 = vmatpush3.bf16.msra.mxu1 %v2103_v33 }
0x13da   :  { %3269 = vmatprep.subr.bf16.mxu1 %v3809_v15 }
0x13dc   :  { %v2161_v42 = vpop.permute.xlu1 %2160 }
0x13dd   :  { %v2166_v47 = vsel %vm459_vm2, %v2161_v42, 0 }
0x13e0   :  { %v2211_v48 = vpop.permute.xlu1 %2210 }
0x13e1   :  { %v3436_v4 = vpop.eup %3435  ;;  %v2216_v52 = vsel %vm459_vm2, %v2211_v48, 0 }
0x13e2   :  { %v2042_v34 = vsel %vm1811_vm7, %v3436_v4, 0.0 }
0x13e3   :  { %v3438_v35 = vpop.eup %3437  ;;  %2043 = vadd.xlane.f32.xlu0 %v2042_v34 }
0x13e4   :  { %v2045_v36 = vsel %vm1811_vm7, %v3438_v35, 0.0  ;;  %v2209_v55 = vpop.permute.xlu1 %2208 }
0x13e7   :  { %2046 = vadd.xlane.f32.xlu0 %v2045_v36 }
0x13fd   :  { %2055 = vrot.lane.b32.xlu0 %v4472_v54, %s3813_s1 }
0x1401   :  { %2158 = vrot.lane.b32.xlu0 %v4458_v14, %s3815_s11 }
0x1470   :  { %v2044_v39 = vpop.xlane.xlu0 %2043 }
0x1471   :  { %3439 = vrcp.f32 %v2044_v39 }
0x1474   :  { %v2047_v40 = vpop.xlane.xlu0 %2046 }
0x1475   :  { %3441 = vrcp.f32 %v2047_v40 }
0x1478   :  { %v2056_v41 = vpop.permute.xlu0 %2055 }
0x1479   :  { %3252 = vmatpush3.bf16.msra.mxu0 %v2056_v41 }
0x147a   :  { %3263 = vmatprep.subr.bf16.mxu0 %v3809_v15 }
0x147b   :  { %v3440_v51 = vpop.eup %3439 }
0x147c   :  { %v2050_v43 = vmul.f32 %v3440_v51, %v3436_v4  ;;  %v2159_v53 = vpop.permute.xlu0 %2158 }
0x147e   :  { %v2052_v44 = vpack.c.bf16 %v2050_v43, %v2050_v43 }
0x147f   :  { %v3442_v45 = vpop.eup %3441 }
0x1480   :  { %v2051_v46 = vmul.f32 %v3442_v45, %v3438_v35  ;;  %3254 = vmatmul.mubr.msk.bf16.vlgmr.msra.gmra.mrb[52].mxu0 %vm1811_vm7, %v2052_v44 }
0x1481   :  { %3265 = vmatprep.mubr.msk.bf16.mxu0 %vm3810_vm1, %v3809_v15 }
0x1482   :  { %3264 = vmatpush3.bf16.xpose.msra.mxu0 %v2166_v47  ;;  %v2053_v49 = vpack.c.bf16 %v2051_v46, %v2051_v46 }
0x1483   :  { %3275 = vmatprep.subr.bf16.mxu0 %v3809_v15 }
0x1484   :  { %3260 = vmatmul.mubr.msk.bf16.vlgmr.msra.gmra.mrb[60].mxu1 %vm1811_vm7, %v2053_v49 }
0x1485   :  { %3270 = vmatpush3.bf16.xpose.msra.mxu1 %v2216_v52  ;;  %3271 = vmatprep.mubr.msk.bf16.mxu1 %vm3810_vm1, %v3809_v15 }
0x1486   :  { %3281 = vmatprep.subr.bf16.mxu1 %v3809_v15 }
0x1489   :  { %3266 = vmatmul.mubr.msk.bf16.vlgmr.msra.gmra.mrb[56].mxu0 %vm459_vm2, %v2159_v53 }
0x148a   :  { %3277 = vmatprep.mubr.msk.bf16.mxu0 %vm3810_vm1, %v3809_v15 }
0x148c   :  { %3272 = vmatmul.mubr.msk.bf16.vlgmr.msra.gmra.mrb[64].mxu1 %vm459_vm2, %v2209_v55 }
0x148d   :  { %3283 = vmatprep.mubr.msk.bf16.mxu1 %vm3810_vm1, %v3809_v15 }
0x1553   :  { %v4542_v57 = vpop.f32.mrb[52].mxu0 }
0x1554   :  { %v3255_v58 = vpop.f32.mrb[53].mxu0 }
0x1555   :  { %v2098_v26 = vpop.f32.mrb[54].mxu0 }
0x1556   :  { %v3256_v29 = vpop.f32.mrb[55].mxu0 }
0x1557   :  { %v4544_v37 = vpop.f32.mrb[60].mxu1 }
0x1558   :  { %v3261_v38 = vpop.f32.mrb[61].mxu1 }
0x1559   :  { %v2145_v59 = vpop.f32.mrb[62].mxu1 }
0x155a   :  { %v3262_v61 = vpop.f32.mrb[63].mxu1 }
0x155c   :  { %v2202_v62 = vpop.f32.mrb[56].mxu0 }
0x155d   :  { %v3267_v2 = vpop.f32.mrb[57].mxu0  ;;  %v2258_v3 = vsel %vm1811_vm7, %v2202_v62, -inf }
0x155e   :  { %2259 = vmax.xlane.f32.xlu0 %v2258_v3  ;;  %v2205_v6 = vpop.f32.mrb[58].mxu0 }
0x155f   :  { %v3268_v11 = vpop.f32.mrb[59].mxu0  ;;  %v2252_v0 = vpop.f32.mrb[64].mxu1 }
0x1560   :  { %v3273_v8 = vpop.f32.mrb[65].mxu1  ;;  %v2261_v10 = vsel %vm1811_vm7, %v2252_v0, -inf }
0x1561   :  { %2262 = vmax.xlane.f32.xlu1 %v2261_v10  ;;  %v2255_v1 = vpop.f32.mrb[66].mxu1 }
0x1562   :  { %v3274_v12 = vpop.f32.mrb[67].mxu1 }
0x1572   :  { %2328 = vrot.lane.b32.xlu1 %v4470_v27, %s3815_s11 }
0x1576   :  { %2386 = vrot.lane.b32.xlu1 %v4450_v9, %s3817_s28 }
0x157a   :  { %2436 = vrot.lane.b32.xlu1 %v4448_v7, %s3817_s28 }
0x157e   :  { %2434 = vrot.lane.b32.xlu1 %v4460_v5, %s3817_s28 }
0x15eb   :  { %v2260_v13 = vpop.xlane.xlu0 %2259 }
0x15ec   :  { %v2264_v16 = vsub.f32 %v2202_v62, %v2260_v13 }
0x15ee   :  { %v2266_v17 = vmul.f32 1.442695, %v2264_v16  ;;  %v2263_v50 = vpop.xlane.xlu1 %2262 }
0x15ef   :  { %v2265_v56 = vsub.f32 %v2252_v0, %v2263_v50 }
0x15f0   :  { %3443 = vpow2.f32 %v2266_v17 }
0x15f1   :  { %v2268_v18 = vmul.f32 1.442695, %v2265_v56 }
0x15f2   :  { %v2329_v19 = vpop.permute.xlu1 %2328 }
0x15f3   :  { %3445 = vpow2.f32 %v2268_v18  ;;  %3282 = vmatpush3.bf16.msra.mxu1 %v2329_v19 }
0x15f4   :  { %3293 = vmatprep.subr.bf16.mxu1 %v3809_v15 }
0x15f6   :  { %v2387_v28 = vpop.permute.xlu1 %2386 }
0x15f7   :  { %v2392_v4 = vsel %vm459_vm2, %v2387_v28, 0 }
0x15fa   :  { %v3444_v20 = vpop.eup %3443  ;;  %v2437_v34 = vpop.permute.xlu1 %2436 }
0x15fb   :  { %v2270_v9 = vsel %vm1811_vm7, %v3444_v20, 0.0  ;;  %v2442_v35 = vsel %vm459_vm2, %v2437_v34, 0 }
0x15fc   :  { %2271 = vadd.xlane.f32.xlu0 %v2270_v9  ;;  %v3379_v9 = vld [vmem:[#allocation17] sm:$0xff]  }
0x15fd   :  { %v3446_v7 = vpop.eup %3445 }
0x15fe   :  { %v2273_v21 = vsel %vm1811_vm7, %v3446_v7, 0.0  ;;  %v2435_v39 = vpop.permute.xlu1 %2434 }
0x1600   :  { %2274 = vadd.xlane.f32.xlu0 %v2273_v21 }
0x1616   :  { %2282 = vrot.lane.b32.xlu0 %v4472_v54, %s3815_s11 }
0x161a   :  { %2384 = vrot.lane.b32.xlu0 %v4458_v14, %s3817_s28 }
0x1689   :  { %v2272_v5 = vpop.xlane.xlu0 %2271 }
0x168a   :  { %3447 = vrcp.f32 %v2272_v5 }
0x168d   :  { %v2275_v22 = vpop.xlane.xlu0 %2274 }
0x168e   :  { %3449 = vrcp.f32 %v2275_v22 }
0x1691   :  { %v2283_v24 = vpop.permute.xlu0 %2282 }
0x1692   :  { %3276 = vmatpush3.bf16.msra.mxu0 %v2283_v24 }
0x1693   :  { %3287 = vmatprep.subr.bf16.mxu0 %v3809_v15 }
0x1694   :  { %v3448_v25 = vpop.eup %3447 }
0x1695   :  { %v2278_v30 = vmul.f32 %v3448_v25, %v3444_v20  ;;  %v2385_v36 = vpop.permute.xlu0 %2384 }
0x1697   :  { %v2280_v31 = vpack.c.bf16 %v2278_v30, %v2278_v30 }
0x1698   :  { %v3450_v32 = vpop.eup %3449 }
0x1699   :  { %v2279_v33 = vmul.f32 %v3450_v32, %v3446_v7  ;;  %3278 = vmatmul.mubr.msk.bf16.vlgmr.msra.gmra.mrb[60].mxu0 %vm1811_vm7, %v2280_v31  ;;  %v3380_v7 = vld [vmem:[#allocation17 + $0x8] sm:$0xff]  }
0x169a   :  { %3289 = vmatprep.mubr.msk.bf16.mxu0 %vm3810_vm1, %v3809_v15 }
0x169b   :  { %3288 = vmatpush3.bf16.xpose.msra.mxu0 %v2392_v4  ;;  %v2281_v14 = vpack.c.bf16 %v2279_v33, %v2279_v33 }
0x169c   :  { %3299 = vmatprep.subr.bf16.mxu0 %v3809_v15 }
0x169d   :  { %3284 = vmatmul.mubr.msk.bf16.vlgmr.msra.gmra.mrb[68].mxu1 %vm1811_vm7, %v2281_v14 }
0x169e   :  { %3294 = vmatpush3.bf16.xpose.msra.mxu1 %v2442_v35  ;;  %3295 = vmatprep.mubr.msk.bf16.mxu1 %vm3810_vm1, %v3809_v15  ;;  %v2962_v35 = vld [vmem:[#allocation19] ss:$0 sm:$0xff] }
0x169f   :  { %3305 = vmatprep.subr.bf16.mxu1 %v3809_v15 }
0x16a2   :  { %3290 = vmatmul.mubr.msk.bf16.vlgmr.msra.gmra.mrb[64].mxu0 %vm459_vm2, %v2385_v36 }
0x16a3   :  { %3301 = vmatprep.mubr.msk.bf16.mxu0 %vm3810_vm1, %v3809_v15 }
0x16a5   :  { %3296 = vmatmul.mubr.msk.bf16.vlgmr.msra.gmra.mrb[72].mxu1 %vm459_vm2, %v2435_v39 }
0x16a6   :  { %3307 = vmatprep.mubr.msk.bf16.mxu1 %vm3810_vm1, %v3809_v15 }
0x176c   :  { %v2322_v40 = vpop.f32.mrb[60].mxu0 }
0x176d   :  { %v3279_v41 = vpop.f32.mrb[61].mxu0 }
0x176e   :  { %v2325_v51 = vpop.f32.mrb[62].mxu0 }
0x176f   :  { %v3280_v42 = vpop.f32.mrb[63].mxu0 }
0x1770   :  { %v2368_v43 = vpop.f32.mrb[68].mxu1 }
0x1771   :  { %v3285_v44 = vpop.f32.mrb[69].mxu1 }
0x1772   :  { %v2371_v45 = vpop.f32.mrb[70].mxu1 }
0x1773   :  { %v3286_v46 = vpop.f32.mrb[71].mxu1 }
0x1775   :  { %v2428_v47 = vpop.f32.mrb[64].mxu0 }
0x1776   :  { %v3291_v48 = vpop.f32.mrb[65].mxu0  ;;  %v2484_v49 = vsel %vm1811_vm7, %v2428_v47, -inf }
0x1777   :  { %2485 = vmax.xlane.f32.xlu0 %v2484_v49  ;;  %v2431_v52 = vpop.f32.mrb[66].mxu0 }
0x1778   :  { %v3292_v53 = vpop.f32.mrb[67].mxu0  ;;  %v2478_v55 = vpop.f32.mrb[72].mxu1 }
0x1779   :  { %v3297_v58 = vpop.f32.mrb[73].mxu1  ;;  %v2487_v26 = vsel %vm1811_vm7, %v2478_v55, -inf }
0x177a   :  { %2488 = vmax.xlane.f32.xlu1 %v2487_v26  ;;  %v2481_v29 = vpop.f32.mrb[74].mxu1 }
0x177b   :  { %v3298_v38 = vpop.f32.mrb[75].mxu1  ;;  %v3381_v29 = vld [vmem:[#allocation20] sm:$0xff]  }
0x177c   :  { %v3382_v38 = vld [vmem:[#allocation20 + $0x8] sm:$0xff]  }
0x178b   :  { %2554 = vrot.lane.b32.xlu1 %v4470_v27, %s3817_s28 }
0x178f   :  { %2150 = vrot.lane.b32.xlu1 %v4542_v57, %s3818_s17 }
0x1793   :  { %2152 = vrot.lane.b32.xlu1 %v4544_v37, %s3818_s17 }
0x1797   :  { %2378 = vrot.lane.b32.xlu1 %v2368_v43, %s3819_s16 }
0x1804   :  { %v2486_v59 = vpop.xlane.xlu0 %2485 }
0x1805   :  { %v2490_v61 = vsub.f32 %v2428_v47, %v2486_v59 }
0x1807   :  { %v2492_v62 = vmul.f32 1.442695, %v2490_v61  ;;  %v2489_v2 = vpop.xlane.xlu1 %2488 }
0x1808   :  { %v2491_v3 = vsub.f32 %v2478_v55, %v2489_v2 }
0x1809   :  { %3451 = vpow2.f32 %v2492_v62 }
0x180a   :  { %v2494_v6 = vmul.f32 1.442695, %v2491_v3 }
0x180b   :  { %v2555_v11 = vpop.permute.xlu1 %2554 }
0x180c   :  { %3453 = vpow2.f32 %v2494_v6  ;;  %3306 = vmatpush3.bf16.msra.mxu1 %v2555_v11  ;;  %v2705_v11 = vsub.s32 2, %v4169_v23  ;;  %v3384_v23 = vld [vmem:[%s4680_s23 + $0x8] sm:$0xff]  }
0x180d   :  { %3319 = vmatprep.subr.bf16.mxu1 %v3809_v15 }
0x180f   :  { %v2151_v27 = vpop.permute.xlu1 %2150 }
0x1810   :  { %2156 = vst.msk [vmem:[#allocation2] sm:$0xff] %vm906_vm4, %v2151_v27 }
0x1813   :  { %v3452_v57 = vpop.eup %3451  ;;  %v2153_v0 = vpop.permute.xlu1 %2152 }
0x1814   :  { %2157 = vst.msk [vmem:[#allocation2 + $0x8] sm:$0xff] %vm906_vm4, %v2153_v0  ;;  %v2496_v37 = vsel %vm1811_vm7, %v3452_v57, 0.0 }
0x1815   :  { %2497 = vadd.xlane.f32.xlu0 %v2496_v37 }
0x1816   :  { %v3454_v8 = vpop.eup %3453 }
0x1817   :  { %v2379_v10 = vpop.permute.xlu1 %2378  ;;  %v2499_v1 = vsel %vm1811_vm7, %v3454_v8, 0.0 }
0x1818   :  { %2383 = vst.msk [vmem:[#allocation2 + $0x8] sm:$0xff] %vm1137_vm5, %v2379_v10 }
0x1819   :  { %2500 = vadd.xlane.f32.xlu0 %v2499_v1 }
0x182f   :  { %2508 = vrot.lane.b32.xlu0 %v4472_v54, %s3817_s28 }
0x1833   :  { %2376 = vrot.lane.b32.xlu0 %v2322_v40, %s3819_s16 }
0x18a2   :  { %v2498_v12 = vpop.xlane.xlu0 %2497 }
0x18a3   :  { %3455 = vrcp.f32 %v2498_v12  ;;  %v3468_v12 = vld [vmem:[#allocation3] sm:$0xf] }
0x18a6   :  { %v2501_v13 = vpop.xlane.xlu0 %2500 }
0x18a7   :  { %3457 = vrcp.f32 %v2501_v13  ;;  %v2712_v13 = vrot.slane %v3468_v12, %v2705_v11 }
0x18aa   :  { %v2509_v16 = vpop.permute.xlu0 %2508 }
0x18ab   :  { %3300 = vmatpush3.bf16.msra.mxu0 %v2509_v16 }
0x18ac   :  { %3311 = vmatprep.subr.bf16.mxu0 %v3809_v15 }
0x18ad   :  { %v3456_v17 = vpop.eup %3455 }
0x18ae   :  { %v2504_v50 = vmul.f32 %v3456_v17, %v3452_v57  ;;  %v2377_v56 = vpop.permute.xlu0 %2376  ;;  %v3467_v57 = vld [vmem:[#allocation5] sm:$0xf] }
0x18af   :  { %2382 = vst.msk [vmem:[#allocation2] sm:$0xff] %vm1137_vm5, %v2377_v56  ;;  %v2706_v0 = vrot.slane %v3467_v57, %v2705_v11 }
0x18b0   :  { %v2506_v18 = vpack.c.bf16 %v2504_v50, %v2504_v50 }
0x18b1   :  { %v3458_v19 = vpop.eup %3457 }
0x18b2   :  { %v2505_v20 = vmul.f32 %v3458_v19, %v3454_v8  ;;  %3302 = vmatmul.mubr.msk.bf16.vlgmr.msra.gmra.mrb[68].mxu0 %vm1811_vm7, %v2506_v18  ;;  %v3383_v18 = vld [vmem:[%s4680_s23] sm:$0xff]   ;;  %v3385_v19 = vld [vmem:[%s4680_s23 + $0x10] sm:$0xff]  }
0x18b3   :  { %3315 = vmatprep.mubr.msk.bf16.mxu0 %vm3810_vm1, %v3809_v15  ;;  %3312 = vmatpush3.bf16.msra.mxu0 %v3379_v9 }
0x18b4   :  { %v2507_v54 = vpack.c.bf16 %v2505_v20, %v2505_v20  ;;  %3313 = vmatprep.subr.bf16.mxu0 %v3809_v15  ;;  %v3386_v20 = vld [vmem:[%s4680_s23 + $0x18] sm:$0xff]  }
0x18b6   :  { %3308 = vmatmul.mubr.msk.bf16.vlgmr.msra.gmra.mrb[76].mxu1 %vm1811_vm7, %v2507_v54  ;;  %v2966_v54 = vld [vmem:[#allocation22] ss:$0 sm:$0xff] }
0x18b7   :  { %3323 = vmatprep.mubr.msk.bf16.mxu1 %vm3810_vm1, %v3809_v15  ;;  %3314 = vmatpush3.bf16.msra.mxu0 %v3380_v7 }
0x18b8   :  { %3327 = vmatprep.subr.bf16.mxu0 %v3809_v15  ;;  %3320 = vmatpush3.bf16.msra.mxu1 %v3381_v29 }
0x18b9   :  { %3321 = vmatprep.subr.bf16.mxu1 %v3809_v15 }
0x18bc   :  { %3322 = vmatpush3.bf16.msra.mxu1 %v3382_v38 }
0x1985   :  { %v2548_v21 = vpop.f32.mrb[68].mxu0 }
0x1986   :  { %2602 = vrot.lane.b32.xlu0 %v2548_v21, %s3820_s3  ;;  %v3303_v5 = vpop.f32.mrb[69].mxu0 }
0x1987   :  { %v2551_v22 = vpop.f32.mrb[70].mxu0 }
0x1988   :  { %v3304_v24 = vpop.f32.mrb[71].mxu0 }
0x1989   :  { %v2594_v25 = vpop.f32.mrb[76].mxu1 }
0x198a   :  { %2604 = vrot.lane.b32.xlu1 %v2594_v25, %s3820_s3  ;;  %v3309_v28 = vpop.f32.mrb[77].mxu1 }
0x198b   :  { %v2597_v30 = vpop.f32.mrb[78].mxu1 }
0x198c   :  { %v3310_v31 = vpop.f32.mrb[79].mxu1 }
0x19f8   :  { %v2603_v32 = vpop.permute.xlu0 %2602 }
0x19f9   :  { %2608 = vst.msk [vmem:[#allocation2] sm:$0xff] %vm1368_vm6, %v2603_v32 }
0x19fc   :  { %v2605_v33 = vpop.permute.xlu1 %2604 }
0x19fd   :  { %2609 = vst.msk [vmem:[#allocation2 + $0x8] sm:$0xff] %vm1368_vm6, %v2605_v33 }
0x1a00   :  { %v2610_v4 = vld [vmem:[#allocation2] sm:$0xff] }
0x1a04   :  { %v2611_v34 = vld [vmem:[#allocation2 + $0x8] sm:$0xff] }
0x1a05   :  { %v2612_v14 = vpack.c.bf16 %v2611_v34, %v2610_v4 }
0x1a07   :  { %3316 = vmatmul.mubr.msk.bf16.vlgmr.msra.gmra.mrb[72].mxu0 %vm271_vm0, %v2612_v14 }
0x1a08   :  { %3335 = vmatprep.mubr.msk.bf16.mxu0 %vm3810_vm1, %v3809_v15  ;;  %3328 = vmatpush3.bf16.msra.mxu0 %v3383_v18 }
0x1a09   :  { %3329 = vmatprep.subr.bf16.mxu0 %v3809_v15 }
0x1a0c   :  { %3330 = vmatpush3.bf16.msra.mxu0 %v3384_v23 }
0x1a0d   :  { %3331 = vmatprep.subr.bf16.mxu0 %v3809_v15 }
0x1a10   :  { %3332 = vmatpush3.bf16.msra.mxu0 %v3385_v19 }
0x1a11   :  { %3333 = vmatprep.subr.bf16.mxu0 %v3809_v15 }
0x1a14   :  { %3334 = vmatpush3.bf16.msra.mxu0 %v3386_v20 }
0x1ada   :  { %v2668_v36 = vpop.f32.mrb[72].mxu0 }
0x1adb   :  { %v2669_v39 = vadd.f32 %v2962_v35, %v2668_v36  ;;  %v3317_v40 = vpop.f32.mrb[73].mxu0 }
0x1adc   :  { %v2671_v41 = vpop.f32.mrb[74].mxu0 }
0x1add   :  { %v4616_v51 = vadd.f32 %v2669_v39, %v4394_v60  ;;  %v2672_v42 = vadd.f32 %v2962_v35, %v2671_v41  ;;  %v3318_v43 = vpop.f32.mrb[75].mxu0 }
0x1adf   :  { %v4619_v44 = vadd.f32 %v2672_v42, %v4397_v63  ;;  %v2677_v45 = vsel %vm271_vm0, %v4616_v51, 0.0 }
0x1ae0   :  { %2678 = vadd.xlane.f32.xlu0 %v2677_v45 }
0x1ae1   :  { %v2680_v46 = vsel %vm271_vm0, %v4619_v44, 0.0 }
0x1ae2   :  { %2681 = vadd.xlane.f32.xlu1 %v2680_v46 }
0x1b6d   :  { %v2679_v47 = vpop.xlane.xlu0 %2678 }
0x1b6e   :  { %v2683_v48 = vmul.f32 0.03125, %v2679_v47 }
0x1b6f   :  { %v2682_v49 = vpop.xlane.xlu1 %2681 }
0x1b70   :  { %v2685_v52 = vsub.f32 %v4616_v51, %v2683_v48  ;;  %v2684_v60 = vmul.f32 0.03125, %v2682_v49  ;;  %v2975_v48 = vld [vmem:[#allocation23] ss:$0 sm:$0xff] }
0x1b72   :  { %v2686_v53 = vsub.f32 %v4619_v44, %v2684_v60  ;;  %v2687_v55 = vmul.f32 %v2685_v52, %v2685_v52 }
0x1b74   :  { %v2689_v63 = vsel %vm271_vm0, %v2687_v55, 0.0  ;;  %v2688_v58 = vmul.f32 %v2686_v53, %v2686_v53 }
0x1b75   :  { %2690 = vadd.xlane.f32.xlu0 %v2689_v63 }
0x1b76   :  { %v2692_v26 = vsel %vm271_vm0, %v2688_v58, 0.0 }
0x1b79   :  { %2693 = vadd.xlane.f32.xlu0 %v2692_v26 }
0x1c02   :  { %v2691_v59 = vpop.xlane.xlu0 %2690 }
0x1c03   :  { %v2695_v61 = vmul.f32 0.03125, %v2691_v59 }
0x1c05   :  { %v2697_v62 = vadd.f32 1e-05, %v2695_v61 }
0x1c06   :  { %v2694_v2 = vpop.xlane.xlu0 %2693 }
0x1c07   :  { %3459 = vrsqrt.f32 %v2697_v62  ;;  %v2696_v3 = vmul.f32 0.03125, %v2694_v2 }
0x1c09   :  { %v2698_v6 = vadd.f32 1e-05, %v2696_v3 }
0x1c0b   :  { %3461 = vrsqrt.f32 %v2698_v6 }
0x1c11   :  { %v3460_v27 = vpop.eup %3459 }
0x1c12   :  { %v2701_v37 = vmul.f32 %v3460_v27, %v2685_v52 }
0x1c14   :  { %v2707_v10 = vadd.f32 %v2706_v0, %v2701_v37 }
0x1c15   :  { %v3462_v8 = vpop.eup %3461 }
0x1c16   :  { %v2702_v1 = vmul.f32 %v3462_v8, %v2686_v53  ;;  %v2713_v17 = vmul.f32 %v2712_v13, %v2707_v10 }
0x1c18   :  { %v2708_v16 = vadd.f32 %v2706_v0, %v2702_v1 }
0x1c1a   :  { %v2714_v50 = vmul.f32 %v2712_v13, %v2708_v16 }
0x1c1c   :  { %v2715_v56 = vpack.c.bf16 %v2714_v50, %v2713_v17 }
0x1c1e   :  { %3324 = vmatmul.mubr.msk.bf16.vlgmr.msra.gmra.mrb[80].mxu1 %vm271_vm0, %v2715_v56 }
0x1cf1   :  { %v2776_v9 = vpop.f32.mrb[80].mxu1 }
0x1cf2   :  { %v2777_v7 = vadd.f32 %v2966_v54, %v2776_v9  ;;  %v3325_v21 = vpop.f32.mrb[81].mxu1 }
0x1cf3   :  { %v2779_v5 = vpop.f32.mrb[82].mxu1 }
0x1cf4   :  { %v2785_v22 = vmul.f32 0.044715, %v2777_v7  ;;  %v2780_v24 = vadd.f32 %v2966_v54, %v2779_v5  ;;  %v3326_v25 = vpop.f32.mrb[83].mxu1  ;;  %v2783_v40 = vmul.f32 0.5, %v2777_v7 }
0x1cf6   :  { %v2787_v28 = vmul.f32 %v2785_v22, %v2777_v7  ;;  %v2786_v30 = vmul.f32 0.044715, %v2780_v24  ;;  %v2784_v41 = vmul.f32 0.5, %v2780_v24 }
0x1cf8   :  { %v2789_v31 = vmul.f32 %v2787_v28, %v2777_v7  ;;  %v2788_v32 = vmul.f32 %v2786_v30, %v2780_v24 }
0x1cfa   :  { %v2791_v33 = vadd.f32 %v2789_v31, %v2777_v7  ;;  %v2790_v4 = vmul.f32 %v2788_v32, %v2780_v24 }
0x1cfc   :  { %v2793_v34 = vmul.f32 0.7978846, %v2791_v33  ;;  %v2792_v14 = vadd.f32 %v2790_v4, %v2780_v24 }
0x1cfe   :  { %3463 = vtanh.f32 %v2793_v34  ;;  %v2794_v35 = vmul.f32 0.7978846, %v2792_v14 }
0x1d00   :  { %3465 = vtanh.f32 %v2794_v35 }
0x1d08   :  { %v3464_v15 = vpop.eup %3463 }
0x1d09   :  { %v2797_v36 = vadd.f32 1.0, %v3464_v15 }
0x1d0a   :  { %v3466_v39 = vpop.eup %3465 }
0x1d0b   :  { %v2798_v42 = vadd.f32 1.0, %v3466_v39  ;;  %v2799_v43 = vmul.f32 %v2797_v36, %v2783_v40 }
0x1d0d   :  { %v2800_v45 = vmul.f32 %v2798_v42, %v2784_v41 }
0x1d0f   :  { %v2801_v46 = vpack.c.bf16 %v2800_v45, %v2799_v43 }
0x1d11   :  { %3336 = vmatmul.mubr.msk.bf16.vlgmr.msra.gmra.mrb[76].mxu0 %vm2834_vm8, %v2801_v46 }
0x1de4   :  { %v2872_v47 = vpop.f32.mrb[76].mxu0 }
0x1de5   :  { %v2879_v49 = vadd.f32 %v2872_v47, %v4616_v51  ;;  %v3337_v52 = vpop.f32.mrb[77].mxu0 }
0x1de6   :  { %v2875_v60 = vpop.f32.mrb[78].mxu0 }
0x1de7   :  { %v2888_v53 = vadd.f32 %v2975_v48, %v2879_v49  ;;  %v2880_v55 = vadd.f32 %v2875_v60, %v4619_v44  ;;  %v3338_v63 = vpop.f32.mrb[79].mxu0 }
0x1de9   :  { %2890 = vst.msk [vmem:[%s4682_s25] sm:$0xff] %vm271_vm0, %v2888_v53  ;;  %v2889_v58 = vadd.f32 %v2975_v48, %v2880_v55 }
0x1deb   :  { %2891 = vst.msk [vmem:[%s4682_s25 + $0x8] sm:$0xff] %vm271_vm0, %v2889_v58 }
0x1dec   :  { %2896 = vsyncpa [#allocation4], 1 }
0x1ded   :  { %2897 = vsyncpa [#allocation6], 1 }
0x1dee   :  { %2898 = vsyncpa [#allocation9], 1 }
0x1def   :  { %2899 = vsyncpa [#allocation12], 1 }
0x1df0   :  { %2900 = vsyncpa [#allocation15], 1 }
0x1df1   :  { %2901 = vsyncpa [#allocation18], 1 }
0x1df2   :  { %2902 = vsyncpa [#allocation21], 1 }
0x1df3   :  { %2903 = vsyncpa [#allocation24], 1 }

</bundles_post_ra>
